<compile_context>
chip_gen: v6e
topology: v6e:2x2x1
jax: 0.10.0
libtpu: 0.0.40
codegen_flags: <defaults>
</compile_context>

<pallas_src>
import math

import jax
import jax.numpy as jnp
import numpy as np
from jax import lax
from jax.experimental import pallas as pl
from jax.experimental.pallas import tpu as pltpu


# ----------------------------- Pallas kernel ------------------------------ #
def diffusion_kernel(
    t_ref, fs_ref, phase_ref, x_ref,
    w1_ref, b1_ref,                      # time-MLP layer 1
    w2_ref, b2_ref,                      # time-MLP layer 2
    wp_ref, bp_ref,                      # proj
    wm1_ref, bm1_ref, wm2_ref, bm2_ref,
    wm3_ref, bm3_ref, wm4_ref, bm4_ref,  # backbone MLP (wm4 lane-padded)
    out_ref,
):
    f32 = jnp.float32
    bf16 = jnp.bfloat16

    # --- sinusoidal timestep embedding, lane-dense ---
    # fs_ref = [fs, fs], phase_ref = [pi/2]*mid ++ [0]*mid, so
    # sin(t*fs_dup + phase) == [cos(t*fs), sin(t*fs)]: one full-width EUP pass, no concat.
    args = t_ref[...] * fs_ref[...] + phase_ref[...]          # (Bt|1, dim_emb) f32
    emb0 = jnp.sin(args)

    # --- TimeStepEmbedding.fc : Linear -> SiLU -> Linear (bf16 MXU, f32 accumulate) ---
    h = jnp.dot(emb0.astype(bf16), w1_ref[...], preferred_element_type=f32) + b1_ref[...]
    h = h * jax.nn.sigmoid(h)                                 # SiLU in f32
    emb = jnp.dot(h.astype(bf16), w2_ref[...], preferred_element_type=f32) + b2_ref[...]

    # --- proj(x) + emb  (emb broadcasts over the batch tile when t is shared) ---
    z = (jnp.dot(x_ref[...].astype(bf16), wp_ref[...], preferred_element_type=f32)
         + bp_ref[...] + emb).astype(bf16)

    # --- backbone MLP: 3 hidden ReLU layers + linear head (lane-padded output) ---
    # bias add in f32, then ReLU fused with the bf16 downcast (half-width VPU pass).
    def relu_bf16(acc, b_ref):
        return jnp.maximum((acc + b_ref[...]).astype(bf16), 0)

    h1 = relu_bf16(jnp.dot(z, wm1_ref[...], preferred_element_type=f32), bm1_ref)
    h2 = relu_bf16(jnp.dot(h1, wm2_ref[...], preferred_element_type=f32), bm2_ref)
    h3 = relu_bf16(jnp.dot(h2, wm3_ref[...], preferred_element_type=f32), bm3_ref)
    out_ref[...] = (jnp.dot(h3, wm4_ref[...], preferred_element_type=f32) + bm4_ref[...])


# ------------------------------- wrapper ----------------------------------- #
def _pick_batch_tile(B, target=512):
    """Largest MXU-friendly tile <= target that still leaves >=2 grid steps (v7x megacore)."""
    if B <= 128:
        return 128
    half = (B // 2 // 128) * 128
    return min(target, max(128, half if half > 0 else 128))


def diffusion_forward(x, t, params, *, batch_tile=None, shared_t=False):
    """x: (B, dim_in) f32, t: (B,) or scalar timesteps. Returns (B, dim_in) f32.

    shared_t=True: all rows use the same timestep (DDPM sampling path); the time
    embedding is computed once per tile as a (1, dim_emb) row and broadcast.
    """
    B, dim_in = x.shape
    dim_emb = params["wp"].shape[1]
    hidden = params["wm1"].shape[1]
    out_pad = params["wm4"].shape[1]     # dim_in rounded up to a multiple of 128

    if batch_tile is None:
        batch_tile = _pick_batch_tile(B)
    n_blocks = pl.cdiv(B, batch_tile)
    B_pad = n_blocks * batch_tile

    x_p = jnp.pad(x, ((0, B_pad - B), (0, 0))) if B_pad != B else x

    if shared_t:
        t2d = jnp.reshape(t, (-1,))[:1].astype(jnp.float32).reshape(1, 1)
        t_spec = pl.BlockSpec((1, 1), lambda i: (0, 0))        # resident scalar
    else:
        t_flat = jnp.reshape(t, (-1,))
        t_p = jnp.pad(t_flat, (0, B_pad - B)) if B_pad != B else t_flat
        t2d = t_p.astype(jnp.float32).reshape(B_pad, 1)
        t_spec = pl.BlockSpec((batch_tile, 1), lambda i: (i, 0))

    weight_ops = (
        params["w1"], params["b1"],
        params["w2"], params["b2"],
        params["wp"], params["bp"],
        params["wm1"], params["bm1"], params["wm2"], params["bm2"],
        params["wm3"], params["bm3"], params["wm4"], params["bm4"],
    )
    operands = (t2d, params["fs2"], params["phase"], x_p) + weight_ops

    # Weights/biases are resident: index_map always returns block (0, 0), so Pallas
    # DMAs them once and keeps them in VMEM across grid steps (~0.5 MiB in bf16).
    # (Consolidating them into one slab is a possible further DMA-descriptor trim; minor.)
    def resident(p):
        return pl.BlockSpec(p.shape, lambda i: (0, 0))

    in_specs = [
        t_spec,                                                 # t
        resident(params["fs2"]),                                # duplicated freqs
        resident(params["phase"]),                              # cos/sin phase offsets
        pl.BlockSpec((batch_tile, dim_in), lambda i: (i, 0)),   # x
    ] + [resident(p) for p in weight_ops]

    out_spec = pl.BlockSpec((batch_tile, out_pad), lambda i: (i, 0))

    B_emb = 1 if shared_t else B_pad
    weight_bytes = sum(int(p.size) * p.dtype.itemsize for p in weight_ops)
    cost = pl.CostEstimate(
        flops=2 * (B_emb * (dim_emb * dim_emb * 2)              # time-MLP (2 layers)
                   + B_pad * (dim_in * dim_emb                  # proj
                              + dim_emb * hidden
                              + hidden * hidden * 2
                              + hidden * out_pad)),
        transcendentals=B_emb * 2 * dim_emb,                    # sin + sigmoid
        bytes_accessed=(x_p.size * x_p.dtype.itemsize
                        + t2d.size * 4
                        + B_pad * out_pad * 4
                        + weight_bytes),
    )

    out = pl.pallas_call(
        diffusion_kernel,
        out_shape=jax.ShapeDtypeStruct((B_pad, out_pad), jnp.float32),
        grid=(n_blocks,),
        in_specs=in_specs,
        out_specs=out_spec,
        compiler_params=pltpu.CompilerParams(
            dimension_semantics=("parallel",),     # megacore-shard batch tiles (v7x)
        ),
        cost_estimate=cost,
    )(*operands)

    return out[:B, :dim_in]


# ---------------------- deterministic parameter init ----------------------- #
def init_params(key, dim_in, dim_emb, hidden, max_period):
    """PyTorch-style Linear init U(-1/sqrt(fan_in), 1/sqrt(fan_in)).

    Weights stored transposed (in, out) in bf16; biases stay f32. The output head
    (wm4/bm4) is zero-padded along its output dim to a multiple of 128 lanes.
    """
    assert dim_emb % 2 == 0, "sinusoidal embedding dim must be even"
    out_pad = -(-dim_in // 128) * 128
    mid = dim_emb // 2

    def linear(k, fan_in, fan_out, pad_out=None):
        kw, kb = jax.random.split(k)
        bound = 1.0 / math.sqrt(fan_in)
        w = jax.random.uniform(kw, (fan_in, fan_out), jnp.float32, -bound, bound)
        b = jax.random.uniform(kb, (1, fan_out), jnp.float32, -bound, bound)
        if pad_out is not None and pad_out > fan_out:
            w = jnp.pad(w, ((0, 0), (0, pad_out - fan_out)))
            b = jnp.pad(b, ((0, 0), (0, pad_out - fan_out)))
        return w.astype(jnp.bfloat16), b

    ks = jax.random.split(key, 7)

    w1, b1 = linear(ks[0], dim_emb, dim_emb)              # time-MLP layer 1
    w2, b2 = linear(ks[1], dim_emb, dim_emb)              # time-MLP layer 2
    wp, bp = linear(ks[2], dim_in, dim_emb)               # proj
    wm1, bm1 = linear(ks[3], dim_emb, hidden)
    wm2, bm2 = linear(ks[4], hidden, hidden)
    wm3, bm3 = linear(ks[5], hidden, hidden)
    wm4, bm4 = linear(ks[6], hidden, dim_in, pad_out=out_pad)

    fs_row = jnp.exp(-math.log(max_period) / mid * jnp.arange(mid, dtype=jnp.float32))
    fs = fs_row.reshape(1, mid)                            # reference form
    fs2 = jnp.concatenate([fs_row, fs_row]).reshape(1, dim_emb)     # kernel: duplicated
    phase = jnp.concatenate([jnp.full((mid,), math.pi / 2, jnp.float32),
                             jnp.zeros((mid,), jnp.float32)]).reshape(1, dim_emb)

    return dict(
        fs=fs, fs2=fs2, phase=phase,
        w1=w1, b1=b1, w2=w2, b2=b2,
        wp=wp, bp=bp,
        wm1=wm1, bm1=bm1, wm2=wm2, bm2=bm2,
        wm3=wm3, bm3=bm3, wm4=wm4, bm4=bm4,
    )


# ------------------------------- reference --------------------------------- #
def reference_forward(x, t, params):
    """f32 reference (bf16 weights upcast, f32 activations throughout)."""
    f = lambda name: params[name].astype(jnp.float32)
    args = t.astype(jnp.float32)[:, None] * params["fs"]
    emb0 = jnp.concatenate([jnp.cos(args), jnp.sin(args)], axis=-1)
    h = emb0 @ f("w1") + params["b1"]
    h = h * jax.nn.sigmoid(h)
    emb = h @ f("w2") + params["b2"]
    z = x @ f("wp") + params["bp"] + emb
    h1 = jnp.maximum(z @ f("wm1") + params["bm1"], 0.0)
    h2 = jnp.maximum(h1 @ f("wm2") + params["bm2"], 0.0)
    h3 = jnp.maximum(h2 @ f("wm3") + params["bm3"], 0.0)
    out = h3 @ f("wm4") + params["bm4"]
    return out[:, :x.shape[1]]


# --------------------------------- main ------------------------------------ #
if __name__ == "__main__":
    B, DIM_IN, DIM_EMB, HIDDEN, MAX_T = 256, 16, 128, 256, 10000

    key = jax.random.PRNGKey(0)
    kx, kt, kp = jax.random.split(key, 3)

    x = jax.random.normal(kx, (B, DIM_IN), jnp.float32)
    t = jax.random.randint(kt, (B,), 0, 1000, jnp.int32)
    params = init_params(kp, DIM_IN, DIM_EMB, HIDDEN, MAX_T)

    # 1) training-style per-row timesteps (adaptive tile -> 128, 2 parallel grid steps)
    out = jax.block_until_ready(diffusion_forward(x, t, params))
    ref = jax.block_until_ready(reference_forward(x, t, params))
    # bf16 matmul inputs with f32 accumulation vs. pure-f32-activation reference
    np.testing.assert_allclose(np.asarray(out), np.asarray(ref), rtol=2e-2, atol=2e-2)

    # 2) sampling-style shared timestep: time-MLP computed once per tile and broadcast
    t_shared = jnp.full((B,), 37, jnp.int32)
    out_s = jax.block_until_ready(diffusion_forward(x, t_shared, params, shared_t=True))
    ref_s = jax.block_until_ready(reference_forward(x, t_shared, params))
    np.testing.assert_allclose(np.asarray(out_s), np.asarray(ref_s), rtol=2e-2, atol=2e-2)

    # 3) jitted multi-step usage (dispatch amortized across sampling steps via scan)
    @jax.jit
    def euler_steps(x0, ts):
        def step(xc, tc):
            eps = diffusion_forward(xc, jnp.full((xc.shape[0],), tc), params, shared_t=True)
            return xc - 0.01 * eps, None
        xf, _ = lax.scan(step, x0, ts)
        return xf

    xs = jax.block_until_ready(euler_steps(x, jnp.arange(4, dtype=jnp.int32)))
    assert xs.shape == x.shape and bool(jnp.isfinite(xs).all())

    print("KERNEL_OK")
</pallas_src>

<mosaic_0001>
module attributes {stable_mosaic.version = 11 : i64} {
  func.func @diffusion_kernel(%arg0: i32, %arg1: memref<128x1xf32, #tpu.memory_space<vmem>>, %arg2: memref<1x128xf32, #tpu.memory_space<vmem>>, %arg3: memref<1x128xf32, #tpu.memory_space<vmem>>, %arg4: memref<128x16xf32, #tpu.memory_space<vmem>>, %arg5: memref<128x128xbf16, #tpu.memory_space<vmem>>, %arg6: memref<1x128xf32, #tpu.memory_space<vmem>>, %arg7: memref<128x128xbf16, #tpu.memory_space<vmem>>, %arg8: memref<1x128xf32, #tpu.memory_space<vmem>>, %arg9: memref<16x128xbf16, #tpu.memory_space<vmem>>, %arg10: memref<1x128xf32, #tpu.memory_space<vmem>>, %arg11: memref<128x256xbf16, #tpu.memory_space<vmem>>, %arg12: memref<1x256xf32, #tpu.memory_space<vmem>>, %arg13: memref<256x256xbf16, #tpu.memory_space<vmem>>, %arg14: memref<1x256xf32, #tpu.memory_space<vmem>>, %arg15: memref<256x256xbf16, #tpu.memory_space<vmem>>, %arg16: memref<1x256xf32, #tpu.memory_space<vmem>>, %arg17: memref<256x128xbf16, #tpu.memory_space<vmem>>, %arg18: memref<1x128xf32, #tpu.memory_space<vmem>>, %arg19: memref<128x128xf32, #tpu.memory_space<vmem>>) attributes {dimension_semantics = [#tpu.dimension_semantics<parallel>], iteration_bounds = array<i64: 2>, scalar_prefetch = 0 : i64, scratch_operands = 0 : i64, tpu.core_type = #tpu.core_type<tc>, window_params = [{transform_indices = @transform_0, window_bounds = array<i64: 128, 1>}, {pipeline_mode = #tpu.pipeline_mode<synchronous>, transform_indices = @transform_1, window_bounds = array<i64: 1, 128>}, {pipeline_mode = #tpu.pipeline_mode<synchronous>, transform_indices = @transform_2, window_bounds = array<i64: 1, 128>}, {transform_indices = @transform_3, window_bounds = array<i64: 128, 16>}, {pipeline_mode = #tpu.pipeline_mode<synchronous>, transform_indices = @transform_4, window_bounds = array<i64: 128, 128>}, {pipeline_mode = #tpu.pipeline_mode<synchronous>, transform_indices = @transform_5, window_bounds = array<i64: 1, 128>}, {pipeline_mode = #tpu.pipeline_mode<synchronous>, transform_indices = @transform_6, window_bounds = array<i64: 128, 128>}, {pipeline_mode = #tpu.pipeline_mode<synchronous>, transform_indices = @transform_7, window_bounds = array<i64: 1, 128>}, {pipeline_mode = #tpu.pipeline_mode<synchronous>, transform_indices = @transform_8, window_bounds = array<i64: 16, 128>}, {pipeline_mode = #tpu.pipeline_mode<synchronous>, transform_indices = @transform_9, window_bounds = array<i64: 1, 128>}, {pipeline_mode = #tpu.pipeline_mode<synchronous>, transform_indices = @transform_10, window_bounds = array<i64: 128, 256>}, {pipeline_mode = #tpu.pipeline_mode<synchronous>, transform_indices = @transform_11, window_bounds = array<i64: 1, 256>}, {pipeline_mode = #tpu.pipeline_mode<synchronous>, transform_indices = @transform_12, window_bounds = array<i64: 256, 256>}, {pipeline_mode = #tpu.pipeline_mode<synchronous>, transform_indices = @transform_13, window_bounds = array<i64: 1, 256>}, {pipeline_mode = #tpu.pipeline_mode<synchronous>, transform_indices = @transform_14, window_bounds = array<i64: 256, 256>}, {pipeline_mode = #tpu.pipeline_mode<synchronous>, transform_indices = @transform_15, window_bounds = array<i64: 1, 256>}, {pipeline_mode = #tpu.pipeline_mode<synchronous>, transform_indices = @transform_16, window_bounds = array<i64: 256, 128>}, {pipeline_mode = #tpu.pipeline_mode<synchronous>, transform_indices = @transform_17, window_bounds = array<i64: 1, 128>}, {transform_indices = @transform_18, window_bounds = array<i64: 128, 128>}]} {
    %c0 = arith.constant 0 : index
    %c0_0 = arith.constant 0 : index
    %0 = vector.load %arg1[%c0, %c0_0] : memref<128x1xf32, #tpu.memory_space<vmem>>, vector<128x1xf32>
    %c0_1 = arith.constant 0 : index
    %c0_2 = arith.constant 0 : index
    %1 = vector.load %arg2[%c0_1, %c0_2] : memref<1x128xf32, #tpu.memory_space<vmem>>, vector<1x128xf32>
    %2 = vector.broadcast %0 : vector<128x1xf32> to vector<128x128xf32>
    %3 = vector.broadcast %1 : vector<1x128xf32> to vector<128x128xf32>
    %4 = arith.mulf %2, %3 : vector<128x128xf32>
    %c0_3 = arith.constant 0 : index
    %c0_4 = arith.constant 0 : index
    %5 = vector.load %arg3[%c0_3, %c0_4] : memref<1x128xf32, #tpu.memory_space<vmem>>, vector<1x128xf32>
    %6 = vector.broadcast %5 : vector<1x128xf32> to vector<128x128xf32>
    %7 = arith.addf %4, %6 : vector<128x128xf32>
    %8 = math.sin %7 : vector<128x128xf32>
    %9 = arith.truncf %8 : vector<128x128xf32> to vector<128x128xbf16>
    %c0_5 = arith.constant 0 : index
    %c0_6 = arith.constant 0 : index
    %10 = vector.load %arg5[%c0_5, %c0_6] : memref<128x128xbf16, #tpu.memory_space<vmem>>, vector<128x128xbf16>
    %cst = arith.constant dense<0.000000e+00> : vector<128x128xf32>
    %11 = tpu.matmul %9, %10, %cst {dimension_numbers = #tpu.dot_dimension_numbers<[1], [0], [0], [1], [0, 0, 1, 1], [], []>} : vector<128x128xbf16>, vector<128x128xbf16>, vector<128x128xf32> -> vector<128x128xf32>
    %c0_7 = arith.constant 0 : index
    %c0_8 = arith.constant 0 : index
    %12 = vector.load %arg6[%c0_7, %c0_8] : memref<1x128xf32, #tpu.memory_space<vmem>>, vector<1x128xf32>
    %13 = vector.broadcast %12 : vector<1x128xf32> to vector<128x128xf32>
    %14 = arith.addf %11, %13 : vector<128x128xf32>
    %15 = arith.negf %14 : vector<128x128xf32>
    %16 = math.exp %15 : vector<128x128xf32>
    %cst_9 = arith.constant 1.000000e+00 : f32
    %17 = vector.broadcast %cst_9 : f32 to vector<128x128xf32>
    %18 = arith.addf %17, %16 : vector<128x128xf32>
    %19 = arith.divf %17, %18 : vector<128x128xf32>
    %20 = arith.mulf %14, %19 : vector<128x128xf32>
    %21 = arith.truncf %20 : vector<128x128xf32> to vector<128x128xbf16>
    %c0_10 = arith.constant 0 : index
    %c0_11 = arith.constant 0 : index
    %22 = vector.load %arg7[%c0_10, %c0_11] : memref<128x128xbf16, #tpu.memory_space<vmem>>, vector<128x128xbf16>
    %cst_12 = arith.constant dense<0.000000e+00> : vector<128x128xf32>
    %23 = tpu.matmul %21, %22, %cst_12 {dimension_numbers = #tpu.dot_dimension_numbers<[1], [0], [0], [1], [0, 0, 1, 1], [], []>} : vector<128x128xbf16>, vector<128x128xbf16>, vector<128x128xf32> -> vector<128x128xf32>
    %c0_13 = arith.constant 0 : index
    %c0_14 = arith.constant 0 : index
    %24 = vector.load %arg8[%c0_13, %c0_14] : memref<1x128xf32, #tpu.memory_space<vmem>>, vector<1x128xf32>
    %25 = vector.broadcast %24 : vector<1x128xf32> to vector<128x128xf32>
    %26 = arith.addf %23, %25 : vector<128x128xf32>
    %c0_15 = arith.constant 0 : index
    %c0_16 = arith.constant 0 : index
    %27 = vector.load %arg4[%c0_15, %c0_16] : memref<128x16xf32, #tpu.memory_space<vmem>>, vector<128x16xf32>
    %28 = arith.truncf %27 : vector<128x16xf32> to vector<128x16xbf16>
    %c0_17 = arith.constant 0 : index
    %c0_18 = arith.constant 0 : index
    %29 = vector.load %arg9[%c0_17, %c0_18] : memref<16x128xbf16, #tpu.memory_space<vmem>>, vector<16x128xbf16>
    %cst_19 = arith.constant dense<0.000000e+00> : vector<128x128xf32>
    %30 = tpu.matmul %28, %29, %cst_19 {dimension_numbers = #tpu.dot_dimension_numbers<[1], [0], [0], [1], [0, 0, 1, 1], [], []>} : vector<128x16xbf16>, vector<16x128xbf16>, vector<128x128xf32> -> vector<128x128xf32>
    %c0_20 = arith.constant 0 : index
    %c0_21 = arith.constant 0 : index
    %31 = vector.load %arg10[%c0_20, %c0_21] : memref<1x128xf32, #tpu.memory_space<vmem>>, vector<1x128xf32>
    %32 = vector.broadcast %31 : vector<1x128xf32> to vector<128x128xf32>
    %33 = arith.addf %30, %32 : vector<128x128xf32>
    %34 = arith.addf %33, %26 : vector<128x128xf32>
    %35 = arith.truncf %34 : vector<128x128xf32> to vector<128x128xbf16>
    %c0_22 = arith.constant 0 : index
    %c0_23 = arith.constant 0 : index
    %36 = vector.load %arg11[%c0_22, %c0_23] : memref<128x256xbf16, #tpu.memory_space<vmem>>, vector<128x256xbf16>
    %cst_24 = arith.constant dense<0.000000e+00> : vector<128x256xf32>
    %37 = tpu.matmul %35, %36, %cst_24 {dimension_numbers = #tpu.dot_dimension_numbers<[1], [0], [0], [1], [0, 0, 1, 1], [], []>} : vector<128x128xbf16>, vector<128x256xbf16>, vector<128x256xf32> -> vector<128x256xf32>
    %c0_25 = arith.constant 0 : index
    %c0_26 = arith.constant 0 : index
    %38 = vector.load %arg12[%c0_25, %c0_26] : memref<1x256xf32, #tpu.memory_space<vmem>>, vector<1x256xf32>
    %39 = vector.broadcast %38 : vector<1x256xf32> to vector<128x256xf32>
    %40 = arith.addf %37, %39 : vector<128x256xf32>
    %41 = arith.truncf %40 : vector<128x256xf32> to vector<128x256xbf16>
    %cst_27 = arith.constant 0.000000e+00 : bf16
    %42 = vector.broadcast %cst_27 : bf16 to vector<128x256xbf16>
    %43 = arith.maximumf %41, %42 : vector<128x256xbf16>
    %c0_28 = arith.constant 0 : index
    %c0_29 = arith.constant 0 : index
    %44 = vector.load %arg13[%c0_28, %c0_29] : memref<256x256xbf16, #tpu.memory_space<vmem>>, vector<256x256xbf16>
    %cst_30 = arith.constant dense<0.000000e+00> : vector<128x256xf32>
    %45 = tpu.matmul %43, %44, %cst_30 {dimension_numbers = #tpu.dot_dimension_numbers<[1], [0], [0], [1], [0, 0, 1, 1], [], []>} : vector<128x256xbf16>, vector<256x256xbf16>, vector<128x256xf32> -> vector<128x256xf32>
    %c0_31 = arith.constant 0 : index
    %c0_32 = arith.constant 0 : index
    %46 = vector.load %arg14[%c0_31, %c0_32] : memref<1x256xf32, #tpu.memory_space<vmem>>, vector<1x256xf32>
    %47 = vector.broadcast %46 : vector<1x256xf32> to vector<128x256xf32>
    %48 = arith.addf %45, %47 : vector<128x256xf32>
    %49 = arith.truncf %48 : vector<128x256xf32> to vector<128x256xbf16>
    %cst_33 = arith.constant 0.000000e+00 : bf16
    %50 = vector.broadcast %cst_33 : bf16 to vector<128x256xbf16>
    %51 = arith.maximumf %49, %50 : vector<128x256xbf16>
    %c0_34 = arith.constant 0 : index
    %c0_35 = arith.constant 0 : index
    %52 = vector.load %arg15[%c0_34, %c0_35] : memref<256x256xbf16, #tpu.memory_space<vmem>>, vector<256x256xbf16>
    %cst_36 = arith.constant dense<0.000000e+00> : vector<128x256xf32>
    %53 = tpu.matmul %51, %52, %cst_36 {dimension_numbers = #tpu.dot_dimension_numbers<[1], [0], [0], [1], [0, 0, 1, 1], [], []>} : vector<128x256xbf16>, vector<256x256xbf16>, vector<128x256xf32> -> vector<128x256xf32>
    %c0_37 = arith.constant 0 : index
    %c0_38 = arith.constant 0 : index
    %54 = vector.load %arg16[%c0_37, %c0_38] : memref<1x256xf32, #tpu.memory_space<vmem>>, vector<1x256xf32>
    %55 = vector.broadcast %54 : vector<1x256xf32> to vector<128x256xf32>
    %56 = arith.addf %53, %55 : vector<128x256xf32>
    %57 = arith.truncf %56 : vector<128x256xf32> to vector<128x256xbf16>
    %cst_39 = arith.constant 0.000000e+00 : bf16
    %58 = vector.broadcast %cst_39 : bf16 to vector<128x256xbf16>
    %59 = arith.maximumf %57, %58 : vector<128x256xbf16>
    %c0_40 = arith.constant 0 : index
    %c0_41 = arith.constant 0 : index
    %60 = vector.load %arg17[%c0_40, %c0_41] : memref<256x128xbf16, #tpu.memory_space<vmem>>, vector<256x128xbf16>
    %cst_42 = arith.constant dense<0.000000e+00> : vector<128x128xf32>
    %61 = tpu.matmul %59, %60, %cst_42 {dimension_numbers = #tpu.dot_dimension_numbers<[1], [0], [0], [1], [0, 0, 1, 1], [], []>} : vector<128x256xbf16>, vector<256x128xbf16>, vector<128x128xf32> -> vector<128x128xf32>
    %c0_43 = arith.constant 0 : index
    %c0_44 = arith.constant 0 : index
    %62 = vector.load %arg18[%c0_43, %c0_44] : memref<1x128xf32, #tpu.memory_space<vmem>>, vector<1x128xf32>
    %63 = vector.broadcast %62 : vector<1x128xf32> to vector<128x128xf32>
    %64 = arith.addf %61, %63 : vector<128x128xf32>
    %c0_45 = arith.constant 0 : index
    %c0_46 = arith.constant 0 : index
    %65 = vector.load %arg19[%c0_45, %c0_46] : memref<128x128xf32, #tpu.memory_space<vmem>>, vector<128x128xf32>
    tpu.vector_store %arg19[%c0_45, %c0_46], %64 {strides = array<i32>} : memref<128x128xf32, #tpu.memory_space<vmem>>, vector<128x128xf32>,
    return
  }
  func.func @transform_0(%arg0: i32) -> (i32, i32) {
    %c0_i32 = arith.constant 0 : i32
    %c0_i32_0 = arith.constant 0 : i32
    return %arg0, %c0_i32 : i32, i32
  }
  func.func @transform_1(%arg0: i32) -> (i32, i32) {
    %c0_i32 = arith.constant 0 : i32
    %c0_i32_0 = arith.constant 0 : i32
    %c0_i32_1 = arith.constant 0 : i32
    return %c0_i32, %c0_i32_0 : i32, i32
  }
  func.func @transform_2(%arg0: i32) -> (i32, i32) {
    %c0_i32 = arith.constant 0 : i32
    %c0_i32_0 = arith.constant 0 : i32
    %c0_i32_1 = arith.constant 0 : i32
    return %c0_i32, %c0_i32_0 : i32, i32
  }
  func.func @transform_3(%arg0: i32) -> (i32, i32) {
    %c0_i32 = arith.constant 0 : i32
    %c0_i32_0 = arith.constant 0 : i32
    return %arg0, %c0_i32 : i32, i32
  }
  func.func @transform_4(%arg0: i32) -> (i32, i32) {
    %c0_i32 = arith.constant 0 : i32
    %c0_i32_0 = arith.constant 0 : i32
    %c0_i32_1 = arith.constant 0 : i32
    return %c0_i32, %c0_i32_0 : i32, i32
  }
  func.func @transform_5(%arg0: i32) -> (i32, i32) {
    %c0_i32 = arith.constant 0 : i32
    %c0_i32_0 = arith.constant 0 : i32
    %c0_i32_1 = arith.constant 0 : i32
    return %c0_i32, %c0_i32_0 : i32, i32
  }
  func.func @transform_6(%arg0: i32) -> (i32, i32) {
    %c0_i32 = arith.constant 0 : i32
    %c0_i32_0 = arith.constant 0 : i32
    %c0_i32_1 = arith.constant 0 : i32
    return %c0_i32, %c0_i32_0 : i32, i32
  }
  func.func @transform_7(%arg0: i32) -> (i32, i32) {
    %c0_i32 = arith.constant 0 : i32
    %c0_i32_0 = arith.constant 0 : i32
    %c0_i32_1 = arith.constant 0 : i32
    return %c0_i32, %c0_i32_0 : i32, i32
  }
  func.func @transform_8(%arg0: i32) -> (i32, i32) {
    %c0_i32 = arith.constant 0 : i32
    %c0_i32_0 = arith.constant 0 : i32
    %c0_i32_1 = arith.constant 0 : i32
    return %c0_i32, %c0_i32_0 : i32, i32
  }
  func.func @transform_9(%arg0: i32) -> (i32, i32) {
    %c0_i32 = arith.constant 0 : i32
    %c0_i32_0 = arith.constant 0 : i32
    %c0_i32_1 = arith.constant 0 : i32
    return %c0_i32, %c0_i32_0 : i32, i32
  }
  func.func @transform_10(%arg0: i32) -> (i32, i32) {
    %c0_i32 = arith.constant 0 : i32
    %c0_i32_0 = arith.constant 0 : i32
    %c0_i32_1 = arith.constant 0 : i32
    return %c0_i32, %c0_i32_0 : i32, i32
  }
  func.func @transform_11(%arg0: i32) -> (i32, i32) {
    %c0_i32 = arith.constant 0 : i32
    %c0_i32_0 = arith.constant 0 : i32
    %c0_i32_1 = arith.constant 0 : i32
    return %c0_i32, %c0_i32_0 : i32, i32
  }
  func.func @transform_12(%arg0: i32) -> (i32, i32) {
    %c0_i32 = arith.constant 0 : i32
    %c0_i32_0 = arith.constant 0 : i32
    %c0_i32_1 = arith.constant 0 : i32
    return %c0_i32, %c0_i32_0 : i32, i32
  }
  func.func @transform_13(%arg0: i32) -> (i32, i32) {
    %c0_i32 = arith.constant 0 : i32
    %c0_i32_0 = arith.constant 0 : i32
    %c0_i32_1 = arith.constant 0 : i32
    return %c0_i32, %c0_i32_0 : i32, i32
  }
  func.func @transform_14(%arg0: i32) -> (i32, i32) {
    %c0_i32 = arith.constant 0 : i32
    %c0_i32_0 = arith.constant 0 : i32
    %c0_i32_1 = arith.constant 0 : i32
    return %c0_i32, %c0_i32_0 : i32, i32
  }
  func.func @transform_15(%arg0: i32) -> (i32, i32) {
    %c0_i32 = arith.constant 0 : i32
    %c0_i32_0 = arith.constant 0 : i32
    %c0_i32_1 = arith.constant 0 : i32
    return %c0_i32, %c0_i32_0 : i32, i32
  }
  func.func @transform_16(%arg0: i32) -> (i32, i32) {
    %c0_i32 = arith.constant 0 : i32
    %c0_i32_0 = arith.constant 0 : i32
    %c0_i32_1 = arith.constant 0 : i32
    return %c0_i32, %c0_i32_0 : i32, i32
  }
  func.func @transform_17(%arg0: i32) -> (i32, i32) {
    %c0_i32 = arith.constant 0 : i32
    %c0_i32_0 = arith.constant 0 : i32
    %c0_i32_1 = arith.constant 0 : i32
    return %c0_i32, %c0_i32_0 : i32, i32
  }
  func.func @transform_18(%arg0: i32) -> (i32, i32) {
    %c0_i32 = arith.constant 0 : i32
    %c0_i32_0 = arith.constant 0 : i32
    return %arg0, %c0_i32 : i32, i32
  }
}

</mosaic_0001>

<bundles_post_ra>
// kernel: tpu_custom_call.1
= control target key start
LH: loop header
LB: loop body
LE: loop exit
PB: predicated region body
PF: predicated region fallthrough
CT: control target
= control target key end

     0   :  { %s8127_s0 = inlined_call_operand.vmem [shape: f32[256,1], index: 0, kind: input, shape index: {}]   ;;  %s8128_s1 = inlined_call_operand.vmem [shape: f32[1,128], index: 1, kind: input, shape index: {}]   ;;  %s8129_s2 = inlined_call_operand.hbm [shape: f32[1,128], index: 2, kind: input, shape index: {}]   ;;  %s8130_s3 = inlined_call_operand.vmem [shape: f32[256,16], index: 3, kind: input, shape index: {}]   ;;  %s8131_s4 = inlined_call_operand.hbm [shape: bf16[128,128], index: 4, kind: input, shape index: {}]   ;;  %s8132_s5 = inlined_call_operand.hbm [shape: f32[1,128], index: 5, kind: input, shape index: {}]   ;;  %s8133_s6 = inlined_call_operand.hbm [shape: bf16[128,128], index: 6, kind: input, shape index: {}]   ;;  %s8134_s7 = inlined_call_operand.hbm [shape: f32[1,128], index: 7, kind: input, shape index: {}]   ;;  %s8135_s8 = inlined_call_operand.vmem [shape: bf16[16,128], index: 8, kind: input, shape index: {}]   ;;  %s8136_s9 = inlined_call_operand.vmem [shape: f32[1,128], index: 9, kind: input, shape index: {}]   ;;  %s8137_s10 = inlined_call_operand.hbm [shape: bf16[128,256], index: 10, kind: input, shape index: {}]   ;;  %s8138_s11 = inlined_call_operand.vmem [shape: f32[1,256], index: 11, kind: input, shape index: {}]   ;;  %s8139_s12 = inlined_call_operand.vmem [shape: bf16[256,256], index: 12, kind: input, shape index: {}]   ;;  %s8140_s13 = inlined_call_operand.vmem [shape: f32[1,256], index: 13, kind: input, shape index: {}]   ;;  %s8141_s14 = inlined_call_operand.vmem [shape: bf16[256,256], index: 14, kind: input, shape index: {}]   ;;  %s8142_s15 = inlined_call_operand.vmem [shape: f32[1,256], index: 15, kind: input, shape index: {}]   ;;  %s8143_s16 = inlined_call_operand.hbm [shape: bf16[256,128], index: 16, kind: input, shape index: {}]   ;;  %s8144_s17 = inlined_call_operand.vmem [shape: f32[1,128], index: 17, kind: input, shape index: {}]   ;;  %s8145_s18 = inlined_call_operand.hbm [shape: f32[256,128], index: 18, kind: output, shape index: {}]  }
   0x1   :  { %8232 = sst [smem:[#allocation51_spill]] %s8127_s0 }
   0x2   :  { %8233 = sst [smem:[#allocation52_spill]] %s8128_s1 }
   0x3   :  { %8234 = sst [smem:[#allocation53_spill]] %s8129_s2 }
   0x4   :  { %8235 = sst [smem:[#allocation54_spill]] %s8131_s4 }
   0x5   :  { %8236 = sst [smem:[#allocation55_spill]] %s8145_s18 }
   0x6   :  { %23 = vsyncpa [#allocation3], 0 }
   0x7   :  { %24 = vsyncpa [#allocation6], 0 }
   0x8   :  { %25 = vsyncpa [#allocation9], 0 }
   0x9   :  { %26 = vsyncpa [#allocation12], 0 }
   0xa   :  { %27 = vsyncpa [#allocation4], 0 }
   0xb   :  { %29 = vsyncpa [#allocation4 + $0x1], 0  ;;  %s5778_s27 = smov 0   ;;  %s5780_s28 = smov 0  }
   0xc   :  { %s5782_s29 = smov 0   ;;  %s5784_s30 = smov 0  }
   0xd LB: > { %8237 = sst [smem:[#allocation20_spill]] %s5648_s27  ;;  %s5799_s0 = sadd.s32 4294967295, %s5660_s30   ;;  %s5660_s30 = sphi %s5784_s30, %s8394_s30   ;;  %s5656_s29 = sphi %s5782_s29, %s8396_s29   ;;  %s5652_s28 = sphi %s5780_s28, %s8398_s28   ;;  %s5648_s27 = sphi %s5778_s27, %s8397_s27  }
   0xe   : > { %8238 = sst [smem:[#allocation21_spill]] %s5656_s29  ;;  %s4507_s19 = sadd.s32 4294967294, %s5660_s30  }
   0xf   : > { %8239 = sst [smem:[#allocation22_spill]] %s5660_s30  ;;  %s5803_s1 = sadd.s32 1, %s5660_s30  }
  0x10   : > { %8240 = sst [smem:[#allocation23_spill]] %s5803_s1  ;;  %s430_s20 = sadd.s32 1, %s5656_s29 }
  0x11   : > { %s427_s21 = ssub.s32 %s5660_s30, %s5803_s1  ;;  %p440_p0 = scmp.ne.s32.totalorder %s5656_s29, %s5652_s28 }
  0x12   : > { %p428_p1 = scmp.eq.s32.totalorder %s427_s21, 0  ;;  %p441_p2 = scmp.eq.s32.totalorder %s5799_s0, 1 }
  0x13   : > { %p446_p3 = scmp.ne.s32.totalorder %s5652_s28, %s5648_s27  ;;  %p447_p4 = scmp.eq.s32.totalorder %s4507_s19, 1 }
  0x14   : > { %s5814_s22 = scalar_select %p428_p1, %s5656_s29, %s430_s20  }
  0x15   : > { %p5816_p5 = por %p441_p2, %p440_p0  ;;  %p5820_p6 = por %p447_p4, %p446_p3 }
  0x16   : > { %8241 = sst [smem:[#allocation24_spill]] %s5814_s22  ;;  %p4508_p7 = scmp.ge.s32.totalorder %s5660_s30, 1 }
  0x17   : > { %s8242_s2 = scalar_select %p5816_p5, 1, 0 }
  0x18   : > { %s8243_s23 = scalar_select %p5820_p6, 1, 0 }
  0x19   : > { %p454_p8 = scmp.lt.s32.totalorder %s5660_s30, 3  ;;  %p8154_p9 = scmp.eq.s32.totalorder %s5799_s0, 0 }
  0x1a   : > { %8244 = sst [smem:[#allocation25_spill]] %s8243_s23  ;;  %s5662_s25 = smov [#allocation5]  }
  0x1b   : > { %p5827_p10 = pnand %p4508_p7, %p454_p8  ;;  %s480_s26 = sshll.u32 %s5662_s25, 4  ;;  %s481_s26 = int_to_ptr.vmem [resolvable:$true] %s480_s26 }
  0x1c   : > { %s5663_s20 = smov [#allocation8]   ;;  %s5664_s22 = smov [#allocation11]  }
  0x1d   : > { %s8245_s24 = scalar_select %p5827_p10, 1, 0 }
  0x1e   : > { %p5024_p11 = pneg %p5827_p10  ;;  %s504_s21 = sshll.u32 %s5663_s20, 4  ;;  %s505_s21 = int_to_ptr.vmem [resolvable:$true] %s504_s21 }
  0x1f   : > { %s534_s29 = sshll.u32 %s5664_s22, 4  ;;  %s5413_s25 = scalar_lea.vmem %s481_s26, 1024  ;;  %s535_s29 = int_to_ptr.vmem [resolvable:$true] %s534_s29 }
  0x20   : > { %p5835_p12 = pnand %p8154_p9, %p5024_p11  ;;  %p5414_p0 = scmp.ne.s32.totalorder %s481_s26, %s5413_s25 }
  0x21   : > { %p5421_p3 = scmp.lt.s32.totalorder %s481_s26, %s481_s26  ;;  %p5422_p4 = scmp.lt.s32.totalorder %s5413_s25, %s5413_s25 }
  0x22   : > { %p5841_p13 = pneg %p5835_p12 }
  0x23   : > { %p5423_p7 = por %p5422_p4, %p5421_p3 }
  0x24   : > { %p5416_p1 = pnand %p5414_p0, %p5841_p13 }
  0x26   : > { %p5417_p2 = pneg %p5416_p1 }
  0x28   : > { %p5424_p8 = pnand %p5423_p7, %p5417_p2 }
  0x2a   : > { %5427 = shalt.err (!%p5424_p8)
}
  0x2b   : > { %s8155_s20 = smov 64   ;;  %s8156_s22 = smov 4  }
  0x2c   : > { %s8248_s4 = sld [smem:[#allocation54_spill]]  ;;  %s5439_s30 = scalar_lea.vmem %s505_s21, 1024 }
  0x2d   : > { %p5440_p11 = scmp.ne.s32.totalorder %s505_s21, %s5439_s30  ;;  %p5447_p3 = scmp.lt.s32.totalorder %s505_s21, %s505_s21 }
  0x2e   : > { %p5448_p2 = scmp.lt.s32.totalorder %s5439_s30, %s5439_s30 }
  0x2f   : > { %p5442_p0 = pnand %p5440_p11, %p5841_p13 }
  0x30   : > { %p5449_p4 = por %p5448_p2, %p5447_p3 }
  0x31   : > { %p5443_p1 = pneg %p5442_p0 }
  0x32   : > { %5030 = dma.hbm_to_vmem [thread:$0]  (!%p5835_p12), %s8248_s4, 1024, %s481_s26, [#allocation6], %s8155_s20, %s8155_s20, %s8156_s22  }
  0x33   : > { %p5450_p7 = pnand %p5449_p4, %p5443_p1 }
  0x35   : > { %5453 = shalt.err (!%p5450_p7)
}
  0x36   : > { %5036 = dma.hbm_to_vmem [thread:$0]  (!%p5835_p12), %s8133_s6, 1024, %s505_s21, [#allocation9], %s8155_s20, %s8155_s20, %s8156_s22  }
  0x37   : > { %s5465_s27 = scalar_lea.vmem %s535_s29, 2048  ;;  %p5473_p9 = scmp.lt.s32.totalorder %s535_s29, %s535_s29 }
  0x38   : > { %p5466_p8 = scmp.ne.s32.totalorder %s535_s29, %s5465_s27  ;;  %p5474_p3 = scmp.lt.s32.totalorder %s5465_s27, %s5465_s27 }
  0x3a   : > { %p5468_p11 = pnand %p5466_p8, %p5841_p13  ;;  %p5475_p1 = por %p5474_p3, %p5473_p9 }
  0x3c   : > { %p5469_p0 = pneg %p5468_p11 }
  0x3e   : > { %p5476_p2 = pnand %p5475_p1, %p5469_p0 }
  0x40   : > { %5479 = shalt.err (!%p5476_p2)
}
  0x41   : > { %s5667_s30 = smov 128   ;;  %s5668_s23 = smov 8  }
  0x42   : > { %5042 = dma.hbm_to_vmem [thread:$0]  (!%p5835_p12), %s8137_s10, 2048, %s535_s29, [#allocation12], %s5667_s30, %s5667_s30, %s5668_s23  }
  0x43   : > { %s5669_s21 = smov [#allocation2]   ;;  %s5670_s20 = smov [#allocation7]  }
  0x44   : > { %s470_s25 = sshll.u32 %s5669_s21, 4  ;;  %s494_s22 = sshll.u32 %s5670_s20, 4  ;;  %s471_s25 = int_to_ptr.vmem [resolvable:$true] %s470_s25  ;;  %s495_s22 = int_to_ptr.vmem [resolvable:$true] %s494_s22 }
  0x45   : > { %s5491_s4 = scalar_lea.vmem %s471_s25, 16  ;;  %s5498_s27 = scalar_lea.vmem %s471_s25, 32 }
  0x46   : > { %p5492_p4 = scmp.ne.s32.totalorder %s471_s25, %s5491_s4  ;;  %p5499_p8 = scmp.lt.s32.totalorder %s471_s25, %s471_s25 }
  0x47   : > { %p5500_p11 = scmp.lt.s32.totalorder %s5498_s27, %s5491_s4 }
  0x48   : > { %p5494_p9 = pnand %p5492_p4, %p5841_p13 }
  0x49   : > { %p5501_p0 = por %p5500_p11, %p5499_p8 }
  0x4a   : > { %p5495_p7 = pneg %p5494_p9 }
  0x4c   : > { %p5502_p3 = pnand %p5501_p0, %p5495_p7 }
  0x4e   : > { %5505 = shalt.err (!%p5502_p3)
}
  0x4f   : > { %s8249_s30 = sld [smem:[#allocation53_spill]]  ;;  %s5517_s20 = scalar_lea.vmem %s495_s22, 16 }
  0x50   : > { %p5518_p1 = scmp.ne.s32.totalorder %s495_s22, %s5517_s20  ;;  %s5524_s23 = scalar_lea.vmem %s495_s22, 32 }
  0x51   : > { %p5525_p9 = scmp.lt.s32.totalorder %s495_s22, %s495_s22  ;;  %p5526_p6 = scmp.lt.s32.totalorder %s5524_s23, %s5517_s20 }
  0x52   : > { %p5520_p2 = pnand %p5518_p1, %p5841_p13 }
  0x53   : > { %p5527_p5 = por %p5526_p6, %p5525_p9 }
  0x54   : > { %p5521_p4 = pneg %p5520_p2 }
  0x55   : > { %5027 = dma.hbm_to_vmem [thread:$0]  (!%p5835_p12), %s8249_s30, 16, %s471_s25, [#allocation3]  }
  0x56   : > { %p5528_p8 = pnand %p5527_p5, %p5521_p4 }
  0x58   : > { %5531 = shalt.err (!%p5528_p8)
}
  0x59   : > { %5033 = dma.hbm_to_vmem [thread:$0]  (!%p5835_p12), %s8132_s5, 16, %s495_s22, [#allocation6]  }
  0x5a   : > { %s5671_s21 = smov [#allocation10]   ;;  %s5672_s27 = smov [#allocation13]  }
  0x5b   : > { %s518_s25 = sshll.u32 %s5671_s21, 4  ;;  %s562_s26 = sshll.u32 %s5672_s27, 4  ;;  %s519_s25 = int_to_ptr.vmem [resolvable:$true] %s518_s25  ;;  %s563_s26 = int_to_ptr.vmem [resolvable:$true] %s562_s26 }
  0x5c   : > { %s5543_s29 = scalar_lea.vmem %s519_s25, 16  ;;  %s5550_s30 = scalar_lea.vmem %s519_s25, 32 }
  0x5d   : > { %p5544_p7 = scmp.ne.s32.totalorder %s519_s25, %s5543_s29  ;;  %p5551_p5 = scmp.lt.s32.totalorder %s519_s25, %s519_s25 }
  0x5e   : > { %p5552_p6 = scmp.lt.s32.totalorder %s5550_s30, %s5543_s29 }
  0x5f   : > { %p5546_p11 = pnand %p5544_p7, %p5841_p13 }
  0x60   : > { %p5553_p3 = por %p5552_p6, %p5551_p5 }
  0x61   : > { %p5547_p0 = pneg %p5546_p11 }
  0x63   : > { %p5554_p1 = pnand %p5553_p3, %p5547_p0 }
  0x65   : > { %5557 = shalt.err (!%p5554_p1)
}
  0x66   : > { %5039 = dma.hbm_to_vmem [thread:$0]  (!%p5835_p12), %s8134_s7, 16, %s519_s25, [#allocation9]  }
  0x67   : > { %s5569_s23 = scalar_lea.vmem %s563_s26, 2048  ;;  %p5577_p8 = scmp.lt.s32.totalorder %s563_s26, %s563_s26 }
  0x68   : > { %p5570_p2 = scmp.ne.s32.totalorder %s563_s26, %s5569_s23  ;;  %p5578_p7 = scmp.lt.s32.totalorder %s5569_s23, %s5569_s23 }
  0x6a   : > { %p5572_p4 = pnand %p5570_p2, %p5841_p13  ;;  %p5579_p11 = por %p5578_p7, %p5577_p8 }
  0x6c   : > { %p5573_p9 = pneg %p5572_p4 }
  0x6e   : > { %p5580_p10 = pnand %p5579_p11, %p5573_p9 }
  0x70   : > { %5583 = shalt.err (!%p5580_p10)
}
  0x71   : > { %s8250_s4 = smov 4   ;;  %s8251_s18 = smov 64  }
  0x72   : > { %5045 = dma.hbm_to_vmem [thread:$0]  (!%p5835_p12), %s8143_s16, 2048, %s563_s26, [#allocation12], %s8251_s18, %s8251_s18, %s8250_s4  }
  0x73   : > { %p8252_p0 = scmp.ne.s32.totalorder %s8245_s24, 0 }
  0x75   : > { %599 = sbr.rel (%p8252_p0) target bundleno = 1990 (0x7c6), region = 92 }
  0x7a   : > { %p8253_p13 = scmp.eq.s32.totalorder %s5799_s0, 0 }
  0x7c   : > { %5627 = dma.done.wait (%p8253_p13), [#allocation3], 16   ;;  %p8254_p5 = pmov %p8253_p13 }
  0x7e   : > { %5629 = vsyncadd (%p8254_p5), [#allocation3], 4294967280  ;;  %p8255_p10 = pmov %p8254_p5 }
  0x7f   : > { %p8256_p6 = pmov %p8254_p5 }
  0x80   : > { %5631 = dma.done.wait (%p8255_p10), [#allocation6], 1040  }
  0x81   : > { %5633 = vsyncadd (%p8256_p6), [#allocation6], 4294966256  ;;  %p8257_p3 = pmov %p8254_p5 }
  0x83   : > { %5635 = dma.done.wait (%p8257_p3), [#allocation9], 1040   ;;  %p8258_p12 = pmov %p8257_p3 }
  0x84   : > { %p8259_p1 = pmov %p8257_p3 }
  0x85   : > { %5637 = vsyncadd (%p8258_p12), [#allocation9], 4294966256 }
  0x86   : > { %5639 = dma.done.wait (%p8259_p1), [#allocation12], 4096   ;;  %p8260_p2 = pmov %p8259_p1 }
  0x87   : > { %s4526_s1 = sshll.u32 %s5799_s0, 4  ;;  %v8159_v0 = vmov 0   ;;  %s8261_s26 = sld [smem:[#allocation51_spill]]  ;;  %v5937_v18 = vld [vmem:[#allocation2] ss:$0 sm:$0xff] }
  0x88   : > { %5641 = vsyncadd (%p8260_p2), [#allocation12], 4294963200  ;;  %5118 = vset.pattern.permute.xlu1 %v8159_v0  ;;  %5117 = vset.pattern.permute.xlu0 %v8159_v0  ;;  %p683_p4 = scmp.lt.s32.totalorder %s4526_s1, 31  ;;  %s8262_s22 = sld [smem:[#allocation52_spill]]  ;;  %v8174_v48 = vmov 683565275  }
  0x89   : > { %v8170_v50 = vmov 2475754826   ;;  %v8172_v52 = vmov 2131351028   ;;  %v8167_v54 = vmov 2102212464  }
  0x8a   : > { %s8400_s1 = smov (!%p683_p4, %s4526_s1), 31  ;;  %v8195_v59 = vmov 920167782   ;;  %v8187_v63 = vmov 1326507024   ;;  %s679_s23 = sand.u32 1, %s5652_s28  }
  0x8b   : > { %s4527_s24 = sshll.u32 %s8400_s1, 3  ;;  %s4525_s4 = sshll.u32 %s679_s23, 7 }
  0x8c   : > { %s7512_s25 = scalar_lea.vmem %s8130_s3, %s4527_s24  ;;  %s8043_s27 = scalar_lea.vmem [#allocation14], %s4525_s4 }
  0x8d   : > { %s686_s29 = scalar_lea.vmem %s8261_s26, %s4527_s24  ;;  %s4742_s19 = sshll.u32 %s5799_s0, 11 }
  0x8e   : > { %v698_v1 = vld [vmem:[%s686_s29 + $0x10] sm:$0xff]  ;;  %v696_v2 = vld [vmem:[%s686_s29] sm:$0xff]  ;;  %v699_v3 = vld [vmem:[%s686_s29 + $0x18] sm:$0xff]  ;;  %s8388_s26 = sld [smem:[#allocation55_spill]]  ;;  %s8087_s30 = scalar_lea.sflag [#allocation4], %s679_s23 }
  0x8f   : > { %725 = vperm.xlu1 %5118, %v698_v1   ;;  %715 = vperm.xlu0 %5117, %v696_v2   ;;  %v697_v4 = vld [vmem:[%s686_s29 + $0x8] sm:$0xff]  ;;  %v700_v6 = vld [vmem:[%s686_s29 + $0x20] sm:$0xff]  ;;  %v703_v7 = vld [vmem:[%s686_s29 + $0x38] sm:$0xff]  ;;  %p8389_p8 = scmp.ne.s32.totalorder %s8242_s2, 0  ;;  %s5680_s20 = smov [#allocation14]  }
  0x90   : > { %v701_v5 = vld [vmem:[%s686_s29 + $0x28] sm:$0xff]  ;;  %v702_v8 = vld [vmem:[%s686_s29 + $0x30] sm:$0xff]  ;;  %v704_v10 = vld [vmem:[%s686_s29 + $0x40] sm:$0xff]  ;;  %s5588_s4 = sshll.u32 %s5680_s20, 4  ;;  %s5589_s4 = int_to_ptr.vmem [resolvable:$false] %s5588_s4 }
  0x91   : > { %v705_v9 = vld [vmem:[%s686_s29 + $0x48] sm:$0xff]  ;;  %v707_v11 = vld [vmem:[%s686_s29 + $0x58] sm:$0xff]  ;;  %v706_v12 = vld [vmem:[%s686_s29 + $0x50] sm:$0xff]  ;;  %s5590_s18 = scalar_lea.vmem %s5589_s4, 4096 }
  0x92   : > { %v709_v13 = vld [vmem:[%s686_s29 + $0x68] sm:$0xff]  ;;  %v708_v14 = vld [vmem:[%s686_s29 + $0x60] sm:$0xff]  ;;  %v711_v15 = vld [vmem:[%s686_s29 + $0x78] sm:$0xff] }
  0x93   : > { %730 = vperm.xlu1 %5118, %v699_v3   ;;  %720 = vperm.xlu0 %5117, %v697_v4   ;;  %v710_v16 = vld [vmem:[%s686_s29 + $0x70] sm:$0xff]  ;;  %v5935_v17 = vld [vmem:[%s8262_s22] ss:$0 sm:$0xff] }
  0x94   : > { %s8079_s29 = scalar_lea.hbm %s8388_s26, %s4742_s19 }
  0x97   : > { %740 = vperm.xlu1 %5118, %v701_v5   ;;  %735 = vperm.xlu0 %5117, %v700_v6  }
  0x9b   : > { %750 = vperm.xlu1 %5118, %v703_v7   ;;  %745 = vperm.xlu0 %5117, %v702_v8  }
  0x9f   : > { %760 = vperm.xlu1 %5118, %v705_v9   ;;  %755 = vperm.xlu0 %5117, %v704_v10  }
  0xa3   : > { %770 = vperm.xlu1 %5118, %v707_v11   ;;  %765 = vperm.xlu0 %5117, %v706_v12  }
  0xa7   : > { %780 = vperm.xlu1 %5118, %v709_v13   ;;  %775 = vperm.xlu0 %5117, %v708_v14  }
  0xab   : > { %790 = vperm.xlu1 %5118, %v711_v15   ;;  %785 = vperm.xlu0 %5117, %v710_v16  }
 0x10a   : > { %v726_v19 = vpop.permute.xlu1 %725  ;;  %v716_v35 = vpop.permute.xlu0 %715 }
 0x10b   : > { %v801_v20 = vmul.f32 %v5935_v17, %v726_v19  ;;  %v5957_v43 = vmul.f32 %v5935_v17, %v716_v35 }
 0x10d   : > { %v5941_v21 = vadd.f32 %v5937_v18, %v801_v20 }
 0x10e   : > { %v731_v22 = vpop.permute.xlu1 %730 }
 0x10f   : > { %8263 = vst [vmem:[#allocation26_spill] sm:$0xff] %v5941_v21  ;;  %v1049_v23 = vand.u32 2139095040, %v5941_v21  ;;  %v802_v24 = vmul.f32 %v5935_v17, %v731_v22  ;;  %v8165_v26 = vand.u32 2147483647, %v5941_v21 }
 0x111   : > { %v1050_v25 = vshrl.u32 %v1049_v23, 23  ;;  %v5947_v27 = vadd.f32 %v5937_v18, %v802_v24  ;;  %v1053_v33 = vand.u32 8388607, %v8165_v26 }
 0x112   : > { %v741_v31 = vpop.permute.xlu1 %740 }
 0x113   : > { %8264 = vst [vmem:[#allocation27_spill] sm:$0xff] %v5947_v27  ;;  %v4540_v28 = vadd.s32 4294967169, %v1050_v25  ;;  %v8164_v29 = vand.u32 2147483647, %v5947_v27  ;;  %v1153_v30 = vand.u32 2139095040, %v5947_v27  ;;  %v804_v37 = vmul.f32 %v5935_v17, %v741_v31 }
 0x114   : > { %v1054_v41 = vor.u32 8388608, %v1053_v33 }
 0x115   : > { %v1056_v32 = vadd.s32 1, %v4540_v28  ;;  %v1154_v34 = vshrl.u32 %v1153_v30, 23  ;;  %v1157_v36 = vand.u32 8388607, %v8164_v29  ;;  %v5960_v47 = vadd.f32 %v5937_v18, %v804_v37 }
 0x116   : > { %v1094_v19 = vshll.u32 %v1054_v41, 8 }
 0x117   : > { %vm1057_vm0 = vcmp.gt.s32.totalorder %v1056_v32, 0  ;;  %v4544_v39 = vadd.s32 4294967169, %v1154_v34  ;;  %v1158_v45 = vor.u32 8388608, %v1157_v36  ;;  %8265 = vst [vmem:[#allocation28_spill] sm:$0xff] %v5960_v47  ;;  %v1361_v35 = vand.u32 2139095040, %v5960_v47 }
 0x118   : > { %v1058_v38 = vsel %vm1057_vm0, %v1056_v32, 0 }
 0x119   : > { %v1060_v40 = vand.u32 31, %v1058_v38  ;;  %v1059_v42 = vshrl.u32 %v1058_v38, 5  ;;  %v1160_v46 = vadd.s32 1, %v4544_v39  ;;  %v1198_v34 = vshll.u32 %v1158_v45, 8 }
 0x11b   : > { %v1061_v44 = vsub.s32 32, %v1060_v40  ;;  %v1063_v49 = vshll.u32 %v8174_v48, %v1060_v40  ;;  %v1066_v51 = vshll.u32 %v8170_v50, %v1060_v40  ;;  %v1069_v53 = vshll.u32 %v8172_v52, %v1060_v40 }
 0x11c   : > { %v1072_v55 = vshll.u32 %v8167_v54, %v1060_v40  ;;  %v1075_v60 = vshll.u32 %v8195_v59, %v1060_v40  ;;  %vm1078_vm1 = vcmp.lt.s32.totalorder %v1059_v42, 1  ;;  %vm1080_vm2 = vcmp.lt.s32.totalorder %v1059_v42, 3 }
 0x11d   : > { %v1064_v56 = vshrl.u32 %v8170_v50, %v1061_v44  ;;  %v1067_v57 = vshrl.u32 %v8172_v52, %v1061_v44  ;;  %v1070_v58 = vshrl.u32 %v8167_v54, %v1061_v44  ;;  %v1062_v61 = vshrl.u32 %v8174_v48, %v1061_v44 }
 0x11e   : > { %v1073_v62 = vshrl.u32 %v8195_v59, %v1061_v44  ;;  %v1076_v1 = vshrl.u32 %v8187_v63, %v1061_v44  ;;  %vm1081_vm3 = vcmp.lt.s32.totalorder %v1059_v42, 4  ;;  %vm1161_vm4 = vcmp.gt.s32.totalorder %v1160_v46, 0 }
 0x11f   : > { %v1065_v2 = vor.u32 %v1064_v56, %v1063_v49  ;;  %v1068_v3 = vor.u32 %v1067_v57, %v1066_v51  ;;  %v1071_v4 = vor.u32 %v1070_v58, %v1069_v53  ;;  %v1162_v14 = vsel %vm1161_vm4, %v1160_v46, 0 }
 0x120   : > { %v1074_v5 = vor.u32 %v1073_v62, %v1072_v55  ;;  %v1077_v6 = vor.u32 %v1076_v1, %v1075_v60  ;;  %vm1079_vm5 = vcmp.lt.s32.totalorder %v1059_v42, 2  ;;  %v1164_v24 = vand.u32 31, %v1162_v14 }
 0x121   : > { %v1082_v7 = vsel %vm1078_vm1, %v1062_v61, %v1065_v2  ;;  %v1083_v8 = vsel %vm1081_vm3, %v1071_v4, 2102212464  ;;  %v1086_v9 = vsel %vm1078_vm1, %v1065_v2, %v1068_v3  ;;  %v1090_v10 = vsel %vm1078_vm1, %v1068_v3, %v1071_v4 }
 0x122   : > { %v1084_v11 = vsel %vm1080_vm2, %v1068_v3, %v1083_v8  ;;  %v1087_v12 = vsel %vm1081_vm3, %v1074_v5, 920167782  ;;  %v1091_v13 = vsel %vm1081_vm3, %v1077_v6, 1326507024  ;;  %v1163_v32 = vshrl.u32 %v1162_v14, 5 }
 0x123   : > { %v1088_v15 = vsel %vm1080_vm2, %v1071_v4, %v1087_v12  ;;  %v1092_v16 = vsel %vm1080_vm2, %v1074_v5, %v1091_v13  ;;  %v1085_v20 = vsel %vm1079_vm5, %v1082_v7, %v1084_v11  ;;  %v1165_v33 = vsub.s32 32, %v1164_v24  ;;  %v721_v12 = vpop.permute.xlu0 %720 }
 0x124   : > { %v1089_v22 = vsel %vm1079_vm5, %v1086_v9, %v1088_v15  ;;  %v1093_v23 = vsel %vm1079_vm5, %v1090_v10, %v1092_v16  ;;  %v1101_v36 = vmul.u32 %v1094_v19, %v1085_v20  ;;  %v1167_v37 = vshll.u32 %v8174_v48, %v1164_v24 }
 0x125   : > { %v5973_v25 = vmul.u32.u64.low %v1094_v19, %v1093_v23  ;;  %v5974_v28 = vmul.u32.u64.high %v1094_v19, %v1093_v23, %v5973_v25  ;;  %v5976_v30 = vmul.u32.u64.low %v1094_v19, %v1089_v22  ;;  %v5977_v31 = vmul.u32.u64.high %v1094_v19, %v1089_v22, %v5976_v30 }
 0x126   : > { %v1170_v38 = vshll.u32 %v8170_v50, %v1164_v24  ;;  %v1173_v39 = vshll.u32 %v8172_v52, %v1164_v24  ;;  %v1168_v40 = vshrl.u32 %v8170_v50, %v1165_v33  ;;  %v1171_v41 = vshrl.u32 %v8172_v52, %v1165_v33 }
 0x127   : > { %v1174_v42 = vshrl.u32 %v8167_v54, %v1165_v33  ;;  %v1176_v44 = vshll.u32 %v8167_v54, %v1164_v24  ;;  %vm1103_vm6 = vc.u32 %v5974_v28, %v5976_v30  ;;  %v1104_v45 = vadd.s32 1, %v5977_v31 }
 0x128   : > { %v1177_v46 = vshrl.u32 %v8195_v59, %v1165_v33  ;;  %v1179_v49 = vshll.u32 %v8195_v59, %v1164_v24  ;;  %v1169_v51 = vor.u32 %v1168_v40, %v1167_v37  ;;  %v1172_v53 = vor.u32 %v1171_v41, %v1170_v38  ;;  %v736_v38 = vpop.permute.xlu0 %735 }
 0x129   : > { %v1175_v55 = vor.u32 %v1174_v42, %v1173_v39  ;;  %v1180_v56 = vshrl.u32 %v8187_v63, %v1165_v33  ;;  %v1105_v57 = vsel %vm1103_vm6, %v1104_v45, %v5977_v31  ;;  %vm1182_vm7 = vcmp.lt.s32.totalorder %v1163_v32, 1 }
 0x12a   : > { %v1178_v58 = vor.u32 %v1177_v46, %v1176_v44  ;;  %vm1185_vm8 = vcmp.lt.s32.totalorder %v1163_v32, 4  ;;  %v1106_v60 = vadd.s32 %v1105_v57, %v1101_v36  ;;  %v1166_v61 = vshrl.u32 %v8174_v48, %v1165_v33 }
 0x12b   : > { %v1181_v62 = vor.u32 %v1180_v56, %v1179_v49  ;;  %v1187_v1 = vsel %vm1185_vm8, %v1175_v55, 2102212464  ;;  %vm1184_vm9 = vcmp.lt.s32.totalorder %v1163_v32, 3  ;;  %v1190_v2 = vsel %vm1182_vm7, %v1169_v51, %v1172_v53 }
 0x12c   : > { %v1191_v3 = vsel %vm1185_vm8, %v1178_v58, 920167782  ;;  %v1194_v4 = vsel %vm1182_vm7, %v1172_v53, %v1175_v55  ;;  %v1107_v5 = vadd.s32 536870912, %v1106_v60  ;;  %vm1183_vm10 = vcmp.lt.s32.totalorder %v1163_v32, 2 }
 0x12d   : > { %v1192_v6 = vsel %vm1184_vm9, %v1175_v55, %v1191_v3  ;;  %v1195_v7 = vsel %vm1185_vm8, %v1181_v62, 1326507024  ;;  %v1186_v8 = vsel %vm1182_vm7, %v1166_v61, %v1169_v51  ;;  %v1188_v9 = vsel %vm1184_vm9, %v1172_v53, %v1187_v1 }
 0x12e   : > { %v1193_v10 = vsel %vm1183_vm10, %v1190_v2, %v1192_v6  ;;  %v1196_v11 = vsel %vm1184_vm9, %v1178_v58, %v1195_v7  ;;  %v5996_v13 = vshrl.u32 %v1107_v5, 30  ;;  %v1362_v22 = vshrl.u32 %v1361_v35, 23 }
 0x12f   : > { %v1197_v14 = vsel %vm1183_vm10, %v1194_v4, %v1196_v11  ;;  %v5998_v15 = vmul.u32.u64.low %v1198_v34, %v1193_v10  ;;  %v5999_v16 = vmul.u32.u64.high %v1198_v34, %v1193_v10, %v5998_v15  ;;  %v6008_v24 = vadd.f32 %v5937_v18, %v5957_v43 }
 0x130   : > { %8266 = vst [vmem:[#allocation29_spill] sm:$0xff] %v5996_v13  ;;  %v6002_v19 = vmul.u32.u64.low %v1198_v34, %v1197_v14  ;;  %v6003_v20 = vmul.u32.u64.high %v1198_v34, %v1197_v14, %v6002_v19  ;;  %v1109_v23 = vshll.u32 %v5996_v13, 30  ;;  %v1189_v25 = vsel %vm1183_vm10, %v1186_v8, %v1188_v9 }
 0x131   : > { %v4552_v31 = vadd.s32 4294967169, %v1362_v22  ;;  %v1208_v33 = vadd.s32 1, %v5999_v16  ;;  %v1205_v36 = vmul.u32 %v1198_v34, %v1189_v25  ;;  %v841_v35 = vand.u32 2139095040, %v6008_v24 }
 0x132   : > { %v6010_v32 = vsub.s32 %v1106_v60, %v1109_v23  ;;  %vm1207_vm11 = vc.u32 %v6003_v20, %v5998_v15  ;;  %v800_v43 = vmul.f32 %v5935_v17, %v721_v12  ;;  %v8161_v41 = vand.u32 2147483647, %v5960_v47 }
 0x133   : > { %v1368_v37 = vadd.s32 1, %v4552_v31  ;;  %v1209_v39 = vsel %vm1207_vm11, %v1208_v33, %v5999_v16  ;;  %v803_v34 = vmul.f32 %v5935_v17, %v736_v38  ;;  %v842_v49 = vshrl.u32 %v841_v35, 23  ;;  %v751_v16 = vpop.permute.xlu1 %750 }
 0x134   : > { %v1210_v40 = vadd.s32 %v1209_v39, %v1205_v36  ;;  %v1112_v42 = vsub.s32 0, %v6010_v32  ;;  %v6024_v53 = vadd.f32 %v5937_v18, %v800_v43  ;;  %v1365_v55 = vand.u32 8388607, %v8161_v41 }
 0x135   : > { %vm1369_vm12 = vcmp.gt.s32.totalorder %v1368_v37, 0  ;;  %v6031_v61 = vadd.f32 %v5937_v18, %v803_v34  ;;  %v4532_v33 = vadd.s32 4294967169, %v842_v49  ;;  %v806_v35 = vmul.f32 %v5935_v17, %v751_v16 }
 0x136   : > { %v1370_v44 = vsel %vm1369_vm12, %v1368_v37, 0  ;;  %v1211_v45 = vadd.s32 536870912, %v1210_v40  ;;  %v4541_v57 = vmin.u32 %v1112_v42, %v6010_v32  ;;  %v1366_v12 = vor.u32 8388608, %v1365_v55 }
 0x137   : > { %v1372_v46 = vand.u32 31, %v1370_v44  ;;  %v1371_v58 = vshrl.u32 %v1370_v44, 5  ;;  %v1257_v14 = vand.u32 2139095040, %v6031_v61  ;;  %v945_v36 = vand.u32 2139095040, %v6024_v53 }
 0x138   : > { %v6021_v51 = vshrl.u32 %v1211_v45, 30  ;;  %v1114_v31 = vclz %v4541_v57  ;;  %v848_v57 = vadd.s32 1, %v4532_v33 }
 0x139   : > { %v1373_v56 = vsub.s32 32, %v1372_v46  ;;  %v1375_v60 = vshll.u32 %v8174_v48, %v1372_v46  ;;  %v1378_v2 = vshll.u32 %v8170_v50, %v1372_v46  ;;  %v1381_v4 = vshll.u32 %v8172_v52, %v1372_v46 }
 0x13a   : > { %8267 = vst [vmem:[#allocation30_spill] sm:$0xff] %v6021_v51  ;;  %v1213_v62 = vshll.u32 %v6021_v51, 30  ;;  %v1384_v6 = vshll.u32 %v8167_v54, %v1372_v46  ;;  %v1387_v25 = vshll.u32 %v8195_v59, %v1372_v46  ;;  %vm1390_vm13 = vcmp.lt.s32.totalorder %v1371_v58, 1 }
 0x13b   : > { %v1376_v1 = vshrl.u32 %v8170_v50, %v1373_v56  ;;  %v1379_v3 = vshrl.u32 %v8172_v52, %v1373_v56  ;;  %v1382_v5 = vshrl.u32 %v8167_v54, %v1373_v56  ;;  %v1385_v7 = vshrl.u32 %v8195_v59, %v1373_v56 }
 0x13c   : > { %v6041_v8 = vsub.s32 %v1210_v40, %v1213_v62  ;;  %v1388_v11 = vshrl.u32 %v8187_v63, %v1373_v56  ;;  %vm1393_vm14 = vcmp.lt.s32.totalorder %v1371_v58, 4  ;;  %vm1392_vm15 = vcmp.lt.s32.totalorder %v1371_v58, 3 }
 0x13d   : > { %v1377_v9 = vor.u32 %v1376_v1, %v1375_v60  ;;  %v1380_v10 = vor.u32 %v1379_v3, %v1378_v2  ;;  %v1383_v22 = vor.u32 %v1382_v5, %v1381_v4  ;;  %v1386_v23 = vor.u32 %v1385_v7, %v1384_v6 }
 0x13e   : > { %v1216_v19 = vsub.s32 0, %v6041_v8  ;;  %v1389_v37 = vor.u32 %v1388_v11, %v1387_v25  ;;  %v1406_v40 = vshll.u32 %v1366_v12, 8  ;;  %v1258_v43 = vshrl.u32 %v1257_v14, 23 }
 0x13f   : > { %v1398_v38 = vsel %vm1390_vm13, %v1377_v9, %v1380_v10  ;;  %v1399_v39 = vsel %vm1393_vm14, %v1386_v23, 920167782  ;;  %vm1391_vm0 = vcmp.lt.s32.totalorder %v1371_v58, 2  ;;  %v1395_v44 = vsel %vm1393_vm14, %v1383_v22, 2102212464 }
 0x140   : > { %v4545_v42 = vmin.u32 %v1216_v19, %v6041_v8  ;;  %v1400_v34 = vsel %vm1392_vm15, %v1383_v22, %v1399_v39  ;;  %v4542_v45 = vadd.s32 4294967294, %v1114_v31  ;;  %v1374_v46 = vshrl.u32 %v8174_v48, %v1373_v56  ;;  %v746_v31 = vpop.permute.xlu0 %745 }
 0x141   : > { %v1401_v49 = vsel %vm1391_vm0, %v1398_v38, %v1400_v34  ;;  %v1402_v55 = vsel %vm1390_vm13, %v1380_v10, %v1383_v22  ;;  %v1403_v60 = vsel %vm1393_vm14, %v1389_v37, 1326507024  ;;  %v1396_v3 = vsel %vm1392_vm15, %v1380_v10, %v1395_v44 }
 0x142   : > { %v6058_v62 = vmul.u32.u64.low %v1406_v40, %v1401_v49  ;;  %v6059_v1 = vmul.u32.u64.high %v1406_v40, %v1401_v49, %v6058_v62  ;;  %v1394_v2 = vsel %vm1390_vm13, %v1374_v46, %v1377_v9  ;;  %v1404_v4 = vsel %vm1392_vm15, %v1386_v23, %v1403_v60 }
 0x143   : > { %v4548_v5 = vadd.s32 4294967169, %v1258_v43  ;;  %v1218_v6 = vclz %v4545_v42  ;;  %v1405_v56 = vsel %vm1391_vm0, %v1402_v55, %v1404_v4  ;;  %v8162_v7 = vand.u32 2147483647, %v6031_v61 }
 0x144   : > { %vm4543_vm1 = vcmp.lt.s32.totalorder %v4542_v45, 0  ;;  %v6067_v11 = vmul.u32.u64.low %v1406_v40, %v1405_v56  ;;  %v6068_v12 = vmul.u32.u64.high %v1406_v40, %v1405_v56, %v6067_v11  ;;  %v6071_v14 = vadd.f32 %v5937_v18, %v806_v35 }
 0x145   : > { %v946_v16 = vshrl.u32 %v945_v36, 23  ;;  %v1397_v9 = vsel %vm1391_vm0, %v1394_v2, %v1396_v3  ;;  %v1416_v10 = vadd.s32 1, %v6059_v1  ;;  %vm849_vm2 = vcmp.gt.s32.totalorder %v848_v57, 0 }
 0x146   : > { %v1264_v19 = vadd.s32 1, %v4548_v5  ;;  %v6075_v22 = vsel %vm4543_vm1, 0, %v4542_v45  ;;  %v4546_v23 = vadd.s32 4294967294, %v1218_v6  ;;  %v1261_v25 = vand.u32 8388607, %v8162_v7 }
 0x147   : > { %v1413_v33 = vmul.u32 %v1406_v40, %v1397_v9  ;;  %vm1415_vm3 = vc.u32 %v6068_v12, %v6058_v62  ;;  %v1569_v36 = vand.u32 2139095040, %v6071_v14  ;;  %v6082_v58 = vsel %vm849_vm2, %v848_v57, 0 }
 0x148   : > { %vm1265_vm4 = vcmp.gt.s32.totalorder %v1264_v19, 0  ;;  %v6084_v37 = vadd.s32 4294967169, %v946_v16  ;;  %v1417_v38 = vsel %vm1415_vm3, %v1416_v10, %v6059_v1  ;;  %v6089_v39 = vadd.s32 %v5976_v30, %v5974_v28 }
 0x149   : > { %v1266_v35 = vsel %vm1265_vm4, %v1264_v19, 0  ;;  %v1418_v43 = vadd.s32 %v1417_v38, %v1413_v33  ;;  %v805_v40 = vmul.f32 %v5935_v17, %v746_v31  ;;  %v1118_v44 = vsub.s32 32, %v6075_v22 }
 0x14a   : > { %v1268_v42 = vand.u32 31, %v1266_v35  ;;  %v1122_v34 = vsub.s32 4294967266, %v6075_v22  ;;  %v1262_v45 = vor.u32 8388608, %v1261_v25  ;;  %v8163_v46 = vand.u32 2147483647, %v6071_v14 }
 0x14b   : > { %vm4547_vm5 = vcmp.lt.s32.totalorder %v4546_v23, 0  ;;  %v1419_v49 = vadd.s32 536870912, %v1418_v43  ;;  %v1570_v57 = vshrl.u32 %v1569_v36, 23  ;;  %v1267_v60 = vshrl.u32 %v1266_v35, 5 }
 0x14c   : > { %v1269_v55 = vsub.s32 32, %v1268_v42  ;;  %v1271_v1 = vshll.u32 %v8174_v48, %v1268_v42  ;;  %v1274_v28 = vshll.u32 %v8170_v50, %v1268_v42  ;;  %v1277_v30 = vshll.u32 %v8172_v52, %v1268_v42 }
 0x14d   : > { %v6098_v2 = vshrl.u32 %v1419_v49, 30  ;;  %v1280_v5 = vshll.u32 %v8167_v54, %v1268_v42  ;;  %v1283_v11 = vshll.u32 %v8195_v59, %v1268_v42  ;;  %v1302_v25 = vshll.u32 %v1262_v45, 8 }
 0x14e   : > { %v1272_v3 = vshrl.u32 %v8170_v50, %v1269_v55  ;;  %v1275_v4 = vshrl.u32 %v8172_v52, %v1269_v55  ;;  %v1278_v6 = vshrl.u32 %v8167_v54, %v1269_v55  ;;  %v1281_v56 = vshrl.u32 %v8195_v59, %v1269_v55 }
 0x14f   : > { %8268 = vst [vmem:[#allocation31_spill] sm:$0xff] %v6098_v2  ;;  %v1284_v16 = vshrl.u32 %v8187_v63, %v1269_v55  ;;  %v1421_v9 = vshll.u32 %v6098_v2, 30  ;;  %v4560_v38 = vadd.s32 4294967169, %v1570_v57  ;;  %v6109_v35 = vsel %vm4547_vm5, 0, %v4546_v23 }
 0x150   : > { %v1273_v10 = vor.u32 %v1272_v3, %v1271_v1  ;;  %v1276_v19 = vor.u32 %v1275_v4, %v1274_v28  ;;  %v1279_v31 = vor.u32 %v1278_v6, %v1277_v30  ;;  %v1282_v33 = vor.u32 %v1281_v56, %v1280_v5 }
 0x151   : > { %v1285_v36 = vor.u32 %v1284_v16, %v1283_v11  ;;  %v6111_v49 = vsub.s32 %v1418_v43, %v1421_v9  ;;  %vm1286_vm6 = vcmp.lt.s32.totalorder %v1267_v60, 1  ;;  %vm1289_vm7 = vcmp.lt.s32.totalorder %v1267_v60, 4 }
 0x152   : > { %v1270_v42 = vshrl.u32 %v8174_v48, %v1269_v55  ;;  %vm1287_vm8 = vcmp.lt.s32.totalorder %v1267_v60, 2  ;;  %v1291_v0 = vsel %vm1289_vm7, %v1279_v31, 2102212464  ;;  %v1294_v41 = vsel %vm1286_vm6, %v1273_v10, %v1276_v19 }
 0x153   : > { %v1424_v1 = vsub.s32 0, %v6111_v49  ;;  %vm1288_vm9 = vcmp.lt.s32.totalorder %v1267_v60, 3  ;;  %v1295_v45 = vsel %vm1289_vm7, %v1282_v33, 920167782  ;;  %v1298_v28 = vsel %vm1286_vm6, %v1276_v19, %v1279_v31 }
 0x154   : > { %v1290_v30 = vsel %vm1286_vm6, %v1270_v42, %v1273_v10  ;;  %v1296_v3 = vsel %vm1288_vm9, %v1279_v31, %v1295_v45  ;;  %v1299_v57 = vsel %vm1289_vm7, %v1285_v36, 1326507024  ;;  %v1576_v4 = vadd.s32 1, %v4560_v38 }
 0x155   : > { %v4553_v23 = vmin.u32 %v1424_v1, %v6111_v49  ;;  %v1292_v43 = vsel %vm1288_vm9, %v1276_v19, %v1291_v0  ;;  %v1297_v5 = vsel %vm1287_vm8, %v1294_v41, %v1296_v3  ;;  %v1300_v6 = vsel %vm1288_vm9, %v1282_v33, %v1299_v57 }
 0x156   : > { %v1301_v55 = vsel %vm1287_vm8, %v1298_v28, %v1300_v6  ;;  %v6118_v56 = vmul.u32.u64.low %v1302_v25, %v1297_v5  ;;  %v6119_v11 = vmul.u32.u64.high %v1302_v25, %v1297_v5, %v6118_v56  ;;  %vm1577_vm10 = vcmp.gt.s32.totalorder %v1576_v4, 0 }
 0x157   : > { %v1123_v16 = vadd.s32 127, %v1122_v34  ;;  %v6122_v9 = vmul.u32.u64.low %v1302_v25, %v1301_v55  ;;  %v6123_v7 = vmul.u32.u64.high %v1302_v25, %v1301_v55, %v6122_v9  ;;  %v1578_v10 = vsel %vm1577_vm10, %v1576_v4, 0 }
 0x158   : > { %v1226_v31 = vsub.s32 4294967266, %v6109_v35  ;;  %v1293_v36 = vsel %vm1287_vm8, %v1290_v30, %v1292_v43  ;;  %v1580_v0 = vand.u32 31, %v1578_v10  ;;  %v6128_v41 = vadd.f32 %v5937_v18, %v805_v40 }
 0x159   : > { %v6131_v19 = vshrl.u32 %v6082_v58, 5  ;;  %v6134_v33 = vand.u32 31, %v6082_v58  ;;  %v6137_v34 = vadd.s32 1, %v6084_v37  ;;  %v1426_v38 = vclz %v4553_v23 }
 0x15a   : > { %v1119_v42 = vshll.u32 %v6010_v32, %v6075_v22  ;;  %v1120_v60 = vshrl.u32 %v6089_v39, %v1118_v44  ;;  %v1312_v40 = vadd.s32 1, %v6119_v11  ;;  %v1581_v1 = vsub.s32 32, %v1580_v0 }
 0x15b   : > { %v1124_v45 = vshll.u32 %v1123_v16, 23  ;;  %v1309_v28 = vmul.u32 %v1302_v25, %v1293_v36  ;;  %vm1311_vm11 = vc.u32 %v6123_v7, %v6118_v56  ;;  %v1573_v58 = vand.u32 8388607, %v8163_v46 }
 0x15c   : > { %v6149_v37 = vadd.s32 127, %v1226_v31  ;;  %v1313_v30 = vsel %vm1311_vm11, %v1312_v40, %v6119_v11  ;;  %v1584_v32 = vshrl.u32 %v8170_v50, %v1581_v1  ;;  %v1465_v22 = vand.u32 2139095040, %v6128_v41 }
 0x15d   : > { %v4554_v39 = vadd.s32 4294967294, %v1426_v38  ;;  %v1314_v44 = vadd.s32 %v1313_v30, %v1309_v28  ;;  %v1579_v3 = vshrl.u32 %v1578_v10, 5  ;;  %v1583_v57 = vshll.u32 %v8174_v48, %v1580_v0 }
 0x15e   : > { %v1586_v25 = vshll.u32 %v8170_v50, %v1580_v0  ;;  %v1587_v4 = vshrl.u32 %v8172_v52, %v1581_v1  ;;  %v1589_v23 = vshll.u32 %v8172_v52, %v1580_v0  ;;  %v1590_v43 = vshrl.u32 %v8167_v54, %v1581_v1 }
 0x15f   : > { %v1315_v5 = vadd.s32 536870912, %v1314_v44  ;;  %v1585_v6 = vor.u32 %v1584_v32, %v1583_v57  ;;  %v1592_v55 = vshll.u32 %v8167_v54, %v1580_v0  ;;  %v1593_v11 = vshrl.u32 %v8195_v59, %v1581_v1 }
 0x160   : > { %v1588_v16 = vor.u32 %v1587_v4, %v1586_v25  ;;  %v1591_v9 = vor.u32 %v1590_v43, %v1589_v23  ;;  %v1595_v10 = vshll.u32 %v8195_v59, %v1580_v0  ;;  %v1596_v31 = vshrl.u32 %v8187_v63, %v1581_v1 }
 0x161   : > { %v1121_v36 = vor.u32 %v1120_v60, %v1119_v42  ;;  %v1125_v38 = vor.u32 4788187, %v1124_v45  ;;  %v6163_v40 = vshrl.u32 %v1315_v5, 30  ;;  %v1594_v28 = vor.u32 %v1593_v11, %v1592_v55 }
 0x162   : > { %v1222_v30 = vsub.s32 32, %v6109_v35  ;;  %v1228_v46 = vshll.u32 %v6149_v37, 23  ;;  %v1574_v32 = vor.u32 8388608, %v1573_v58  ;;  %v1597_v57 = vor.u32 %v1596_v31, %v1595_v10 }
 0x163   : > { %8269 = vst [vmem:[#allocation32_spill] sm:$0xff] %v6163_v40  ;;  %vm4555_vm12 = vcmp.lt.s32.totalorder %v4554_v39, 0  ;;  %vm1598_vm13 = vcmp.lt.s32.totalorder %v1579_v3, 1  ;;  %vm1601_vm14 = vcmp.lt.s32.totalorder %v1579_v3, 4  ;;  %v1466_v25 = vshrl.u32 %v1465_v22, 23 }
 0x164   : > { %vm953_vm15 = vcmp.gt.s32.totalorder %v6137_v34, 0  ;;  %vm1600_vm0 = vcmp.lt.s32.totalorder %v1579_v3, 3  ;;  %v1603_v0 = vsel %vm1601_vm14, %v1591_v9, 2102212464  ;;  %v1606_v42 = vsel %vm1598_vm13, %v1585_v6, %v1588_v16 }
 0x165   : > { %v1607_v60 = vsel %vm1601_vm14, %v1594_v28, 920167782  ;;  %v1317_v45 = vshll.u32 %v6163_v40, 30  ;;  %v1582_v4 = vshrl.u32 %v8174_v48, %v1581_v1  ;;  %vm1599_vm1 = vcmp.lt.s32.totalorder %v1579_v3, 2 }
 0x166   : > { %v1608_v23 = vsel %vm1600_vm0, %v1591_v9, %v1607_v60  ;;  %v1610_v37 = vsel %vm1598_vm13, %v1588_v16, %v1591_v9  ;;  %v1611_v43 = vsel %vm1601_vm14, %v1597_v57, 1326507024  ;;  %v1614_v5 = vshll.u32 %v1574_v32, 8 }
 0x167   : > { %v1609_v58 = vsel %vm1599_vm1, %v1606_v42, %v1608_v23  ;;  %v6174_v22 = vsel %vm4555_vm12, 0, %v4554_v39  ;;  %v1602_v55 = vsel %vm1598_vm13, %v1582_v4, %v1585_v6  ;;  %v1604_v11 = vsel %vm1600_vm0, %v1588_v16, %v1603_v0  ;;  %v761_v23 = vpop.permute.xlu1 %760 }
 0x168   : > { %v1612_v10 = vsel %vm1600_vm0, %v1594_v28, %v1611_v43  ;;  %v6178_v29 = vmul.u32.u64.low %v1614_v5, %v1609_v58  ;;  %v6179_v26 = vmul.u32.u64.high %v1614_v5, %v1609_v58, %v6178_v29  ;;  %v4556_v1 = vadd.s32 4294967169, %v1466_v25 }
 0x169   : > { %v1613_v31 = vsel %vm1599_vm1, %v1610_v37, %v1612_v10  ;;  %v1206_v42 = vadd.s32 %v5998_v15, %v6003_v20  ;;  %v6184_v9 = vsub.s32 %v1314_v44, %v1317_v45  ;;  %v1128_v39 = vcvt.s32.f32 %v1121_v36 }
 0x16a   : > { %v6186_v32 = vmul.u32.u64.low %v1614_v5, %v1613_v31  ;;  %v6187_v57 = vmul.u32.u64.high %v1614_v5, %v1613_v31, %v6186_v32  ;;  %v1434_v6 = vsub.s32 4294967266, %v6174_v22  ;;  %v1605_v16 = vsel %vm1599_vm1, %v1602_v55, %v1604_v11 }
 0x16b   : > { %v1472_v28 = vadd.s32 1, %v4556_v1  ;;  %v1126_v0 = vand.u32 2147483647, %v1125_v38  ;;  %v1223_v60 = vshll.u32 %v6041_v8, %v6109_v35  ;;  %v1224_v4 = vshrl.u32 %v1206_v42, %v1222_v30 }
 0x16c   : > { %v8166_v25 = vand.u32 2147483647, %v6128_v41  ;;  %v6194_v15 = vor.u32 4788187, %v1228_v46  ;;  %v1430_v20 = vsub.s32 32, %v6174_v22  ;;  %v1624_v44 = vadd.s32 1, %v6179_v26 }
 0x16d   : > { %vm1473_vm2 = vcmp.gt.s32.totalorder %v1472_v28, 0  ;;  %v1320_v36 = vsub.s32 0, %v6184_v9  ;;  %v1621_v3 = vmul.u32 %v1614_v5, %v1605_v16  ;;  %vm1623_vm3 = vc.u32 %v6187_v57, %v6178_v29 }
 0x16e   : > { %v1474_v38 = vsel %vm1473_vm2, %v1472_v28, 0  ;;  %v1435_v45 = vadd.s32 127, %v1434_v6  ;;  %v1625_v8 = vsel %vm1623_vm3, %v1624_v44, %v6179_v26  ;;  %v808_v30 = vmul.f32 %v5935_v17, %v761_v23 }
 0x16f   : > { %v1476_v35 = vand.u32 31, %v1474_v38  ;;  %v6203_v46 = vmul.f32 %v1128_v39, %v1126_v0  ;;  %v6208_v58 = vsel %vm953_vm15, %v6137_v34, 0  ;;  %v1414_v37 = vadd.s32 %v6058_v62, %v6068_v12 }
 0x170   : > { %v1626_v43 = vadd.s32 %v1625_v8, %v1621_v3  ;;  %v6212_v5 = vor.u32 %v1224_v4, %v1223_v60  ;;  %v1230_v55 = vand.u32 2147483647, %v6194_v15  ;;  %v1469_v26 = vand.u32 8388607, %v8166_v25  ;;  %v756_v4 = vpop.permute.xlu0 %755 }
 0x171   : > { %v1477_v11 = vsub.s32 32, %v1476_v35  ;;  %v1431_v10 = vshll.u32 %v6111_v49, %v6174_v22  ;;  %v1432_v31 = vshrl.u32 %v1414_v37, %v1430_v20  ;;  %v4549_v1 = vmin.u32 %v1320_v36, %v6184_v9 }
 0x172   : > { %v1627_v34 = vadd.s32 536870912, %v1626_v43  ;;  %v1436_v42 = vshll.u32 %v1435_v45, 23  ;;  %v6223_v12 = vadd.f32 %v5937_v18, %v808_v30  ;;  %v1479_v6 = vshll.u32 %v8174_v48, %v1476_v35 }
 0x173   : > { %v1480_v32 = vshrl.u32 %v8170_v50, %v1477_v11  ;;  %v1483_v62 = vshrl.u32 %v8172_v52, %v1477_v11  ;;  %v1482_v16 = vshll.u32 %v8170_v50, %v1476_v35  ;;  %v1486_v49 = vshrl.u32 %v8167_v54, %v1477_v11 }
 0x174   : > { %v6225_v39 = vshrl.u32 %v1627_v34, 30  ;;  %v1475_v22 = vshrl.u32 %v1474_v38, 5  ;;  %v1485_v28 = vshll.u32 %v8172_v52, %v1476_v35  ;;  %v1488_v0 = vshll.u32 %v8167_v54, %v1476_v35 }
 0x175   : > { %v1489_v60 = vshrl.u32 %v8195_v59, %v1477_v11  ;;  %v1322_v23 = vclz %v4549_v1  ;;  %v1481_v44 = vor.u32 %v1480_v32, %v1479_v6  ;;  %v1484_v36 = vor.u32 %v1483_v62, %v1482_v16 }
 0x176   : > { %8270 = vst [vmem:[#allocation33_spill] sm:$0xff] %v6225_v39  ;;  %v1629_v20 = vshll.u32 %v6225_v39, 30  ;;  %v1487_v3 = vor.u32 %v1486_v49, %v1485_v28  ;;  %v1491_v8 = vshll.u32 %v8195_v59, %v1476_v35  ;;  %v1492_v30 = vshrl.u32 %v8187_v63, %v1477_v11 }
 0x177   : > { %v1490_v45 = vor.u32 %v1489_v60, %v1488_v0  ;;  %v6236_v37 = vor.u32 %v1432_v31, %v1431_v10  ;;  %v6238_v38 = vor.u32 4788187, %v1436_v42  ;;  %v1470_v34 = vor.u32 8388608, %v1469_v26 }
 0x178   : > { %v807_v25 = vmul.f32 %v5935_v17, %v756_v4  ;;  %v6241_v54 = vsub.s32 %v1626_v43, %v1629_v20  ;;  %v1493_v1 = vor.u32 %v1492_v30, %v1491_v8  ;;  %vm1494_vm4 = vcmp.lt.s32.totalorder %v1475_v22, 1 }
 0x179   : > { %v1777_v32 = vand.u32 2139095040, %v6223_v12  ;;  %v4550_v62 = vadd.s32 4294967294, %v1322_v23  ;;  %vm1496_vm5 = vcmp.lt.s32.totalorder %v1475_v22, 3  ;;  %vm1497_vm6 = vcmp.lt.s32.totalorder %v1475_v22, 4 }
 0x17a   : > { %v1502_v35 = vsel %vm1494_vm4, %v1481_v44, %v1484_v36  ;;  %v1499_v6 = vsel %vm1497_vm6, %v1487_v3, 2102212464  ;;  %v1503_v16 = vsel %vm1497_vm6, %v1490_v45, 920167782  ;;  %v1506_v10 = vsel %vm1494_vm4, %v1484_v36, %v1487_v3 }
 0x17b   : > { %v1507_v31 = vsel %vm1497_vm6, %v1493_v1, 1326507024  ;;  %v1478_v26 = vshrl.u32 %v8174_v48, %v1477_v11  ;;  %vm1495_vm7 = vcmp.lt.s32.totalorder %v1475_v22, 2  ;;  %v1504_v43 = vsel %vm1496_vm5, %v1487_v3, %v1503_v16 }
 0x17c   : > { %v1510_v42 = vshll.u32 %v1470_v34, 8  ;;  %vm1048_vm8 = vcmp.lt.s32.totalorder %v5941_v21, 0  ;;  %v1632_v49 = vsub.s32 0, %v6241_v54  ;;  %v1505_v28 = vsel %vm1495_vm7, %v1502_v35, %v1504_v43 }
 0x17d   : > { %v1508_v0 = vsel %vm1496_vm5, %v1490_v45, %v1507_v31  ;;  %v1778_v60 = vshrl.u32 %v1777_v32, 23  ;;  %vm4551_vm9 = vcmp.lt.s32.totalorder %v4550_v62, 0  ;;  %v1498_v4 = vsel %vm1494_vm4, %v1478_v26, %v1481_v44 }
 0x17e   : > { %v1500_v23 = vsel %vm1496_vm5, %v1484_v36, %v1499_v6  ;;  %v1509_v11 = vsel %vm1495_vm7, %v1506_v10, %v1508_v0  ;;  %v6258_v3 = vmul.u32.u64.low %v1510_v42, %v1505_v28  ;;  %v6259_v30 = vmul.u32.u64.high %v1510_v42, %v1505_v28, %v6258_v3  ;;  %v771_v28 = vpop.permute.xlu1 %770 }
 0x17f   : > { %v6255_v20 = vmul.u32.u64.low %v1510_v42, %v1509_v11  ;;  %v6256_v8 = vmul.u32.u64.high %v1510_v42, %v1509_v11, %v6255_v20  ;;  %v6263_v34 = vsub.s32 32, %v6134_v33  ;;  %v1232_v45 = vcvt.s32.f32 %v6212_v5 }
 0x180   : > { %v8169_v1 = vand.u32 2147483647, %v6223_v12  ;;  %v4568_v32 = vadd.s32 4294967169, %v1778_v60  ;;  %v6267_v44 = vsel %vm4551_vm9, 0, %v4550_v62  ;;  %v4561_v36 = vmin.u32 %v1632_v49, %v6241_v54 }
 0x181   : > { %v1501_v35 = vsel %vm1495_vm7, %v1498_v4, %v1500_v23  ;;  %v6272_v6 = vadd.f32 %v5937_v18, %v807_v25  ;;  %v1130_v16 = vxor.u32 2147483648, %v6203_v46  ;;  %v6277_v10 = vmul.f32 %v1232_v45, %v1230_v55 }
 0x182   : > { %v6280_v5 = vand.u32 31, %v6208_v58  ;;  %v1784_v31 = vadd.s32 1, %v4568_v32  ;;  %v1438_v62 = vand.u32 2147483647, %v6238_v38  ;;  %v1440_v26 = vcvt.s32.f32 %v6236_v37 }
 0x183   : > { %vm1519_vm10 = vc.u32 %v6256_v8, %v6258_v3  ;;  %v1520_v18 = vadd.s32 1, %v6259_v30  ;;  %v1330_v25 = vsub.s32 4294967266, %v6267_v44  ;;  %v1517_v22 = vmul.u32 %v1510_v42, %v1501_v35 }
 0x184   : > { %8271 = vst [vmem:[#allocation34_spill] sm:$0xff] %v6280_v5  ;;  %v1781_v15 = vand.u32 8388607, %v8169_v1  ;;  %vm1785_vm11 = vcmp.gt.s32.totalorder %v1784_v31, 0  ;;  %v1634_v55 = vclz %v4561_v36  ;;  %v1673_v38 = vand.u32 2139095040, %v6272_v6 }
 0x185   : > { %v1521_v43 = vsel %vm1519_vm10, %v1520_v18, %v6259_v30  ;;  %v1786_v49 = vsel %vm1785_vm11, %v1784_v31, 0  ;;  %v6295_v37 = vsel %vm1048_vm8, %v1130_v16, %v6203_v46  ;;  %v6298_v0 = vshrl.u32 %v6208_v58, 5 }
 0x186   : > { %8272 = vst [vmem:[#allocation35_spill] sm:$0xff] %v6295_v37  ;;  %v6301_v42 = vsub.s32 32, %v6280_v5  ;;  %v1522_v60 = vadd.s32 %v1521_v43, %v1517_v22  ;;  %v1234_v4 = vxor.u32 2147483648, %v6277_v10  ;;  %v6304_v23 = vmul.f32 %v1440_v26, %v1438_v62 }
 0x187   : > { %8273 = vst [vmem:[#allocation36_spill] sm:$0xff] %v6298_v0  ;;  %v1310_v11 = vadd.s32 %v6118_v56, %v6123_v7  ;;  %v1788_v20 = vand.u32 31, %v1786_v49  ;;  %v1326_v30 = vsub.s32 32, %v6267_v44  ;;  %v6309_v45 = vadd.s32 127, %v1330_v25 }
 0x188   : > { %v1523_v46 = vadd.s32 536870912, %v1522_v60  ;;  %v6312_v58 = vmul.f32 %v5935_v17, %v771_v28  ;;  %v4562_v32 = vadd.s32 4294967294, %v1634_v55  ;;  %v1782_v36 = vor.u32 8388608, %v1781_v15 }
 0x189   : > { %v1789_v35 = vsub.s32 32, %v1788_v20  ;;  %v1674_v16 = vshrl.u32 %v1673_v38, 23  ;;  %v1787_v62 = vshrl.u32 %v1786_v49, 5  ;;  %v1791_v26 = vshll.u32 %v8174_v48, %v1788_v20 }
 0x18a   : > { %v6314_v31 = vshrl.u32 %v1523_v46, 30  ;;  %v1794_v7 = vshll.u32 %v8170_v50, %v1788_v20  ;;  %v1797_v25 = vshll.u32 %v8172_v52, %v1788_v20  ;;  %v8275_v22 = vmov 2102212464  }
 0x18b   : > { %v1792_v56 = vshrl.u32 %v8170_v50, %v1789_v35  ;;  %v1795_v18 = vshrl.u32 %v8172_v52, %v1789_v35  ;;  %v1798_v17 = vshrl.u32 %v8275_v22, %v1789_v35  ;;  %vm1152_vm12 = vcmp.lt.s32.totalorder %v5947_v27, 0 }
 0x18c   : > { %8274 = vst [vmem:[#allocation37_spill] sm:$0xff] %v6314_v31  ;;  %v1525_v15 = vshll.u32 %v6314_v31, 30  ;;  %v1800_v55 = vshll.u32 %v8275_v22, %v1788_v20  ;;  %v1801_v43 = vshrl.u32 %v8195_v59, %v1789_v35  ;;  %v1803_v49 = vshll.u32 %v8195_v59, %v1788_v20 }
 0x18d   : > { %v1793_v38 = vor.u32 %v1792_v56, %v1791_v26  ;;  %v1796_v28 = vor.u32 %v1795_v18, %v1794_v7  ;;  %v1799_v46 = vor.u32 %v1798_v17, %v1797_v25  ;;  %v1804_v1 = vshrl.u32 %v8187_v63, %v1789_v35 }
 0x18e   : > { %vm4563_vm13 = vcmp.lt.s32.totalorder %v4562_v32, 0  ;;  %v1802_v50 = vor.u32 %v1801_v43, %v1800_v55  ;;  %v1822_v52 = vshll.u32 %v1782_v36, 8  ;;  %v8186_v48 = vand.u32 2147483647, %v6272_v6 }
 0x18f   : > { %v1805_v39 = vor.u32 %v1804_v1, %v1803_v49  ;;  %vm1806_vm14 = vcmp.lt.s32.totalorder %v1787_v62, 1  ;;  %vm1809_vm15 = vcmp.lt.s32.totalorder %v1787_v62, 4  ;;  %v4564_v31 = vadd.s32 4294967169, %v1674_v16  ;;  %v766_v49 = vpop.permute.xlu0 %765 }
 0x190   : > { %v6329_v2 = vsub.s32 %v1522_v60, %v1525_v15  ;;  %v8276_v40 = vmov 683565275   ;;  %v1811_v37 = vsel %vm1809_vm15, %v1799_v46, 2102212464  ;;  %v1814_v20 = vsel %vm1806_vm14, %v1793_v38, %v1796_v28 }
 0x191   : > { %v1790_v51 = vshrl.u32 %v8276_v40, %v1789_v35  ;;  %vm1808_vm0 = vcmp.lt.s32.totalorder %v1787_v62, 3  ;;  %v1815_v26 = vsel %vm1809_vm15, %v1802_v50, 920167782  ;;  %v1818_v7 = vsel %vm1806_vm14, %v1796_v28, %v1799_v46 }
 0x192   : > { %v1819_v56 = vsel %vm1809_vm15, %v1805_v39, 1326507024  ;;  %v6333_v18 = vsel %vm4563_vm13, 0, %v4562_v32  ;;  %vm1807_vm1 = vcmp.lt.s32.totalorder %v1787_v62, 2  ;;  %v1816_v25 = vsel %vm1808_vm0, %v1799_v46, %v1815_v26 }
 0x193   : > { %v1810_v36 = vsel %vm1806_vm14, %v1790_v51, %v1793_v38  ;;  %v1812_v1 = vsel %vm1808_vm0, %v1796_v28, %v1811_v37  ;;  %v1817_v17 = vsel %vm1807_vm1, %v1814_v20, %v1816_v25  ;;  %v1820_v55 = vsel %vm1808_vm0, %v1802_v50, %v1819_v56  ;;  %v6368_v56 = vld [vmem:[%s8262_s22] ss:$0 sm:$0xff] }
 0x194   : > { %v1680_v16 = vadd.s32 1, %v4564_v31  ;;  %v1528_v60 = vsub.s32 0, %v6329_v2  ;;  %v1821_v15 = vsel %vm1807_vm1, %v1818_v7, %v1820_v55  ;;  %v6343_v39 = vsel %vm1152_vm12, %v1234_v4, %v6277_v10 }
 0x195   : > { %v6336_v35 = vmul.u32.u64.low %v1822_v52, %v1817_v17  ;;  %v6337_v43 = vmul.u32.u64.high %v1822_v52, %v1817_v17, %v6336_v35  ;;  %8277 = vst [vmem:[#allocation38_spill] sm:$0xff] %v6343_v39  ;;  %v6345_v32 = vmul.u32.u64.low %v1822_v52, %v1821_v15  ;;  %v6346_v62 = vmul.u32.u64.high %v1822_v52, %v1821_v15, %v6345_v32 }
 0x196   : > { %vm1681_vm2 = vcmp.gt.s32.totalorder %v1680_v16, 0  ;;  %v1328_v51 = vshrl.u32 %v1310_v11, %v1326_v30  ;;  %v1332_v50 = vshll.u32 %v6309_v45, 23  ;;  %v1813_v37 = vsel %vm1807_vm1, %v1810_v36, %v1812_v1  ;;  %v6357_v30 = vld [vmem:[#allocation2] ss:$0 sm:$0xff] }
 0x197   : > { %v1682_v31 = vsel %vm1681_vm2, %v1680_v16, 0  ;;  %v1642_v28 = vsub.s32 4294967266, %v6333_v18  ;;  %v1677_v46 = vand.u32 8388607, %v8186_v48  ;;  %v1327_v10 = vshll.u32 %v6184_v9, %v6267_v44 }
 0x198   : > { %v1684_v20 = vand.u32 31, %v1682_v31  ;;  %v4557_v4 = vmin.u32 %v1528_v60, %v6329_v2  ;;  %v1832_v11 = vadd.s32 1, %v6337_v43  ;;  %v6361_v45 = vadd.f32 %v6357_v30, %v6312_v58 }
 0x199   : > { %v1829_v26 = vmul.u32 %v1822_v52, %v1813_v37  ;;  %vm1831_vm3 = vc.u32 %v6346_v62, %v6336_v35  ;;  %v6371_v9 = vmul.f32 %v6368_v56, %v766_v49  ;;  %v6373_v44 = vor.u32 %v1328_v51, %v1327_v10 }
 0x19a   : > { %8278 = vst [vmem:[#allocation39_spill] sm:$0xff] %v6361_v45  ;;  %v1685_v7 = vsub.s32 32, %v1684_v20  ;;  %v6375_v36 = vor.u32 4788187, %v1332_v50  ;;  %v1622_v58 = vadd.s32 %v6178_v29, %v6187_v57  ;;  %v1833_v52 = vsel %vm1831_vm3, %v1832_v11, %v6337_v43 }
 0x19b   : > { %v1643_v25 = vadd.s32 127, %v1642_v28  ;;  %v1834_v1 = vadd.s32 %v1833_v52, %v1829_v26  ;;  %v1678_v17 = vor.u32 8388608, %v1677_v46  ;;  %v8279_v55 = vmov 2475754826  }
 0x19c   : > { %v1688_v16 = vshrl.u32 %v8279_v55, %v1685_v7  ;;  %v1530_v60 = vclz %v4557_v4  ;;  %v1687_v15 = vshll.u32 %v8276_v40, %v1684_v20  ;;  %v8280_v32 = vmov 2131351028  }
 0x19d   : > { %v1691_v37 = vshrl.u32 %v8280_v32, %v1685_v7  ;;  %v1985_v51 = vand.u32 2139095040, %v6361_v45  ;;  %v1835_v49 = vadd.s32 536870912, %v1834_v1  ;;  %v1690_v50 = vshll.u32 %v8279_v55, %v1684_v20 }
 0x19e   : > { %v1693_v10 = vshll.u32 %v8280_v32, %v1684_v20  ;;  %v1694_v29 = vshrl.u32 %v8275_v22, %v1685_v7  ;;  %v1638_v43 = vsub.s32 32, %v6333_v18  ;;  %v1683_v28 = vshrl.u32 %v1682_v31, 5 }
 0x19f   : > { %v1689_v46 = vor.u32 %v1688_v16, %v1687_v15  ;;  %v1692_v4 = vor.u32 %v1691_v37, %v1690_v50  ;;  %v1696_v26 = vshll.u32 %v8275_v22, %v1684_v20  ;;  %v1697_v52 = vshrl.u32 %v8195_v59, %v1685_v7 }
 0x1a0   : > { %v1695_v11 = vor.u32 %v1694_v29, %v1693_v10  ;;  %v1644_v48 = vshll.u32 %v1643_v25, 23  ;;  %v6391_v38 = vshrl.u32 %v1835_v49, 30  ;;  %v1699_v63 = vshll.u32 %v8195_v59, %v1684_v20 }
 0x1a1   : > { %v8282_v39 = vmov 1326507024   ;;  %vm1360_vm4 = vcmp.lt.s32.totalorder %v5960_v47, 0  ;;  %v4558_v57 = vadd.s32 4294967294, %v1530_v60  ;;  %v1698_v13 = vor.u32 %v1697_v52, %v1696_v26 }
 0x1a2   : > { %8281 = vst [vmem:[#allocation40_spill] sm:$0xff] %v6391_v38  ;;  %v1700_v27 = vshrl.u32 %v8282_v39, %v1685_v7  ;;  %v1718_v21 = vshll.u32 %v1678_v17, 8  ;;  %v1986_v31 = vshrl.u32 %v1985_v51, 23  ;;  %v1686_v16 = vshrl.u32 %v8276_v40, %v1685_v7 }
 0x1a3   : > { %vm1702_vm5 = vcmp.lt.s32.totalorder %v1683_v28, 1  ;;  %vm1705_vm6 = vcmp.lt.s32.totalorder %v1683_v28, 4  ;;  %vm1704_vm7 = vcmp.lt.s32.totalorder %v1683_v28, 3  ;;  %v1837_v50 = vshll.u32 %v6391_v38, 30 }
 0x1a4   : > { %v1701_v15 = vor.u32 %v1700_v27, %v1699_v63  ;;  %v1707_v37 = vsel %vm1705_vm6, %v1695_v11, 2102212464  ;;  %v1710_v25 = vsel %vm1702_vm5, %v1689_v46, %v1692_v4  ;;  %v1711_v49 = vsel %vm1705_vm6, %v1698_v13, 920167782 }
 0x1a5   : > { %vm1703_vm9 = vcmp.lt.s32.totalorder %v1683_v28, 2  ;;  %v1712_v20 = vsel %vm1704_vm7, %v1695_v11, %v1711_v49  ;;  %v1714_v10 = vsel %vm1702_vm5, %v1692_v4, %v1695_v11  ;;  %vm4559_vm10 = vcmp.lt.s32.totalorder %v4558_v57, 0  ;;  %v781_v28 = vpop.permute.xlu1 %780 }
 0x1a6   : > { %v1706_v29 = vsel %vm1702_vm5, %v1686_v16, %v1689_v46  ;;  %v1713_v60 = vsel %vm1703_vm9, %v1710_v25, %v1712_v20  ;;  %v1715_v17 = vsel %vm1705_vm6, %v1701_v15, 1326507024  ;;  %v1708_v51 = vsel %vm1704_vm7, %v1692_v4, %v1707_v37  ;;  %v5119_v37 = vld [vmem:[#allocation5 + $0x38] sm:$0xff]  }
 0x1a7   : > { %v1716_v26 = vsel %vm1704_vm7, %v1698_v13, %v1715_v17  ;;  %v6399_v7 = vmul.u32.u64.low %v1718_v21, %v1713_v60  ;;  %v6400_v27 = vmul.u32.u64.high %v1718_v21, %v1713_v60, %v6399_v7  ;;  %v1640_v63 = vshrl.u32 %v1622_v58, %v1638_v43  ;;  %4848 = vmatprep.subr.bf16.mxu1 %v5119_v37 }
 0x1a8   : > { %v1717_v52 = vsel %vm1703_vm9, %v1714_v10, %v1716_v26  ;;  %v8200_v59 = vand.u32 2147483647, %v6361_v45  ;;  %v4576_v38 = vadd.s32 4294967169, %v1986_v31  ;;  %v6405_v0 = vsel %vm4559_vm10, 0, %v4558_v57  ;;  %4849 = vmatpush3.bf16.msra.mxu1 %v5119_v37 }
 0x1a9   : > { %v6407_v11 = vsub.s32 %v1834_v1, %v1837_v50  ;;  %v6409_v46 = vmul.u32.u64.low %v1718_v21, %v1717_v52  ;;  %v6410_v16 = vmul.u32.u64.high %v1718_v21, %v1717_v52, %v6409_v46  ;;  %v1639_v13 = vshll.u32 %v6241_v54, %v6333_v18 }
 0x1aa   : > { %v1709_v4 = vsel %vm1703_vm9, %v1706_v29, %v1708_v51  ;;  %v1992_v15 = vadd.s32 1, %v4576_v38  ;;  %v6417_v58 = vadd.f32 %v6357_v30, %v6371_v9  ;;  %v8284_v43 = vxor.u32 2147483648, %v6304_v23 }
 0x1ab   : > { %v1336_v57 = vcvt.s32.f32 %v6373_v44  ;;  %v6427_v31 = vor.u32 4788187, %v1644_v48  ;;  %v1728_v54 = vadd.s32 1, %v6400_v27  ;;  %v6430_v18 = vor.u32 %v1640_v63, %v1639_v13  ;;  %v5120_v63 = vld [vmem:[#allocation5 + $0x30] sm:$0xff]  }
 0x1ac   : > { %8283 = vst [vmem:[#allocation41_spill] sm:$0xff] %v6417_v58  ;;  %v6424_v1 = vsel %vm1360_vm4, %v8284_v43, %v6304_v23  ;;  %v1534_v38 = vsub.s32 32, %v6405_v0  ;;  %v1989_v9 = vand.u32 8388607, %v8200_v59  ;;  %vm1993_vm11 = vcmp.gt.s32.totalorder %v1992_v15, 0  ;;  %4850 = vmatprep.subr.bf16.mxu1 %v5120_v63 }
 0x1ad   : > { %8285 = vst [vmem:[#allocation42_spill] sm:$0xff] %v6424_v1  ;;  %v1840_v25 = vsub.s32 0, %v6407_v11  ;;  %v1725_v23 = vmul.u32 %v1718_v21, %v1709_v4  ;;  %vm1727_vm13 = vc.u32 %v6410_v16, %v6399_v7  ;;  %v1994_v48 = vsel %vm1993_vm11, %v1992_v15, 0  ;;  %4851 = vmatpush3.bf16.msra.mxu1 %v5120_v63 }
 0x1ae   : > { %v8286_v44 = vand.u32 2147483647, %v6375_v36  ;;  %v1729_v50 = vsel %vm1727_vm13, %v1728_v54, %v6400_v27  ;;  %v1996_v20 = vand.u32 31, %v1994_v48  ;;  %v1881_v10 = vand.u32 2139095040, %v6417_v58 }
 0x1af   : > { %v1518_v60 = vadd.s32 %v6258_v3, %v6256_v8  ;;  %v1730_v21 = vadd.s32 %v1729_v50, %v1725_v23  ;;  %v6448_v17 = vmul.f32 %v6368_v56, %v781_v28  ;;  %v1538_v51 = vsub.s32 4294967266, %v6405_v0  ;;  %v5121_v50 = vld [vmem:[#allocation5 + $0x28] sm:$0xff]  }
 0x1b0   : > { %v6440_v49 = vmul.f32 %v1336_v57, %v8286_v44  ;;  %v1997_v26 = vsub.s32 32, %v1996_v20  ;;  %v4569_v46 = vmin.u32 %v1840_v25, %v6407_v11  ;;  %v1990_v4 = vor.u32 8388608, %v1989_v9  ;;  %4852 = vmatprep.subr.bf16.mxu1 %v5121_v50 }
 0x1b1   : > { %v6453_v52 = vshrl.u32 %v1518_v60, %v1534_v38  ;;  %v1731_v13 = vadd.s32 536870912, %v1730_v21  ;;  %v1999_v8 = vshll.u32 %v8276_v40, %v1996_v20  ;;  %v2002_v15 = vshll.u32 %v8279_v55, %v1996_v20  ;;  %4853 = vmatpush3.bf16.msra.mxu1 %v5121_v50 }
 0x1b2   : > { %v2000_v3 = vshrl.u32 %v8279_v55, %v1997_v26  ;;  %v1882_v43 = vshrl.u32 %v1881_v10, 23  ;;  %v2003_v54 = vshrl.u32 %v8280_v32, %v1997_v26  ;;  %v2005_v28 = vshll.u32 %v8280_v32, %v1996_v20 }
 0x1b3   : > { %v6459_v57 = vshrl.u32 %v1731_v13, 30  ;;  %v2006_v38 = vshrl.u32 %v8275_v22, %v1997_v26  ;;  %v1539_v37 = vadd.s32 127, %v1538_v51  ;;  %v1995_v25 = vshrl.u32 %v1994_v48, 5 }
 0x1b4   : > { %v2008_v9 = vshll.u32 %v8275_v22, %v1996_v20  ;;  %v8288_v23 = vmov 920167782   ;;  %v2001_v10 = vor.u32 %v2000_v3, %v1999_v8  ;;  %v2004_v59 = vor.u32 %v2003_v54, %v2002_v15  ;;  %v5122_v8 = vld [vmem:[#allocation5 + $0x20] sm:$0xff]  }
 0x1b5   : > { %8287 = vst [vmem:[#allocation43_spill] sm:$0xff] %v6459_v57  ;;  %v2009_v44 = vshrl.u32 %v8288_v23, %v1997_v26  ;;  %v1733_v60 = vshll.u32 %v6459_v57, 30  ;;  %v2007_v13 = vor.u32 %v2006_v38, %v2005_v28  ;;  %v1842_v27 = vclz %v4569_v46  ;;  %4854 = vmatprep.subr.bf16.mxu1 %v5122_v8 }
 0x1b6   : > { %v2011_v29 = vshll.u32 %v8288_v23, %v1996_v20  ;;  %v2012_v1 = vshrl.u32 %v8282_v39, %v1997_v26  ;;  %v1998_v48 = vshrl.u32 %v8276_v40, %v1997_v26  ;;  %v6472_v51 = vshll.u32 %v1990_v4, 8  ;;  %4855 = vmatpush3.bf16.msra.mxu1 %v5122_v8 }
 0x1b7   : > { %v2010_v36 = vor.u32 %v2009_v44, %v2008_v9  ;;  %v6469_v63 = vsub.s32 %v1730_v21, %v1733_v60  ;;  %v4572_v47 = vadd.s32 4294967169, %v1882_v43  ;;  %vm2014_vm14 = vcmp.lt.s32.totalorder %v1995_v25, 1 }
 0x1b8   : > { %v2013_v45 = vor.u32 %v2012_v1, %v2011_v29  ;;  %vm2016_vm15 = vcmp.lt.s32.totalorder %v1995_v25, 3  ;;  %vm2017_vm0 = vcmp.lt.s32.totalorder %v1995_v25, 4  ;;  %v2022_v20 = vsel %vm2014_vm14, %v2001_v10, %v2004_v59 }
 0x1b9   : > { %v1736_v46 = vsub.s32 0, %v6469_v63  ;;  %v2019_v3 = vsel %vm2017_vm0, %v2007_v13, 2102212464  ;;  %v2023_v15 = vsel %vm2017_vm0, %v2010_v36, 920167782  ;;  %v4570_v54 = vadd.s32 4294967294, %v1842_v27 }
 0x1ba   : > { %vm2015_vm1 = vcmp.lt.s32.totalorder %v1995_v25, 2  ;;  %v2024_v21 = vsel %vm2016_vm15, %v2007_v13, %v2023_v15  ;;  %v2026_v28 = vsel %vm2014_vm14, %v2004_v59, %v2007_v13  ;;  %v1540_v26 = vshll.u32 %v1539_v37, 23  ;;  %v5123_v27 = vld [vmem:[#allocation5 + $0x18] sm:$0xff]   ;;  %v5124_v15 = vld [vmem:[#allocation5 + $0x10] sm:$0xff]  }
 0x1bb   : > { %v2018_v4 = vsel %vm2014_vm14, %v1998_v48, %v2001_v10  ;;  %v2025_v43 = vsel %vm2015_vm1, %v2022_v20, %v2024_v21  ;;  %v2027_v1 = vsel %vm2017_vm0, %v2013_v45, 1326507024  ;;  %v2020_v29 = vsel %vm2016_vm15, %v2004_v59, %v2019_v3  ;;  %4856 = vmatprep.subr.bf16.mxu1 %v5123_v27  ;;  %v776_v20 = vpop.permute.xlu0 %775 }
 0x1bc   : > { %v2028_v38 = vsel %vm2016_vm15, %v2010_v36, %v2027_v1  ;;  %v6480_v9 = vmul.u32.u64.low %v6472_v51, %v2025_v43  ;;  %v6481_v44 = vmul.u32.u64.high %v6472_v51, %v2025_v43, %v6480_v9  ;;  %v1535_v50 = vshll.u32 %v6329_v2, %v6405_v0  ;;  %4857 = vmatpush3.bf16.msra.mxu1 %v5123_v27 }
 0x1bd   : > { %v4565_v37 = vmin.u32 %v1736_v46, %v6469_v63  ;;  %v2029_v60 = vsel %vm2015_vm1, %v2026_v28, %v2028_v38  ;;  %v1888_v10 = vadd.s32 1, %v4572_v47  ;;  %v8289_v45 = vand.u32 2147483647, %v6427_v31  ;;  %4858 = vmatprep.subr.bf16.mxu1 %v5124_v15 }
 0x1be   : > { %v8290_v59 = vcvt.s32.f32 %v6430_v18  ;;  %vm4571_vm2 = vcmp.lt.s32.totalorder %v4570_v54, 0  ;;  %v6495_v36 = vmul.u32.u64.low %v6472_v51, %v2029_v60  ;;  %v6496_v48 = vmul.u32.u64.high %v6472_v51, %v2029_v60, %v6495_v36 }
 0x1bf   : > { %v6499_v8 = vor.u32 %v6453_v52, %v1535_v50  ;;  %v6501_v2 = vor.u32 4788187, %v1540_v26  ;;  %v2021_v0 = vsel %vm2015_vm1, %v2018_v4, %v2020_v29  ;;  %vm1889_vm3 = vcmp.gt.s32.totalorder %v1888_v10, 0 }
 0x1c0   : > { %v6492_v13 = vmul.f32 %v8290_v59, %v8289_v45  ;;  %v2040_v31 = vadd.s32 1, %v6481_v44  ;;  %v8291_v18 = vand.u32 2147483647, %v6417_v58  ;;  %v1890_v3 = vsel %vm1889_vm3, %v1888_v10, 0  ;;  %4859 = vmatpush3.bf16.msra.mxu1 %v5124_v15 }
 0x1c1   : > { %v6509_v21 = vsel %vm4571_vm2, 0, %v4570_v54  ;;  %v1738_v52 = vclz %v4565_v37  ;;  %v1892_v28 = vand.u32 31, %v1890_v3  ;;  %v6513_v25 = vadd.f32 %v6357_v30, %v6448_v17 }
 0x1c2   : > { %v1885_v46 = vand.u32 8388607, %v8291_v18  ;;  %v6518_v4 = vadd.s32 %v6336_v35, %v6346_v62  ;;  %v2037_v43 = vmul.u32 %v6472_v51, %v2021_v0  ;;  %vm2039_vm5 = vc.u32 %v6496_v48, %v6480_v9  ;;  %v5125_v51 = vld [vmem:[#allocation5 + $0x8] sm:$0xff]  }
 0x1c3   : > { %v2041_v29 = vsel %vm2039_vm5, %v2040_v31, %v6481_v44  ;;  %v6527_v17 = vmul.f32 %v6368_v56, %v776_v20  ;;  %v1850_v38 = vsub.s32 4294967266, %v6509_v21  ;;  %v1893_v27 = vsub.s32 32, %v1892_v28  ;;  %4860 = vmatprep.subr.bf16.mxu1 %v5125_v51 }
 0x1c4   : > { %v2042_v35 = vadd.s32 %v2041_v29, %v2037_v43  ;;  %v1886_v62 = vor.u32 8388608, %v1885_v46  ;;  %v4566_v50 = vadd.s32 4294967294, %v1738_v52  ;;  %v1891_v37 = vshrl.u32 %v1890_v3, 5  ;;  %4861 = vmatpush3.bf16.msra.mxu1 %v5125_v51  ;;  %v5126_v43 = vld [vmem:[#allocation5] sm:$0xff]  }
 0x1c5   : > { %v1895_v60 = vshll.u32 %v8276_v40, %v1892_v28  ;;  %v2193_v10 = vand.u32 2139095040, %v6513_v25  ;;  %v1896_v59 = vshrl.u32 %v8279_v55, %v1893_v27  ;;  %v1898_v44 = vshll.u32 %v8279_v55, %v1892_v28  ;;  %4862 = vmatprep.subr.bf16.mxu1 %v5126_v43 }
 0x1c6   : > { %v2043_v45 = vadd.s32 536870912, %v2042_v35  ;;  %v1899_v36 = vshrl.u32 %v8280_v32, %v1893_v27  ;;  %v1901_v0 = vshll.u32 %v8280_v32, %v1892_v28  ;;  %v1902_v31 = vshrl.u32 %v8275_v22, %v1893_v27 }
 0x1c7   : > { %v1904_v18 = vshll.u32 %v8275_v22, %v1892_v28  ;;  %v1905_v46 = vshrl.u32 %v8288_v23, %v1893_v27  ;;  %v1897_v20 = vor.u32 %v1896_v59, %v1895_v60  ;;  %vm1256_vm6 = vcmp.lt.s32.totalorder %v6031_v61, 0 }
 0x1c8   : > { %v6539_v3 = vshrl.u32 %v2043_v45, 30  ;;  %v1900_v15 = vor.u32 %v1899_v36, %v1898_v44  ;;  %vm1568_vm7 = vcmp.lt.s32.totalorder %v6071_v14, 0  ;;  %v1846_v29 = vsub.s32 32, %v6509_v21  ;;  %4863 = vmatpush3.bf16.msra.mxu1 %v5126_v43 }
 0x1c9   : > { %v1903_v1 = vor.u32 %v1902_v31, %v1901_v0  ;;  %v1906_v54 = vor.u32 %v1905_v46, %v1904_v18  ;;  %v1926_v26 = vshll.u32 %v1886_v62, 8  ;;  %v1851_v47 = vadd.s32 127, %v1850_v38 }
 0x1ca   : > { %8292 = vst [vmem:[#allocation44_spill] sm:$0xff] %v6539_v3  ;;  %v2045_v57 = vshll.u32 %v6539_v3, 30  ;;  %v1907_v51 = vshll.u32 %v8288_v23, %v1892_v28  ;;  %v1908_v60 = vshrl.u32 %v8282_v39, %v1893_v27  ;;  %vm4567_vm9 = vcmp.lt.s32.totalorder %v4566_v50, 0 }
 0x1cb   : > { %vm1910_vm10 = vcmp.lt.s32.totalorder %v1891_v37, 1  ;;  %vm1913_vm11 = vcmp.lt.s32.totalorder %v1891_v37, 4  ;;  %v2194_v45 = vshrl.u32 %v2193_v10, 23  ;;  %v1894_v38 = vshrl.u32 %v8276_v40, %v1893_v27 }
 0x1cc   : > { %v6548_v59 = vsub.s32 %v2042_v35, %v2045_v57  ;;  %v1909_v44 = vor.u32 %v1908_v60, %v1907_v51  ;;  %v1915_v36 = vsel %vm1913_vm11, %v1903_v1, 2102212464  ;;  %v1918_v0 = vsel %vm1910_vm10, %v1897_v20, %v1900_v15 }
 0x1cd   : > { %vm1912_vm13 = vcmp.lt.s32.totalorder %v1891_v37, 3  ;;  %v1919_v62 = vsel %vm1913_vm11, %v1906_v54, 920167782  ;;  %v1922_v28 = vsel %vm1910_vm10, %v1900_v15, %v1903_v1  ;;  %vm1911_vm14 = vcmp.lt.s32.totalorder %v1891_v37, 2 }
 0x1ce   : > { %v2048_v31 = vsub.s32 0, %v6548_v59  ;;  %v1920_v18 = vsel %vm1912_vm13, %v1903_v1, %v1919_v62  ;;  %v1923_v46 = vsel %vm1913_vm11, %v1909_v44, 1326507024  ;;  %v1914_v10 = vsel %vm1910_vm10, %v1894_v38, %v1897_v20 }
 0x1cf   : > { %v1916_v43 = vsel %vm1912_vm13, %v1900_v15, %v1915_v36  ;;  %v1921_v57 = vsel %vm1911_vm14, %v1918_v0, %v1920_v18  ;;  %v1924_v35 = vsel %vm1912_vm13, %v1906_v54, %v1923_v46  ;;  %v6556_v51 = vsel %vm4567_vm9, 0, %v4566_v50 }
 0x1d0   : > { %v1925_v60 = vsel %vm1911_vm14, %v1922_v28, %v1924_v35  ;;  %v6558_v52 = vmul.u32.u64.low %v1926_v26, %v1921_v57  ;;  %v6559_v27 = vmul.u32.u64.high %v1926_v26, %v1921_v57, %v6558_v52  ;;  %v4577_v3 = vmin.u32 %v2048_v31, %v6548_v59 }
 0x1d1   : > { %v6563_v58 = vmul.u32.u64.low %v1926_v26, %v1925_v60  ;;  %v6564_v5 = vmul.u32.u64.high %v1926_v26, %v1925_v60, %v6563_v58  ;;  %v4584_v1 = vadd.s32 4294967169, %v2194_v45  ;;  %v8293_v37 = vxor.u32 2147483648, %v6440_v49 }
 0x1d2   : > { %v8294_v50 = vxor.u32 2147483648, %v6492_v13  ;;  %v1917_v15 = vsel %vm1911_vm14, %v1914_v10, %v1916_v43  ;;  %v6582_v44 = vadd.f32 %v6357_v30, %v6527_v17  ;;  %v8295_v58 = vand.u32 2147483647, %v6501_v2 }
 0x1d3   : > { %v6571_v54 = vsel %vm1256_vm6, %v8293_v37, %v6440_v49  ;;  %v8296_v45 = vcvt.s32.f32 %v6499_v8  ;;  %v1847_v49 = vshll.u32 %v6407_v11, %v6509_v21  ;;  %v1848_v0 = vshrl.u32 %v6518_v4, %v1846_v29 }
 0x1d4   : > { %v6578_v20 = vsel %vm1568_vm7, %v8294_v50, %v6492_v13  ;;  %v2200_v38 = vadd.s32 1, %v4584_v1  ;;  %v1852_v62 = vshll.u32 %v1851_v47, 23  ;;  %v1742_v13 = vsub.s32 32, %v6556_v51 }
 0x1d5   : > { %v6588_v36 = vmul.f32 %v8296_v45, %v8295_v58  ;;  %v1936_v28 = vadd.s32 1, %v6559_v27  ;;  %v8297_v17 = vand.u32 2147483647, %v6513_v25  ;;  %v2050_v18 = vclz %v4577_v3 }
 0x1d6   : > { %v1933_v2 = vmul.u32 %v1926_v26, %v1917_v15  ;;  %vm1935_vm15 = vc.u32 %v6564_v5, %v6558_v52  ;;  %vm2201_vm0 = vcmp.gt.s32.totalorder %v2200_v38, 0  ;;  %v1746_v8 = vsub.s32 4294967266, %v6556_v51 }
 0x1d7   : > { %v2197_v31 = vand.u32 8388607, %v8297_v17  ;;  %v1937_v11 = vsel %vm1935_vm15, %v1936_v28, %v6559_v27  ;;  %v2202_v21 = vsel %vm2201_vm0, %v2200_v38, 0  ;;  %v2089_v47 = vand.u32 2139095040, %v6582_v44 }
 0x1d8   : > { %v1726_v29 = vadd.s32 %v6399_v7, %v6410_v16  ;;  %v1938_v46 = vadd.s32 %v1937_v11, %v1933_v2  ;;  %v2204_v10 = vand.u32 31, %v2202_v21  ;;  %v6605_v3 = vor.u32 %v1848_v0, %v1847_v49 }
 0x1d9   : > { %v6607_v26 = vor.u32 4788187, %v1852_v62  ;;  %v2198_v57 = vor.u32 8388608, %v2197_v31  ;;  %v4578_v60 = vadd.s32 4294967294, %v2050_v18  ;;  %v1747_v37 = vadd.s32 127, %v1746_v8 }
 0x1da   : > { %v1744_v35 = vshrl.u32 %v1726_v29, %v1742_v13  ;;  %v1939_v27 = vadd.s32 536870912, %v1938_v46  ;;  %v2205_v1 = vsub.s32 32, %v2204_v10  ;;  %v2203_v50 = vshrl.u32 %v2202_v21, 5 }
 0x1db   : > { %v2207_v15 = vshll.u32 %v8276_v40, %v2204_v10  ;;  %v2090_v58 = vshrl.u32 %v2089_v47, 23  ;;  %v2210_v45 = vshll.u32 %v8279_v55, %v2204_v10  ;;  %v2213_v0 = vshll.u32 %v8280_v32, %v2204_v10 }
 0x1dc   : > { %v6612_v7 = vshrl.u32 %v1939_v27, 30  ;;  %v2208_v16 = vshrl.u32 %v8279_v55, %v2205_v1  ;;  %v2211_v49 = vshrl.u32 %v8280_v32, %v2205_v1  ;;  %v2214_v38 = vshrl.u32 %v8275_v22, %v2205_v1 }
 0x1dd   : > { %v2216_v62 = vshll.u32 %v8275_v22, %v2204_v10  ;;  %v2217_v13 = vshrl.u32 %v8288_v23, %v2205_v1  ;;  %vm4579_vm1 = vcmp.lt.s32.totalorder %v4578_v60, 0  ;;  %v1748_v18 = vshll.u32 %v1747_v37, 23 }
 0x1de   : > { %8298 = vst [vmem:[#allocation45_spill] sm:$0xff] %v6612_v7  ;;  %v1941_v28 = vshll.u32 %v6612_v7, 30  ;;  %v2209_v17 = vor.u32 %v2208_v16, %v2207_v15  ;;  %v2212_v31 = vor.u32 %v2211_v49, %v2210_v45  ;;  %v2215_v2 = vor.u32 %v2214_v38, %v2213_v0 }
 0x1df   : > { %v2218_v8 = vor.u32 %v2217_v13, %v2216_v62  ;;  %v2238_v11 = vshll.u32 %v2198_v57, 8  ;;  %v2219_v47 = vshll.u32 %v8288_v23, %v2204_v10  ;;  %v2220_v29 = vshrl.u32 %v8282_v39, %v2205_v1 }
 0x1e0   : > { %v6622_v21 = vsub.s32 %v1938_v46, %v1941_v28  ;;  %v8216_v27 = vand.u32 2147483647, %v6582_v44  ;;  %v6627_v4 = vsel %vm4579_vm1, 0, %v4578_v60  ;;  %vm2222_vm2 = vcmp.lt.s32.totalorder %v2203_v50, 1  ;;  %v791_v28 = vpop.permute.xlu1 %790 }
 0x1e1   : > { %vm2225_vm3 = vcmp.lt.s32.totalorder %v2203_v50, 4  ;;  %v4580_v43 = vadd.s32 4294967169, %v2090_v58  ;;  %v2221_v16 = vor.u32 %v2220_v29, %v2219_v47  ;;  %v2230_v45 = vsel %vm2222_vm2, %v2209_v17, %v2212_v31 }
 0x1e2   : > { %v1944_v15 = vsub.s32 0, %v6622_v21  ;;  %v2227_v37 = vsel %vm2225_vm3, %v2215_v2, 2102212464  ;;  %v2206_v46 = vshrl.u32 %v8276_v40, %v2205_v1  ;;  %vm2224_vm5 = vcmp.lt.s32.totalorder %v2203_v50, 3 }
 0x1e3   : > { %v2231_v57 = vsel %vm2225_vm3, %v2218_v8, 920167782  ;;  %v2234_v10 = vsel %vm2222_vm2, %v2212_v31, %v2215_v2  ;;  %vm1464_vm9 = vcmp.lt.s32.totalorder %v6128_v41, 0  ;;  %vm2223_vm10 = vcmp.lt.s32.totalorder %v2203_v50, 2 }
 0x1e4   : > { %v4573_v60 = vmin.u32 %v1944_v15, %v6622_v21  ;;  %v2232_v49 = vsel %vm2224_vm5, %v2215_v2, %v2231_v57  ;;  %v2235_v0 = vsel %vm2225_vm3, %v2221_v16, 1326507024  ;;  %v2226_v58 = vsel %vm2222_vm2, %v2206_v46, %v2209_v17 }
 0x1e5   : > { %v2228_v38 = vsel %vm2224_vm5, %v2212_v31, %v2227_v37  ;;  %v2233_v62 = vsel %vm2223_vm10, %v2230_v45, %v2232_v49  ;;  %v2236_v13 = vsel %vm2224_vm5, %v2218_v8, %v2235_v0  ;;  %v2093_v7 = vand.u32 8388607, %v8216_v27 }
 0x1e6   : > { %v2237_v1 = vsel %vm2223_vm10, %v2234_v10, %v2236_v13  ;;  %v6638_v47 = vmul.u32.u64.low %v2238_v11, %v2233_v62  ;;  %v6639_v29 = vmul.u32.u64.high %v2238_v11, %v2233_v62, %v6638_v47  ;;  %v2058_v15 = vsub.s32 4294967266, %v6627_v4 }
 0x1e7   : > { %v6645_v2 = vmul.u32.u64.low %v2238_v11, %v2237_v1  ;;  %v6646_v16 = vmul.u32.u64.high %v2238_v11, %v2237_v1, %v6645_v2  ;;  %v2096_v17 = vadd.s32 1, %v4580_v43  ;;  %v1856_v31 = vcvt.s32.f32 %v6605_v3 }
 0x1e8   : > { %v1946_v37 = vclz %v4573_v60  ;;  %v2229_v8 = vsel %vm2223_vm10, %v2226_v58, %v2228_v38  ;;  %v814_v45 = vmul.f32 %v6368_v56, %v791_v28  ;;  %v1854_v46 = vand.u32 2147483647, %v6607_v26 }
 0x1e9   : > { %v8299_v57 = vshll.u32 %v6469_v63, %v6556_v51  ;;  %v2038_v49 = vadd.s32 %v6480_v9, %v6496_v48  ;;  %vm2097_vm11 = vcmp.gt.s32.totalorder %v2096_v17, 0  ;;  %v6659_v0 = vor.u32 4788187, %v1748_v18 }
 0x1ea   : > { %v2054_v3 = vsub.s32 32, %v6627_v4  ;;  %v2248_v43 = vadd.s32 1, %v6639_v29  ;;  %v2098_v50 = vsel %vm2097_vm11, %v2096_v17, 0  ;;  %v6663_v60 = vadd.s32 127, %v2058_v15 }
 0x1eb   : > { %v6655_v10 = vor.u32 %v1744_v35, %v8299_v57  ;;  %v2245_v58 = vmul.u32 %v2238_v11, %v2229_v8  ;;  %vm2247_vm13 = vc.u32 %v6646_v16, %v6638_v47  ;;  %v2094_v63 = vor.u32 8388608, %v2093_v7 }
 0x1ec   : > { %v4574_v51 = vadd.s32 4294967294, %v1946_v37  ;;  %v2249_v26 = vsel %vm2247_vm13, %v2248_v43, %v6639_v29  ;;  %v6668_v35 = vshrl.u32 %v2098_v50, 5  ;;  %v6671_v9 = vadd.f32 %v6357_v30, %v814_v45 }
 0x1ed   : > { %v8301_v48 = vxor.u32 2147483648, %v6588_v36  ;;  %v6680_v11 = vmul.f32 %v1856_v31, %v1854_v46  ;;  %v2250_v38 = vadd.s32 %v2249_v26, %v2245_v58  ;;  %v2100_v62 = vand.u32 31, %v2098_v50 }
 0x1ee   : > { %8300 = vst [vmem:[#allocation46_spill] sm:$0xff] %v6671_v9  ;;  %v1750_v7 = vand.u32 2147483647, %v6659_v0  ;;  %v1752_v13 = vcvt.s32.f32 %v6655_v10  ;;  %v2055_v28 = vshll.u32 %v6548_v59, %v6627_v4  ;;  %v2056_v1 = vshrl.u32 %v2038_v49, %v2054_v3 }
 0x1ef   : > { %v6678_v18 = vsel %vm1464_vm9, %v8301_v48, %v6588_v36  ;;  %v2060_v29 = vshll.u32 %v6663_v60, 23  ;;  %v2251_v15 = vadd.s32 536870912, %v2250_v38  ;;  %v2101_v2 = vsub.s32 32, %v2100_v62 }
 0x1f0   : > { %v6687_v17 = vshll.u32 %v2094_v63, 8  ;;  %vm4575_vm14 = vcmp.lt.s32.totalorder %v4574_v51, 0  ;;  %v2103_v36 = vshll.u32 %v8276_v40, %v2100_v62  ;;  %vm2118_vm15 = vcmp.lt.s32.totalorder %v6668_v35, 1 }
 0x1f1   : > { %v2401_v31 = vand.u32 2139095040, %v6671_v9  ;;  %v6692_v37 = vshrl.u32 %v2251_v15, 30  ;;  %v2104_v8 = vshrl.u32 %v8279_v55, %v2101_v2  ;;  %v2106_v59 = vshll.u32 %v8279_v55, %v2100_v62 }
 0x1f2   : > { %v2107_v4 = vshrl.u32 %v8280_v32, %v2101_v2  ;;  %v2109_v45 = vshll.u32 %v8280_v32, %v2100_v62  ;;  %v2110_v46 = vshrl.u32 %v8275_v22, %v2101_v2  ;;  %v2112_v57 = vshll.u32 %v8275_v22, %v2100_v62 }
 0x1f3   : > { %8302 = vst [vmem:[#allocation47_spill] sm:$0xff] %v6692_v37  ;;  %v2113_v10 = vshrl.u32 %v8288_v23, %v2101_v2  ;;  %v2253_v49 = vshll.u32 %v6692_v37, 30  ;;  %v2105_v0 = vor.u32 %v2104_v8, %v2103_v36  ;;  %vm2120_vm0 = vcmp.lt.s32.totalorder %v6668_v35, 3 }
 0x1f4   : > { %v2108_v3 = vor.u32 %v2107_v4, %v2106_v59  ;;  %v2111_v43 = vor.u32 %v2110_v46, %v2109_v45  ;;  %v2115_v60 = vshll.u32 %v8288_v23, %v2100_v62  ;;  %v2116_v58 = vshrl.u32 %v8282_v39, %v2101_v2 }
 0x1f5   : > { %v2114_v50 = vor.u32 %v2113_v10, %v2112_v57  ;;  %v6705_v63 = vsub.s32 %v2250_v38, %v2253_v49  ;;  %v2102_v26 = vshrl.u32 %v8276_v40, %v2101_v2  ;;  %vm2121_vm1 = vcmp.lt.s32.totalorder %v6668_v35, 4 }
 0x1f6   : > { %v2126_v48 = vsel %vm2118_vm15, %v2105_v0, %v2108_v3  ;;  %v2117_v15 = vor.u32 %v2116_v58, %v2115_v60  ;;  %v2123_v36 = vsel %vm2121_vm1, %v2111_v43, 2102212464  ;;  %v2402_v59 = vshrl.u32 %v2401_v31, 23  ;;  %v786_v31 = vpop.permute.xlu0 %785 }
 0x1f7   : > { %v2127_v8 = vsel %vm2121_vm1, %v2114_v50, 920167782  ;;  %v1949_v4 = vsel %vm4575_vm14, 0, %v4574_v51  ;;  %vm2119_vm2 = vcmp.lt.s32.totalorder %v6668_v35, 2  ;;  %v2130_v38 = vsel %vm2118_vm15, %v2108_v3, %v2111_v43 }
 0x1f8   : > { %v2128_v62 = vsel %vm2120_vm0, %v2111_v43, %v2127_v8  ;;  %v2122_v2 = vsel %vm2118_vm15, %v2102_v26, %v2105_v0  ;;  %v2131_v46 = vsel %vm2121_vm1, %v2117_v15, 1326507024  ;;  %v8215_v57 = vand.u32 2147483647, %v6671_v9 }
 0x1f9   : > { %v2129_v45 = vsel %vm2119_vm2, %v2126_v48, %v2128_v62  ;;  %v2124_v51 = vsel %vm2120_vm0, %v2108_v3, %v2123_v36  ;;  %v2132_v10 = vsel %vm2120_vm0, %v2114_v50, %v2131_v46  ;;  %v1954_v43 = vsub.s32 4294967266, %v1949_v4 }
 0x1fa   : > { %v6727_v49 = vmul.u32.u64.low %v6687_v17, %v2129_v45  ;;  %v6728_v60 = vmul.u32.u64.high %v6687_v17, %v2129_v45, %v6727_v49  ;;  %v2256_v0 = vsub.s32 0, %v6705_v63  ;;  %v2133_v58 = vsel %vm2119_vm2, %v2130_v38, %v2132_v10 }
 0x1fb   : > { %v4592_v26 = vadd.s32 4294967169, %v2402_v59  ;;  %v6736_v15 = vmul.u32.u64.low %v6687_v17, %v2133_v58  ;;  %v6737_v3 = vmul.u32.u64.high %v6687_v17, %v2133_v58, %v6736_v15  ;;  %v813_v50 = vmul.f32 %v6368_v56, %v786_v31 }
 0x1fc   : > { %v6740_v36 = vmul.f32 %v1752_v13, %v1750_v7  ;;  %v6742_v8 = vor.u32 %v2056_v1, %v2055_v28  ;;  %v2125_v62 = vsel %vm2119_vm2, %v2122_v2, %v2124_v51  ;;  %v6746_v46 = vor.u32 4788187, %v2060_v29 }
 0x1fd   : > { %v2408_v45 = vadd.s32 1, %v4592_v26  ;;  %v1934_v59 = vadd.s32 %v6558_v52, %v6564_v5  ;;  %v1950_v38 = vsub.s32 32, %v1949_v4  ;;  %v2144_v10 = vadd.s32 1, %v6728_v60 }
 0x1fe   : > { %v1955_v58 = vadd.s32 127, %v1954_v43  ;;  %v4585_v15 = vmin.u32 %v2256_v0, %v6705_v63  ;;  %v2405_v56 = vand.u32 8388607, %v8215_v57  ;;  %v2141_v7 = vmul.u32 %v6687_v17, %v2125_v62 }
 0x1ff   : > { %vm2409_vm3 = vcmp.gt.s32.totalorder %v2408_v45, 0  ;;  %vm2143_vm5 = vc.u32 %v6737_v3, %v6727_v49  ;;  %v6758_v13 = vadd.f32 %v6357_v30, %v813_v50  ;;  %v1951_v2 = vshll.u32 %v6622_v21, %v1949_v4 }
 0x200   : > { %v2410_v35 = vsel %vm2409_vm3, %v2408_v45, 0  ;;  %v2145_v28 = vsel %vm2143_vm5, %v2144_v10, %v6728_v60  ;;  %v1952_v31 = vshrl.u32 %v1934_v59, %v1950_v38  ;;  %v1956_v51 = vshll.u32 %v1955_v58, 23 }
 0x201   : > { %v2412_v1 = vand.u32 31, %v2410_v35  ;;  %v2146_v17 = vadd.s32 %v2145_v28, %v2141_v7  ;;  %v2258_v43 = vclz %v4585_v15  ;;  %v2406_v0 = vor.u32 8388608, %v2405_v56 }
 0x202   : > { %v2297_v45 = vand.u32 2139095040, %v6758_v13  ;;  %v2411_v59 = vshrl.u32 %v2410_v35, 5  ;;  %v1953_v15 = vor.u32 %v1952_v31, %v1951_v2  ;;  %vm1776_vm10 = vcmp.lt.s32.totalorder %v6223_v12, 0 }
 0x203   : > { %v2413_v26 = vsub.s32 32, %v2412_v1  ;;  %v2147_v62 = vadd.s32 536870912, %v2146_v17  ;;  %v2415_v30 = vshll.u32 %v8276_v40, %v2412_v1  ;;  %v2418_v50 = vshll.u32 %v8279_v55, %v2412_v1 }
 0x204   : > { %v2421_v57 = vshll.u32 %v8280_v32, %v2412_v1  ;;  %v2424_v38 = vshll.u32 %v8275_v22, %v2412_v1  ;;  %v1957_v27 = vor.u32 4788187, %v1956_v51  ;;  %v4586_v52 = vadd.s32 4294967294, %v2258_v43 }
 0x205   : > { %v2416_v60 = vshrl.u32 %v8279_v55, %v2413_v26  ;;  %v2419_v10 = vshrl.u32 %v8280_v32, %v2413_v26  ;;  %v2422_v21 = vshrl.u32 %v8275_v22, %v2413_v26  ;;  %v6772_v4 = vshrl.u32 %v2147_v62, 30 }
 0x206   : > { %v2425_v58 = vshrl.u32 %v8288_v23, %v2413_v26  ;;  %vm1672_vm11 = vcmp.lt.s32.totalorder %v6272_v6, 0  ;;  %v2427_v62 = vshll.u32 %v8288_v23, %v2412_v1  ;;  %v2428_v35 = vshrl.u32 %v8282_v39, %v2413_v26 }
 0x207   : > { %8303 = vst [vmem:[#allocation48_spill] sm:$0xff] %v6772_v4  ;;  %v2417_v56 = vor.u32 %v2416_v60, %v2415_v30  ;;  %v2420_v7 = vor.u32 %v2419_v10, %v2418_v50  ;;  %v2423_v28 = vor.u32 %v2422_v21, %v2421_v57  ;;  %v2149_v29 = vshll.u32 %v6772_v4, 30 }
 0x208   : > { %v2426_v5 = vor.u32 %v2425_v58, %v2424_v38  ;;  %v2446_v48 = vshll.u32 %v2406_v0, 8  ;;  %v2298_v37 = vshrl.u32 %v2297_v45, 23  ;;  %vm2430_vm13 = vcmp.lt.s32.totalorder %v2411_v59, 1 }
 0x209   : > { %v6781_v9 = vsub.s32 %v2146_v17, %v2149_v29  ;;  %vm2432_vm14 = vcmp.lt.s32.totalorder %v2411_v59, 3  ;;  %vm2433_vm15 = vcmp.lt.s32.totalorder %v2411_v59, 4  ;;  %v2429_v57 = vor.u32 %v2428_v35, %v2427_v62 }
 0x20a   : > { %v2435_v2 = vsel %vm2433_vm15, %v2423_v28, 2102212464  ;;  %v2438_v31 = vsel %vm2430_vm13, %v2417_v56, %v2420_v7  ;;  %v2439_v51 = vsel %vm2433_vm15, %v2426_v5, 920167782  ;;  %v2414_v30 = vshrl.u32 %v8276_v40, %v2413_v26 }
 0x20b   : > { %v2152_v43 = vsub.s32 0, %v6781_v9  ;;  %vm2431_vm0 = vcmp.lt.s32.totalorder %v2411_v59, 2  ;;  %v2440_v1 = vsel %vm2432_vm14, %v2423_v28, %v2439_v51  ;;  %vm4587_vm1 = vcmp.lt.s32.totalorder %v4586_v52, 0 }
 0x20c   : > { %v2441_v0 = vsel %vm2431_vm0, %v2438_v31, %v2440_v1  ;;  %v2442_v50 = vsel %vm2430_vm13, %v2420_v7, %v2423_v28  ;;  %v2443_v29 = vsel %vm2433_vm15, %v2429_v57, 1326507024  ;;  %v2434_v17 = vsel %vm2430_vm13, %v2414_v30, %v2417_v56 }
 0x20d   : > { %v2436_v45 = vsel %vm2432_vm14, %v2420_v7, %v2435_v2  ;;  %v2444_v60 = vsel %vm2432_vm14, %v2426_v5, %v2443_v29  ;;  %v8221_v10 = vand.u32 2147483647, %v6758_v13  ;;  %v4588_v26 = vadd.s32 4294967169, %v2298_v37 }
 0x20e   : > { %v2445_v21 = vsel %vm2431_vm0, %v2442_v50, %v2444_v60  ;;  %v6791_v38 = vmul.u32.u64.low %v2446_v48, %v2441_v0  ;;  %v6792_v58 = vmul.u32.u64.high %v2446_v48, %v2441_v0, %v6791_v38  ;;  %v6795_v62 = vsel %vm4587_vm1, 0, %v4586_v52 }
 0x20f   : > { %v4581_v35 = vmin.u32 %v2152_v43, %v6781_v9  ;;  %v6798_v28 = vmul.u32.u64.low %v2446_v48, %v2445_v21  ;;  %v6799_v57 = vmul.u32.u64.high %v2446_v48, %v2445_v21, %v6798_v28  ;;  %v8304_v56 = vxor.u32 2147483648, %v6680_v11 }
 0x210   : > { %v1958_v7 = vand.u32 2147483647, %v1957_v27  ;;  %v2437_v2 = vsel %vm2431_vm0, %v2434_v17, %v2436_v45  ;;  %v2304_v31 = vadd.s32 1, %v4588_v26  ;;  %v8306_v37 = vxor.u32 2147483648, %v6740_v36 }
 0x211   : > { %v6806_v5 = vsel %vm1776_vm10, %v8304_v56, %v6680_v11  ;;  %v8307_v51 = vand.u32 2147483647, %v6746_v46  ;;  %v8308_v43 = vcvt.s32.f32 %v6742_v8  ;;  %v1960_v1 = vcvt.s32.f32 %v1953_v15 }
 0x212   : > { %8305 = vst [vmem:[#allocation49_spill] sm:$0xff] %v6806_v5  ;;  %v6814_v52 = vsel %vm1672_vm11, %v8306_v37, %v6740_v36  ;;  %v8222_v11 = vand.u32 2147483647, %v6008_v24  ;;  %v2266_v27 = vsub.s32 4294967266, %v6795_v62  ;;  %v2456_v59 = vadd.s32 1, %v6792_v58 }
 0x213   : > { %v6820_v30 = vmul.f32 %v8308_v43, %v8307_v51  ;;  %v2301_v0 = vand.u32 8388607, %v8221_v10  ;;  %vm2305_vm2 = vcmp.gt.s32.totalorder %v2304_v31, 0  ;;  %v2154_v50 = vclz %v4581_v35 }
 0x214   : > { %v2453_v36 = vmul.u32 %v2446_v48, %v2437_v2  ;;  %vm2455_vm3 = vc.u32 %v6799_v57, %v6791_v38  ;;  %v2306_v46 = vsel %vm2305_vm2, %v2304_v31, 0  ;;  %v6829_v8 = vmul.f32 %v1960_v1, %v1958_v7 }
 0x215   : > { %v2246_v15 = vadd.s32 %v6638_v47, %v6646_v16  ;;  %v2457_v29 = vsel %vm2455_vm3, %v2456_v59, %v6792_v58  ;;  %v2308_v17 = vand.u32 31, %v2306_v46  ;;  %v2262_v45 = vsub.s32 32, %v6795_v62 }
 0x216   : > { %v6837_v60 = vadd.s32 %v6727_v49, %v6737_v3  ;;  %v2458_v21 = vadd.s32 %v2457_v29, %v2453_v36  ;;  %v6841_v48 = vand.u32 8388607, %v8222_v11  ;;  %v2263_v26 = vshll.u32 %v6705_v63, %v6795_v62 }
 0x217   : > { %v2267_v35 = vadd.s32 127, %v2266_v27  ;;  %v2302_v28 = vor.u32 8388608, %v2301_v0  ;;  %v2309_v47 = vsub.s32 32, %v2308_v17  ;;  %v4582_v16 = vadd.s32 4294967294, %v2154_v50 }
 0x218   : > { %v2459_v58 = vadd.s32 536870912, %v2458_v21  ;;  %v2311_v56 = vshll.u32 %v8276_v40, %v2308_v17  ;;  %v2314_v7 = vshll.u32 %v8279_v55, %v2308_v17  ;;  %v2317_v2 = vshll.u32 %v8280_v32, %v2308_v17 }
 0x219   : > { %v2312_v49 = vshrl.u32 %v8279_v55, %v2309_v47  ;;  %v2315_v3 = vshrl.u32 %v8280_v32, %v2309_v47  ;;  %v2318_v31 = vshrl.u32 %v8275_v22, %v2309_v47  ;;  %v2307_v63 = vshrl.u32 %v2306_v46, 5 }
 0x21a   : > { %v6851_v37 = vshrl.u32 %v2459_v58, 30  ;;  %v2320_v62 = vshll.u32 %v8275_v22, %v2308_v17  ;;  %v2321_v51 = vshrl.u32 %v8288_v23, %v2309_v47  ;;  %v2264_v43 = vshrl.u32 %v2246_v15, %v2262_v45 }
 0x21b   : > { %v2313_v1 = vor.u32 %v2312_v49, %v2311_v56  ;;  %v2316_v27 = vor.u32 %v2315_v3, %v2314_v7  ;;  %v2319_v59 = vor.u32 %v2318_v31, %v2317_v2  ;;  %v2268_v0 = vshll.u32 %v2267_v35, 23 }
 0x21c   : > { %8309 = vst [vmem:[#allocation50_spill] sm:$0xff] %v6851_v37  ;;  %v2461_v50 = vshll.u32 %v6851_v37, 30  ;;  %v2322_v36 = vor.u32 %v2321_v51, %v2320_v62  ;;  %v2342_v29 = vshll.u32 %v2302_v28, 8  ;;  %vm4583_vm5 = vcmp.lt.s32.totalorder %v4582_v16, 0 }
 0x21d   : > { %v2310_v10 = vshrl.u32 %v8276_v40, %v2309_v47  ;;  %v2323_v58 = vshll.u32 %v8288_v23, %v2308_v17  ;;  %v2324_v46 = vshrl.u32 %v8282_v39, %v2309_v47  ;;  %vm2326_vm13 = vcmp.lt.s32.totalorder %v2307_v63, 1 }
 0x21e   : > { %v6859_v11 = vsub.s32 %v2458_v21, %v2461_v50  ;;  %vm2328_vm14 = vcmp.lt.s32.totalorder %v2307_v63, 3  ;;  %vm2329_vm15 = vcmp.lt.s32.totalorder %v2307_v63, 4  ;;  %v2334_v56 = vsel %vm2326_vm13, %v2313_v1, %v2316_v27 }
 0x21f   : > { %v2325_v15 = vor.u32 %v2324_v46, %v2323_v58  ;;  %v2331_v45 = vsel %vm2329_vm15, %v2319_v59, 2102212464  ;;  %v2335_v35 = vsel %vm2329_vm15, %v2322_v36, 920167782  ;;  %vm2327_vm0 = vcmp.lt.s32.totalorder %v2307_v63, 2 }
 0x220   : > { %v2464_v7 = vsub.s32 0, %v6859_v11  ;;  %v2330_v28 = vsel %vm2326_vm13, %v2310_v10, %v2313_v1  ;;  %v2336_v49 = vsel %vm2328_vm14, %v2319_v59, %v2335_v35  ;;  %v2332_v3 = vsel %vm2328_vm14, %v2316_v27, %v2331_v45 }
 0x221   : > { %v2337_v17 = vsel %vm2327_vm0, %v2334_v56, %v2336_v49  ;;  %v2338_v2 = vsel %vm2326_vm13, %v2316_v27, %v2319_v59  ;;  %v2339_v47 = vsel %vm2329_vm15, %v2325_v15, 1326507024  ;;  %v6864_v21 = vor.u32 %v2264_v43, %v2263_v26 }
 0x222   : > { %v6866_v31 = vor.u32 4788187, %v2268_v0  ;;  %v2340_v62 = vsel %vm2328_vm14, %v2322_v36, %v2339_v47  ;;  %v856_v51 = vshrl.u32 %v8279_v55, %v6263_v34  ;;  %v6872_v50 = vsel %vm4583_vm5, 0, %v4582_v16 }
 0x223   : > { %v2341_v10 = vsel %vm2327_vm0, %v2338_v2, %v2340_v62  ;;  %v6874_v1 = vmul.u32.u64.low %v2342_v29, %v2337_v17  ;;  %v6875_v58 = vmul.u32.u64.high %v2342_v29, %v2337_v17, %v6874_v1  ;;  %v4593_v27 = vmin.u32 %v2464_v7, %v6859_v11 }
 0x224   : > { %v2333_v59 = vsel %vm2327_vm0, %v2330_v28, %v2332_v3  ;;  %v6879_v26 = vmul.u32.u64.low %v2342_v29, %v2341_v10  ;;  %v6880_v43 = vmul.u32.u64.high %v2342_v29, %v2341_v10, %v6879_v26  ;;  %v855_v63 = vshll.u32 %v8276_v40, %v6134_v33 }
 0x225   : > { %v858_v0 = vshll.u32 %v8279_v55, %v6134_v33  ;;  %v859_v16 = vshrl.u32 %v8280_v32, %v6263_v34  ;;  %v862_v36 = vshrl.u32 %v8275_v22, %v6263_v34  ;;  %v2162_v46 = vsub.s32 4294967266, %v6872_v50 }
 0x226   : > { %v861_v15 = vshll.u32 %v8280_v32, %v6134_v33  ;;  %v865_v45 = vshrl.u32 %v8288_v23, %v6263_v34  ;;  %v868_v56 = vshrl.u32 %v8282_v39, %v6263_v34  ;;  %v2349_v35 = vmul.u32 %v2342_v29, %v2333_v59 }
 0x227   : > { %v2352_v7 = vadd.s32 1, %v6875_v58  ;;  %v864_v28 = vshll.u32 %v8275_v22, %v6134_v33  ;;  %v867_v49 = vshll.u32 %v8288_v23, %v6134_v33  ;;  %v2466_v3 = vclz %v4593_v27 }
 0x228   : > { %vm2351_vm1 = vc.u32 %v6880_v43, %v6874_v1  ;;  %v857_v17 = vor.u32 %v856_v51, %v855_v63  ;;  %v863_v2 = vor.u32 %v862_v36, %v861_v15  ;;  %v860_v62 = vor.u32 %v859_v16, %v858_v0 }
 0x229   : > { %v2353_v47 = vsel %vm2351_vm1, %v2352_v7, %v6875_v58  ;;  %v866_v10 = vor.u32 %v865_v45, %v864_v28  ;;  %v869_v26 = vor.u32 %v868_v56, %v867_v49  ;;  %v2270_v29 = vand.u32 2147483647, %v6866_v31 }
 0x22a   : > { %v2272_v59 = vcvt.s32.f32 %v6864_v21  ;;  %v2354_v37 = vadd.s32 %v2353_v47, %v2349_v35  ;;  %v846_v4 = vor.u32 8388608, %v6841_v48  ;;  %v2158_v33 = vsub.s32 32, %v6872_v50 }
 0x22b   : > { %v2163_v27 = vadd.s32 127, %v2162_v46  ;;  %v854_v5 = vshrl.u32 %v8276_v40, %v6263_v34  ;;  %vm873_vm2 = vcmp.lt.s32.totalorder %v6131_v19, 4  ;;  %v4594_v51 = vadd.s32 4294967294, %v2466_v3 }
 0x22c   : > { %v2355_v58 = vadd.s32 536870912, %v2354_v37  ;;  %vm870_vm3 = vcmp.lt.s32.totalorder %v6131_v19, 1  ;;  %v875_v63 = vsel %vm873_vm2, %v863_v2, 2102212464  ;;  %vm871_vm5 = vcmp.lt.s32.totalorder %v6131_v19, 2 }
 0x22d   : > { %v878_v31 = vsel %vm870_vm3, %v857_v17, %v860_v62  ;;  %v879_v21 = vsel %vm873_vm2, %v866_v10, 920167782  ;;  %v883_v0 = vsel %vm873_vm2, %v869_v26, 1326507024  ;;  %vm872_vm13 = vcmp.lt.s32.totalorder %v6131_v19, 3 }
 0x22e   : > { %v6914_v16 = vshrl.u32 %v2355_v58, 30  ;;  %v874_v48 = vsel %vm870_vm3, %v854_v5, %v857_v17  ;;  %v882_v36 = vsel %vm870_vm3, %v860_v62, %v863_v2  ;;  %v876_v46 = vsel %vm872_vm13, %v860_v62, %v875_v63 }
 0x22f   : > { %v880_v34 = vsel %vm872_vm13, %v863_v2, %v879_v21  ;;  %v884_v15 = vsel %vm872_vm13, %v866_v10, %v883_v0  ;;  %v886_v45 = vshll.u32 %v846_v4, 8  ;;  %v2160_v56 = vshrl.u32 %v6837_v60, %v2158_v33 }
 0x230   : > { %v2164_v35 = vshll.u32 %v2163_v27, 23  ;;  %v2357_v7 = vshll.u32 %v6914_v16, 30  ;;  %v881_v28 = vsel %vm871_vm5, %v878_v31, %v880_v34  ;;  %vm4595_vm14 = vcmp.lt.s32.totalorder %v4594_v51, 0 }
 0x231   : > { %v885_v49 = vsel %vm871_vm5, %v882_v36, %v884_v15  ;;  %v6923_v3 = vmul.u32.u64.low %v886_v45, %v881_v28  ;;  %v6924_v47 = vmul.u32.u64.high %v886_v45, %v881_v28, %v6923_v3  ;;  %v877_v4 = vsel %vm871_vm5, %v874_v48, %v876_v46 }
 0x232   : > { %v6927_v5 = vsub.s32 %v2354_v37, %v2357_v7  ;;  %v6931_v60 = vmul.u32.u64.low %v886_v45, %v885_v49  ;;  %v6932_v17 = vmul.u32.u64.high %v886_v45, %v885_v49, %v6931_v60  ;;  %v2066_v2 = vxor.u32 2147483648, %v6820_v30 }
 0x233   : > { %v1962_v62 = vxor.u32 2147483648, %v6829_v8  ;;  %v2159_v10 = vshll.u32 %v6781_v9, %v6872_v50  ;;  %v942_v26 = vand.u32 2147483647, %v6024_v53  ;;  %v6939_v33 = vmul.f32 %v2272_v59, %v2270_v29  ;;  %v8310_v59 = vld [vmem:[#allocation34_spill] sm:$0xff] }
 0x234   : > { %v2454_v37 = vadd.s32 %v6791_v38, %v6799_v57  ;;  %v6943_v27 = vsel %vm4595_vm14, 0, %v4594_v51  ;;  %v2360_v19 = vsub.s32 0, %v6927_v5  ;;  %v2165_v63 = vor.u32 4788187, %v2164_v35 }
 0x235   : > { %v2161_v58 = vor.u32 %v2160_v56, %v2159_v10  ;;  %v893_v31 = vmul.u32 %v886_v45, %v877_v4  ;;  %v896_v21 = vadd.s32 1, %v6924_v47  ;;  %vm895_vm15 = vc.u32 %v6932_v17, %v6923_v3 }
 0x236   : > { %v4589_v0 = vmin.u32 %v2360_v19, %v6927_v5  ;;  %v960_v9 = vshrl.u32 %v8279_v55, %v6301_v42  ;;  %v963_v38 = vshrl.u32 %v8280_v32, %v6301_v42  ;;  %v2470_v57 = vsub.s32 32, %v6943_v27  ;;  %v8311_v19 = vld [vmem:[#allocation36_spill] sm:$0xff] }
 0x237   : > { %v897_v50 = vsel %vm895_vm15, %v896_v21, %v6924_v47  ;;  %v949_v29 = vand.u32 8388607, %v942_v26  ;;  %v959_v51 = vshll.u32 %v8276_v40, %v8310_v59  ;;  %v962_v46 = vshll.u32 %v8279_v55, %v8310_v59 }
 0x238   : > { %v2362_v48 = vclz %v4589_v0  ;;  %v898_v36 = vadd.s32 %v897_v50, %v893_v31  ;;  %v966_v34 = vshrl.u32 %v8275_v22, %v6301_v42  ;;  %v965_v15 = vshll.u32 %v8280_v32, %v8310_v59  ;;  %v8312_v31 = vld [vmem:[#allocation39_spill] sm:$0xff] }
 0x239   : > { %v968_v45 = vshll.u32 %v8275_v22, %v8310_v59  ;;  %v969_v56 = vshrl.u32 %v8288_v23, %v6301_v42  ;;  %v972_v35 = vshrl.u32 %v8282_v39, %v6301_v42  ;;  %v961_v49 = vor.u32 %v960_v9, %v959_v51  ;;  %v8313_v39 = vld [vmem:[#allocation41_spill] sm:$0xff] }
 0x23a   : > { %v4590_v7 = vadd.s32 4294967294, %v2362_v48  ;;  %v899_v28 = vadd.s32 536870912, %v898_v36  ;;  %v964_v47 = vor.u32 %v963_v38, %v962_v46  ;;  %v2474_v55 = vsub.s32 4294967266, %v6943_v27 }
 0x23b   : > { %v967_v4 = vor.u32 %v966_v34, %v965_v15  ;;  %v970_v60 = vor.u32 %v969_v56, %v968_v45  ;;  %v971_v32 = vshll.u32 %v8288_v23, %v8310_v59  ;;  %v950_v22 = vor.u32 8388608, %v949_v29 }
 0x23c   : > { %vm4591_vm0 = vcmp.lt.s32.totalorder %v4590_v7, 0  ;;  %v6975_v10 = vshrl.u32 %v899_v28, 30  ;;  %vm977_vm1 = vcmp.lt.s32.totalorder %v8311_v19, 4  ;;  %vm8227_vm2 = vcmp.lt.s32.totalorder %v8312_v31, 0 }
 0x23d   : > { %vm8231_vm3 = vcmp.lt.s32.totalorder %v8313_v39, 0  ;;  %v6980_v21 = vsel %vm4591_vm0, 0, %v4590_v7  ;;  %v973_v0 = vor.u32 %v972_v35, %v971_v32  ;;  %vm974_vm5 = vcmp.lt.s32.totalorder %v8311_v19, 1 }
 0x23e   : > { %v983_v9 = vsel %vm977_vm1, %v970_v60, 920167782  ;;  %v2166_v38 = vand.u32 2147483647, %v2165_v63  ;;  %v901_v23 = vshll.u32 %v6975_v10, 30  ;;  %vm976_vm13 = vcmp.lt.s32.totalorder %v8311_v19, 3 }
 0x23f   : > { %v982_v50 = vsel %vm974_vm5, %v961_v49, %v964_v47  ;;  %v2472_v29 = vshrl.u32 %v2454_v37, %v2470_v57  ;;  %v2475_v59 = vadd.s32 127, %v2474_v55  ;;  %v958_v51 = vshrl.u32 %v8276_v40, %v6301_v42 }
 0x240   : > { %v984_v48 = vsel %vm976_vm13, %v967_v4, %v983_v9  ;;  %v2370_v46 = vsub.s32 4294967266, %v6980_v21  ;;  %v6994_v34 = vsub.s32 %v898_v36, %v901_v23  ;;  %vm975_vm14 = vcmp.lt.s32.totalorder %v8311_v19, 2 }
 0x241   : > { %v979_v63 = vsel %vm977_vm1, %v967_v4, 2102212464  ;;  %v985_v15 = vsel %vm975_vm14, %v982_v50, %v984_v48  ;;  %v986_v37 = vsel %vm974_vm5, %v964_v47, %v967_v4  ;;  %v987_v40 = vsel %vm977_vm1, %v973_v0, 1326507024 }
 0x242   : > { %v990_v42 = vshll.u32 %v950_v22, 8  ;;  %v2168_v57 = vcvt.s32.f32 %v2161_v58  ;;  %v2471_v36 = vshll.u32 %v6859_v11, %v6943_v27  ;;  %v904_v45 = vsub.s32 0, %v6994_v34 }
 0x243   : > { %v978_v56 = vsel %vm974_vm5, %v958_v51, %v961_v49  ;;  %v980_v35 = vsel %vm976_vm13, %v964_v47, %v979_v63  ;;  %v988_v7 = vsel %vm976_vm13, %v970_v60, %v987_v40  ;;  %v2476_v58 = vshll.u32 %v2475_v59, 23 }
 0x244   : > { %v7014_v28 = vmul.u32.u64.low %v990_v42, %v985_v15  ;;  %v7015_v55 = vmul.u32.u64.high %v990_v42, %v985_v15, %v7014_v28  ;;  %v7018_v4 = vmul.f32 %v2168_v57, %v2166_v38  ;;  %v4533_v11 = vmin.u32 %v904_v45, %v6994_v34 }
 0x245   : > { %v989_v27 = vsel %vm975_vm14, %v986_v37, %v988_v7  ;;  %v7023_v32 = vor.u32 %v2472_v29, %v2471_v36  ;;  %v2371_v49 = vadd.s32 127, %v2370_v46  ;;  %v7033_v60 = vsel %vm8227_vm2, %v2066_v2, %v6820_v30 }
 0x246   : > { %v7025_v22 = vmul.u32.u64.low %v990_v42, %v989_v27  ;;  %v7026_v47 = vmul.u32.u64.high %v990_v42, %v989_v27, %v7025_v22  ;;  %v7040_v0 = vsel %vm8231_vm3, %v1962_v62, %v6829_v8  ;;  %v906_v9 = vclz %v4533_v11 }
 0x247   : > { %v981_v38 = vsel %vm975_vm14, %v978_v56, %v980_v35  ;;  %v2274_v23 = vxor.u32 2147483648, %v6939_v33  ;;  %v2366_v50 = vsub.s32 32, %v6980_v21  ;;  %vm840_vm15 = vcmp.lt.s32.totalorder %v6008_v24, 0 }
 0x248   : > { %v1000_v30 = vadd.s32 1, %v7015_v55  ;;  %v2170_v2 = vxor.u32 2147483648, %v7018_v4  ;;  %v7049_v29 = vor.u32 4788187, %v2476_v58  ;;  %v2350_v8 = vadd.s32 %v6874_v1, %v6880_v43 }
 0x249   : > { %v4534_v62 = vadd.s32 4294967294, %v906_v9  ;;  %v2480_v59 = vcvt.s32.f32 %v7023_v32  ;;  %v2372_v19 = vshll.u32 %v2371_v49, 23  ;;  %v8314_v51 = vand.u32 2147483647, %v6008_v24  ;;  %v8323_v32 = vld [vmem:[#allocation27_spill] sm:$0xff]  ;;  %v8327_v9 = vld [vmem:[#allocation30_spill] sm:$0xff] }
 0x24a   : > { %v997_v46 = vmul.u32 %v990_v42, %v981_v38  ;;  %vm999_vm1 = vc.u32 %v7026_v47, %v7014_v28  ;;  %v2367_v63 = vshll.u32 %v6927_v5, %v6980_v21  ;;  %v894_v1 = vadd.s32 %v6923_v3, %v6932_v17  ;;  %v8317_v42 = vld [vmem:[#allocation26_spill] sm:$0xff]  ;;  %v8321_v5 = vld [vmem:[#allocation29_spill] sm:$0xff] }
 0x24b   : > { %vm7056_vm0 = vcmp.le.f32.partialorder %v8314_v51, 0.7853982  ;;  %vm4535_vm5 = vcmp.lt.s32.totalorder %v4534_v62, 0  ;;  %v1001_v43 = vsel %vm999_vm1, %v1000_v30, %v7015_v55  ;;  %v2368_v15 = vshrl.u32 %v2350_v8, %v2366_v50  ;;  %v8322_v55 = vld [vmem:[#allocation35_spill] sm:$0xff]  ;;  %v8328_v8 = vld [vmem:[#allocation38_spill] sm:$0xff] }
 0x24c   : > { %v909_v37 = vsel %vm4535_vm5, 0, %v4534_v62  ;;  %v924_v40 = vsub.s32 4, %v6975_v10  ;;  %v1002_v57 = vadd.s32 %v1001_v43, %v997_v46  ;;  %v8318_v56 = vand.u32 2147483647, %v8317_v42 }
 0x24d   : > { %v910_v36 = vsub.s32 32, %v909_v37  ;;  %v914_v45 = vsub.s32 4294967266, %v909_v37  ;;  %v1132_v21 = vsub.s32 4, %v8321_v5  ;;  %vm8229_vm14 = vcmp.lt.s32.totalorder %v6513_v25, 0 }
 0x24e   : > { %vm7070_vm13 = vcmp.le.f32.partialorder %v8318_v56, 0.7853982  ;;  %v2373_v3 = vor.u32 4788187, %v2372_v19  ;;  %v911_v17 = vshll.u32 %v6994_v34, %v909_v37  ;;  %v1003_v7 = vadd.s32 536870912, %v1002_v57 }
 0x24f   : > { %v1134_v58 = vsel %vm7070_vm13, %v8317_v42, %v8322_v55  ;;  %vm8230_vm1 = vcmp.lt.s32.totalorder %v6582_v44, 0  ;;  %v912_v11 = vshrl.u32 %v894_v1, %v910_v36  ;;  %v915_v27 = vadd.s32 127, %v914_v45 }
 0x250   : > { %v8324_v49 = vand.u32 2147483647, %v8323_v32  ;;  %v1236_v38 = vsub.s32 4, %v8327_v9  ;;  %v2369_v50 = vor.u32 %v2368_v15, %v2367_v63  ;;  %v925_v34 = vsel %vm840_vm15, %v924_v40, %v6975_v10 }
 0x251   : > { %v1004_v30 = vshrl.u32 %v1003_v7, 30  ;;  %v913_v19 = vor.u32 %v912_v11, %v911_v17  ;;  %v916_v51 = vshll.u32 %v915_v27, 23  ;;  %v1133_v46 = vsel %vm1048_vm8, %v1132_v21, %v8321_v5 }
 0x252   : > { %vm7084_vm5 = vcmp.le.f32.partialorder %v8324_v49, 0.7853982  ;;  %5272 = vcosq.f32 %v1134_v58  ;;  %v2478_v1 = vand.u32 2147483647, %v7049_v29  ;;  %v2374_v63 = vand.u32 2147483647, %v2373_v3 }
 0x253   : > { %v1238_v62 = vsel %vm7084_vm5, %v8323_v32, %v8328_v8  ;;  %v1005_v43 = vshll.u32 %v1004_v30, 30  ;;  %5274 = vsinq.f32 %v1134_v58  ;;  %v917_v15 = vor.u32 4788187, %v916_v51  ;;  %v8332_v3 = vld [vmem:[#allocation32_spill] sm:$0xff] }
 0x254   : > { %v927_v10 = vsel %vm7056_vm0, 0, %v925_v34  ;;  %v1237_v37 = vsel %vm1152_vm12, %v1236_v38, %v8327_v9  ;;  %5276 = vcosq.f32 %v1238_v62  ;;  %v2376_v40 = vcvt.s32.f32 %v2369_v50 }
 0x255   : > { %v7105_v36 = vsub.s32 %v1002_v57, %v1005_v43  ;;  %v1135_v45 = vsel %vm7070_vm13, 0, %v1133_v46  ;;  %5278 = vsinq.f32 %v1238_v62  ;;  %vm8228_vm8 = vcmp.lt.s32.totalorder %v6758_v13, 0 }
 0x256   : > { %v918_v29 = vand.u32 2147483647, %v917_v15  ;;  %v920_v56 = vcvt.s32.f32 %v913_v19  ;;  %v8329_v5 = vand.u32 2147483647, %v6031_v61  ;;  %v1340_v17 = vsub.s32 4, %v8332_v3 }
 0x257   : > { %v2377_v7 = vmul.f32 %v2376_v40, %v2374_v63  ;;  %v1008_v57 = vsub.s32 0, %v7105_v36  ;;  %v1239_v35 = vsel %vm7084_vm5, 0, %v1237_v37  ;;  %v7129_v58 = vsel %vm8229_vm14, %v2274_v23, %v6939_v33 }
 0x258   : > { %vm7112_vm2 = vcmp.le.f32.partialorder %v8329_v5, 0.7853982  ;;  %v921_v11 = vmul.f32 %v920_v56, %v918_v29  ;;  %v1028_v27 = vsub.s32 4, %v1004_v30  ;;  %v1139_v49 = vadd.s32 3, %v1135_v45  ;;  %v8336_v5 = vld [vmem:[#allocation28_spill] sm:$0xff] }
 0x259   : > { %v1342_v55 = vsel %vm7112_vm2, %v6031_v61, %v6571_v54  ;;  %v7136_v22 = vsel %vm8230_vm1, %v2170_v2, %v7018_v4  ;;  %v7138_v9 = vmul.f32 %v2480_v59, %v2478_v1  ;;  %v931_v54 = vadd.s32 3, %v927_v10 }
 0x25a   : > { %v4537_v38 = vmin.u32 %v1008_v57, %v7105_v36  ;;  %v922_v50 = vxor.u32 2147483648, %v921_v11  ;;  %v1243_v34 = vadd.s32 3, %v1239_v35  ;;  %v1341_v33 = vsel %vm1256_vm6, %v1340_v17, %v8332_v3  ;;  %v8340_v35 = vld [vmem:[#allocation42_spill] sm:$0xff] }
 0x25b   : > { %5280 = vcosq.f32 %v1342_v55  ;;  %v2378_v23 = vxor.u32 2147483648, %v2377_v7  ;;  %vm944_vm12 = vcmp.lt.s32.totalorder %v6024_v53, 0  ;;  %vm7149_vm13 = vcmp.le.f32.partialorder %v942_v26, 0.7853982 }
 0x25c   : > { %v1010_v8 = vclz %v4537_v38  ;;  %5282 = vsinq.f32 %v1342_v55  ;;  %v923_v4 = vsel %vm840_vm15, %v922_v50, %v921_v11  ;;  %v1029_v59 = vsel %vm944_vm12, %v1028_v27, %v1004_v30  ;;  %v8335_v30 = vld [vmem:[#allocation31_spill] sm:$0xff] }
 0x25d   : > { %v7155_v62 = vand.u32 3, %v1139_v49  ;;  %v2482_v19 = vxor.u32 2147483648, %v7138_v9  ;;  %v926_v51 = vsel %vm7056_vm0, %v6008_v24, %v923_v4  ;;  %v1343_v1 = vsel %vm7112_vm2, 0, %v1341_v33 }
 0x25e   : > { %v4538_v46 = vadd.s32 4294967294, %v1010_v8  ;;  %v7163_v63 = vand.u32 3, %v931_v54  ;;  %v998_v26 = vadd.s32 %v7014_v28, %v7026_v47  ;;  %v7167_v43 = vand.u32 3, %v1243_v34 }
 0x25f   : > { %v1444_v15 = vsub.s32 4, %v8335_v30  ;;  %v5273_v10 = vpop.eup %5272  ;;  %v7172_v37 = vsel %vm8228_vm8, %v2378_v23, %v2377_v7  ;;  %5284 = vcosq.f32 %v926_v51  ;;  %v1031_v48 = vsel %vm7149_vm13, 0, %v1029_v59 }
 0x260   : > { %vm4539_vm6 = vcmp.lt.s32.totalorder %v4538_v46, 0  ;;  %v5275_v40 = vpop.eup %5274  ;;  %5286 = vsinq.f32 %v926_v51  ;;  %vm1142_vm2 = vcmp.eq.s32.totalorder %v7155_v62, 0  ;;  %v1347_v28 = vadd.s32 3, %v1343_v1  ;;  %v8344_v51 = vld [vmem:[#allocation37_spill] sm:$0xff] }
 0x261   : > { %v1013_v45 = vsel %vm4539_vm6, 0, %v4538_v46  ;;  %v5277_v47 = vpop.eup %5276  ;;  %vm1145_vm15 = vcmp.eq.s32.totalorder %v7155_v62, 2  ;;  %v8337_v21 = vand.u32 2147483647, %v8336_v5  ;;  %v1035_v7 = vadd.s32 3, %v1031_v48 }
 0x262   : > { %v1014_v29 = vsub.s32 32, %v1013_v45  ;;  %v1018_v56 = vsub.s32 4294967266, %v1013_v45  ;;  %v5279_v17 = vpop.eup %5278  ;;  %vm1141_vm5 = vcmp.lt.s32.totalorder %v7155_v62, 2  ;;  %vm1246_vm6 = vcmp.eq.s32.totalorder %v7167_v43, 0 }
 0x263   : > { %vm7180_vm0 = vcmp.le.f32.partialorder %v8337_v21, 0.7853982  ;;  %v1445_v57 = vsel %vm1360_vm4, %v1444_v15, %v8335_v30  ;;  %v1015_v11 = vshll.u32 %v7105_v36, %v1013_v45  ;;  %v1146_v54 = vxor.u32 2147483648, %v5273_v10 }
 0x264   : > { %v1446_v55 = vsel %vm7180_vm0, %v8336_v5, %v8340_v35  ;;  %v1016_v27 = vshrl.u32 %v998_v26, %v1014_v29  ;;  %v1019_v49 = vadd.s32 127, %v1018_v56  ;;  %v1143_v38 = vxor.u32 2147483648, %v5275_v40 }
 0x265   : > { %vm1245_vm8 = vcmp.lt.s32.totalorder %v7167_v43, 2  ;;  %v1250_v50 = vxor.u32 2147483648, %v5277_v47  ;;  %v7195_v34 = vand.u32 3, %v1347_v28  ;;  %5288 = vcosq.f32 %v1446_v55 }
 0x266   : > { %v1017_v33 = vor.u32 %v1016_v27, %v1015_v11  ;;  %v1020_v23 = vshll.u32 %v1019_v49, 23  ;;  %vm1138_vm4 = vweird.f32 %v8317_v42  ;;  %v1447_v8 = vsel %vm7180_vm0, 0, %v1445_v57  ;;  %v8348_v57 = vld [vmem:[#allocation33_spill] sm:$0xff] }
 0x267   : > { %v8341_v4 = vand.u32 2147483647, %v6128_v41  ;;  %v1247_v59 = vxor.u32 2147483648, %v5279_v17  ;;  %5290 = vsinq.f32 %v1446_v55  ;;  %v1548_v46 = vsub.s32 4, %v8344_v51 }
 0x268   : > { %v5281_v26 = vpop.eup %5280  ;;  %v1021_v30 = vor.u32 4788187, %v1020_v23  ;;  %v7211_v15 = vand.u32 3, %v1035_v7  ;;  %v1147_v48 = vsel %vm1145_vm15, %v1146_v54, %v5275_v40  ;;  %vm1242_vm0 = vweird.f32 %v8323_v32 }
 0x269   : > { %vm7202_vm14 = vcmp.le.f32.partialorder %v8341_v4, 0.7853982  ;;  %vm1249_vm1 = vcmp.eq.s32.totalorder %v7167_v43, 2  ;;  %v5283_v45 = vpop.eup %5282  ;;  %v1144_v28 = vsel %vm1142_vm2, %v5273_v10, %v1143_v38  ;;  %v1451_v56 = vadd.s32 3, %v1447_v8 }
 0x26a   : > { %v1550_v1 = vsel %vm7202_vm14, %v6128_v41, %v6678_v18  ;;  %v1251_v29 = vsel %vm1249_vm1, %v1250_v50, %v5279_v17  ;;  %v1022_v21 = vand.u32 2147483647, %v1021_v30  ;;  %v1024_v18 = vcvt.s32.f32 %v1017_v33 }
 0x26b   : > { %5292 = vcosq.f32 %v1550_v1  ;;  %vm1349_vm3 = vcmp.lt.s32.totalorder %v7195_v34, 2  ;;  %v1549_v3 = vsel %vm1464_vm9, %v1548_v46, %v8344_v51  ;;  %vm937_vm15 = vcmp.eq.s32.totalorder %v7163_v63, 2 }
 0x26c   : > { %5294 = vsinq.f32 %v1550_v1  ;;  %v1248_v40 = vsel %vm1246_vm6, %v5277_v47, %v1247_v59  ;;  %v1354_v7 = vxor.u32 2147483648, %v5281_v26  ;;  %v8345_v10 = vand.u32 2147483647, %v6071_v14  ;;  %v5285_v49 = vpop.eup %5284 }
 0x26d   : > { %v1652_v35 = vsub.s32 4, %v8348_v57  ;;  %vm934_vm2 = vcmp.eq.s32.totalorder %v7163_v63, 0  ;;  %v1025_v55 = vmul.f32 %v1024_v18, %v1022_v21  ;;  %v1148_v11 = vsel %vm1141_vm5, %v1144_v28, %v1147_v48  ;;  %v5287_v33 = vpop.eup %5286 }
 0x26e   : > { %vm7228_vm1 = vcmp.le.f32.partialorder %v8345_v10, 0.7853982  ;;  %v1351_v27 = vxor.u32 2147483648, %v5283_v45  ;;  %v7240_v54 = vand.u32 3, %v1451_v56  ;;  %v1551_v38 = vsel %vm7202_vm14, 0, %v1549_v3 }
 0x26f   : > { %v1654_v47 = vsel %vm7228_vm1, %v6071_v14, %v6578_v20  ;;  %v1653_v50 = vsel %vm1568_vm7, %v1652_v35, %v8348_v57  ;;  %v1026_v62 = vxor.u32 2147483648, %v1025_v55  ;;  %v1252_v23 = vsel %vm1245_vm8, %v1248_v40, %v1251_v29 }
 0x270   : > { %5296 = vcosq.f32 %v1654_v47  ;;  %vm1350_vm9 = vcmp.eq.s32.totalorder %v7195_v34, 0  ;;  %vm1353_vm5 = vcmp.eq.s32.totalorder %v7195_v34, 2  ;;  %vm933_vm6 = vcmp.lt.s32.totalorder %v7163_v63, 2 }
 0x271   : > { %v7254_v20 = vsel %vm1138_vm4, nan, %v1148_v11  ;;  %v1355_v8 = vsel %vm1353_vm5, %v1354_v7, %v5283_v45  ;;  %v1655_v4 = vsel %vm7228_vm1, 0, %v1653_v50  ;;  %5298 = vsinq.f32 %v1654_v47  ;;  %v8357_v50 = vld [vmem:[#allocation49_spill] sm:$0xff] }
 0x272   : > { %v938_v36 = vxor.u32 2147483648, %v5285_v49  ;;  %v1027_v43 = vsel %vm944_vm12, %v1026_v62, %v1025_v55  ;;  %vm1346_vm7 = vweird.f32 %v6031_v61  ;;  %v1352_v59 = vsel %vm1350_vm9, %v5281_v26, %v1351_v27  ;;  %v5289_v30 = vpop.eup %5288  ;;  %v8349_v26 = vld [vmem:[#allocation43_spill] sm:$0xff] }
 0x273   : > { %v1555_v51 = vadd.s32 3, %v1551_v38  ;;  %v935_v46 = vxor.u32 2147483648, %v5287_v33  ;;  %v1030_v42 = vsel %vm7149_vm13, %v6024_v53, %v1027_v43  ;;  %v7266_v1 = vsel %vm1242_vm0, nan, %v1252_v23 }
 0x274   : > { %vm1454_vm14 = vcmp.eq.s32.totalorder %v7240_v54, 0  ;;  %vm930_vm8 = vweird.f32 %v6008_v24  ;;  %5300 = vcosq.f32 %v1030_v42  ;;  %vm1457_vm12 = vcmp.eq.s32.totalorder %v7240_v54, 2  ;;  %v5291_v56 = vpop.eup %5290 }
 0x275   : > { %v1659_v48 = vadd.s32 3, %v1655_v4  ;;  %v1756_v45 = vsub.s32 4, %v8349_v26  ;;  %5302 = vsinq.f32 %v1030_v42  ;;  %v1356_v2 = vsel %vm1349_vm3, %v1352_v59, %v1355_v8  ;;  %v8368_v42 = vld [vmem:[#allocation46_spill] sm:$0xff] }
 0x276   : > { %v1458_v28 = vxor.u32 2147483648, %v5289_v30  ;;  %v8350_v32 = vand.u32 2147483647, %v6272_v6  ;;  %v939_v21 = vsel %vm937_vm15, %v938_v36, %v5287_v33  ;;  %v7282_v18 = vand.u32 3, %v1555_v51 }
 0x277   : > { %v1757_v3 = vsel %vm1672_vm11, %v1756_v45, %v8349_v26  ;;  %v936_v40 = vsel %vm934_vm2, %v5285_v49, %v935_v46  ;;  %v1455_v7 = vxor.u32 2147483648, %v5291_v56  ;;  %v7297_v35 = vand.u32 3, %v1659_v48  ;;  %v8356_v49 = vld [vmem:[#allocation40_spill] sm:$0xff] }
 0x278   : > { %vm7276_vm13 = vcmp.le.f32.partialorder %v8350_v32, 0.7853982  ;;  %v5293_v17 = vpop.eup %5292  ;;  %v1459_v57 = vsel %vm1457_vm12, %v1458_v28, %v5291_v56  ;;  %v8353_v55 = vand.u32 2147483647, %v6223_v12  ;;  %v1860_v38 = vsub.s32 4, %v8356_v49 }
 0x279   : > { %v1758_v34 = vsel %vm7276_vm13, %v6272_v6, %v6814_v52  ;;  %v1759_v10 = vsel %vm7276_vm13, 0, %v1757_v3  ;;  %v5295_v52 = vpop.eup %5294  ;;  %v1456_v27 = vsel %vm1454_vm14, %v5289_v30, %v1455_v7  ;;  %v940_v62 = vsel %vm933_vm6, %v936_v40, %v939_v21  ;;  %v8361_v30 = vld [vmem:[#allocation45_spill] sm:$0xff] }
 0x27a   : > { %5304 = vcosq.f32 %v1758_v34  ;;  %vm7301_vm11 = vcmp.le.f32.partialorder %v8353_v55, 0.7853982  ;;  %v1763_v47 = vadd.s32 3, %v1759_v10  ;;  %v2503_v23 = vpack.c.bf16 %v7266_v1, %v7254_v20  ;;  %v8374_v20 = vld [vmem:[#allocation47_spill] sm:$0xff] }
 0x27b   : > { %5306 = vsinq.f32 %v1758_v34  ;;  %v1862_v33 = vsel %vm7301_vm11, %v6223_v12, %v8357_v50  ;;  %vm1450_vm3 = vweird.f32 %v8336_v5  ;;  %vm1453_vm4 = vcmp.lt.s32.totalorder %v7240_v54, 2 }
 0x27c   : > { %vm1041_vm0 = vcmp.eq.s32.totalorder %v7211_v15, 2  ;;  %v7321_v8 = vsel %vm1346_vm7, nan, %v1356_v2  ;;  %vm1557_vm15 = vcmp.lt.s32.totalorder %v7282_v18, 2  ;;  %v1861_v63 = vsel %vm1776_vm10, %v1860_v38, %v8356_v49 }
 0x27d   : > { %5308 = vcosq.f32 %v1862_v33  ;;  %v5297_v4 = vpop.eup %5296  ;;  %vm1038_vm1 = vcmp.eq.s32.totalorder %v7211_v15, 0  ;;  %v1460_v36 = vsel %vm1453_vm4, %v1456_v27, %v1459_v57  ;;  %vm1558_vm2 = vcmp.eq.s32.totalorder %v7282_v18, 0 }
 0x27e   : > { %v1559_v54 = vxor.u32 2147483648, %v5295_v52  ;;  %v1562_v43 = vxor.u32 2147483648, %v5293_v17  ;;  %v7331_v61 = vsel %vm930_vm8, nan, %v940_v62  ;;  %vm1037_vm9 = vcmp.lt.s32.totalorder %v7211_v15, 2  ;;  %v5299_v51 = vpop.eup %5298 }
 0x27f   : > { %vm1561_vm5 = vcmp.eq.s32.totalorder %v7282_v18, 2  ;;  %vm1662_vm6 = vcmp.eq.s32.totalorder %v7297_v35, 0  ;;  %v7336_v59 = vand.u32 3, %v1763_v47  ;;  %vm1034_vm10 = vweird.f32 %v6024_v53 }
 0x280   : > { %vm1661_vm7 = vcmp.lt.s32.totalorder %v7297_v35, 2  ;;  %v1863_v46 = vsel %vm7301_vm11, 0, %v1861_v63  ;;  %5310 = vsinq.f32 %v1862_v33  ;;  %v8358_v24 = vand.u32 2147483647, %v8313_v39 }
 0x281   : > { %v1964_v48 = vsub.s32 4, %v8361_v30  ;;  %v7351_v26 = vsel %vm1450_vm3, nan, %v1460_v36  ;;  %vm1665_vm8 = vcmp.eq.s32.totalorder %v7297_v35, 2  ;;  %v1666_v45 = vxor.u32 2147483648, %v5297_v4  ;;  %v5301_v5 = vpop.eup %5300 }
 0x282   : > { %vm7344_vm14 = vcmp.le.f32.partialorder %v8358_v24, 0.7853982  ;;  %vm1554_vm12 = vweird.f32 %v6128_v41  ;;  %v1560_v28 = vsel %vm1558_vm2, %v5293_v17, %v1559_v54  ;;  %v1563_v32 = vsel %vm1561_vm5, %v1562_v43, %v5295_v52  ;;  %v5303_v34 = vpop.eup %5302 }
 0x283   : > { %v1966_v2 = vsel %vm7344_vm14, %v8313_v39, %v7040_v0  ;;  %v1663_v29 = vxor.u32 2147483648, %v5299_v51  ;;  %vm1658_vm13 = vweird.f32 %v6071_v14  ;;  %v1867_v56 = vadd.s32 3, %v1863_v46  ;;  %v8363_v0 = vld [vmem:[#allocation44_spill] sm:$0xff] }
 0x284   : > { %5312 = vcosq.f32 %v1966_v2  ;;  %vm8362_vm11 = vcmp.lt.s32.totalorder %v8313_v39, 0  ;;  %v2068_v3 = vsub.s32 4, %v8363_v0  ;;  %v1042_v40 = vxor.u32 2147483648, %v5301_v5 }
 0x285   : > { %v1965_v21 = vsel %vm8362_vm11, %v1964_v48, %v8361_v30  ;;  %5314 = vsinq.f32 %v1966_v2  ;;  %v2504_v7 = vpack.c.bf16 %v7351_v26, %v7321_v8  ;;  %vm1765_vm3 = vcmp.lt.s32.totalorder %v7336_v59, 2 }
 0x286   : > { %vm1766_vm4 = vcmp.eq.s32.totalorder %v7336_v59, 0  ;;  %v1039_v10 = vxor.u32 2147483648, %v5303_v34  ;;  %v1564_v17 = vsel %vm1557_vm15, %v1560_v28, %v1563_v32  ;;  %v1667_v57 = vsel %vm1665_vm8, %v1666_v45, %v5299_v51  ;;  %v8372_v45 = vld [vmem:[#allocation48_spill] sm:$0xff] }
 0x287   : > { %v8364_v55 = vand.u32 2147483647, %v8312_v31  ;;  %v5305_v52 = vpop.eup %5304  ;;  %v1043_v27 = vsel %vm1041_vm0, %v1042_v40, %v5303_v34  ;;  %v1664_v47 = vsel %vm1662_vm6, %v5297_v4, %v1663_v29  ;;  %vm1762_vm5 = vweird.f32 %v6272_v6 }
 0x288   : > { %v1967_v18 = vsel %vm7344_vm14, 0, %v1965_v21  ;;  %v5307_v38 = vpop.eup %5306  ;;  %v1040_v50 = vsel %vm1038_vm1, %v5301_v5, %v1039_v10  ;;  %v1770_v33 = vxor.u32 2147483648, %v5305_v52  ;;  %v1868_v62 = vand.u32 3, %v1867_v56 }
 0x289   : > { %vm7378_vm2 = vcmp.le.f32.partialorder %v8364_v55, 0.7853982  ;;  %vm8367_vm0 = vcmp.lt.s32.totalorder %v8312_v31, 0  ;;  %v1044_v63 = vsel %vm1037_vm9, %v1040_v50, %v1043_v27  ;;  %v1767_v4 = vxor.u32 2147483648, %v5307_v38 }
 0x28a   : > { %v2070_v49 = vsel %vm7378_vm2, %v8312_v31, %v7033_v60  ;;  %v2069_v8 = vsel %vm8367_vm0, %v2068_v3, %v8363_v0  ;;  %vm1769_vm15 = vcmp.eq.s32.totalorder %v7336_v59, 2  ;;  %v1045_v60 = vsel %vm1034_vm10, nan, %v1044_v63  ;;  %v5309_v51 = vpop.eup %5308 }
 0x28b   : > { %5316 = vcosq.f32 %v2070_v49  ;;  %v1668_v36 = vsel %vm1661_vm7, %v1664_v47, %v1667_v57  ;;  %v1771_v54 = vsel %vm1769_vm15, %v1770_v33, %v5307_v38  ;;  %vm1866_vm1 = vweird.f32 %v6223_v12 }
 0x28c   : > { %v1971_v43 = vadd.s32 3, %v1967_v18  ;;  %v2502_v46 = vpack.c.bf16 %v1045_v60, %v7331_v61  ;;  %v1768_v15 = vsel %vm1766_vm4, %v5305_v52, %v1767_v4  ;;  %v2071_v24 = vsel %vm7378_vm2, 0, %v2069_v8 }
 0x28d   : > { %5318 = vsinq.f32 %v2070_v49  ;;  %vm2400_vm9 = vcmp.lt.s32.totalorder %v8368_v42, 0  ;;  %v1565_v53 = vsel %vm1554_vm12, nan, %v1564_v17  ;;  %vm1869_vm6 = vcmp.lt.s32.totalorder %v1868_v62, 2  ;;  %v5311_v28 = vpop.eup %5310 }
 0x28e   : > { %v1874_v35 = vxor.u32 2147483648, %v5309_v51  ;;  %v8369_v30 = vand.u32 2147483647, %v6582_v44  ;;  %4864 = vmatprep.mubr.bf16.mxu1 %v2502_v46  ;;  %v1669_v61 = vsel %vm1658_vm13, nan, %v1668_v36  ;;  %v1772_v26 = vsel %vm1765_vm3, %v1768_v15, %v1771_v54 }
 0x28f   : > { %v2172_v2 = vsub.s32 4, %v8372_v45  ;;  %4865 = vmatmul.mubr.bf16.vlgmr.msra.gmra.mxu1 %v2503_v23  ;;  %vm1873_vm7 = vcmp.eq.s32.totalorder %v1868_v62, 2  ;;  %v1972_v32 = vand.u32 3, %v1971_v43  ;;  %v2075_v29 = vadd.s32 3, %v2071_v24 }
 0x290   : > { %vm7416_vm10 = vcmp.le.f32.partialorder %v8369_v30, 0.7853982  ;;  %4868 = vmatprep.mubr.bf16.mxu1 %v2504_v7  ;;  %v1871_v14 = vxor.u32 2147483648, %v5311_v28  ;;  %v1875_v59 = vsel %vm1873_vm7, %v1874_v35, %v5311_v28  ;;  %vm8373_vm14 = vcmp.lt.s32.totalorder %v6582_v44, 0 }
 0x291   : > { %v2174_v41 = vsel %vm7416_vm10, %v6582_v44, %v7136_v22  ;;  %v2173_v5 = vsel %vm8373_vm14, %v2172_v2, %v8372_v45  ;;  %v5313_v56 = vpop.eup %5312  ;;  %v2505_v21 = vpack.c.bf16 %v1669_v61, %v1565_v53  ;;  %v1773_v22 = vsel %vm1762_vm5, nan, %v1772_v26 }
 0x292   : > { %5320 = vcosq.f32 %v2174_v41  ;;  %vm1870_vm8 = vcmp.eq.s32.totalorder %v1868_v62, 0  ;;  %v2276_v1 = vsub.s32 4, %v8374_v20  ;;  %v5315_v23 = vpop.eup %5314  ;;  %v1978_v3 = vxor.u32 2147483648, %v5313_v56 }
 0x293   : > { %5322 = vsinq.f32 %v2174_v41  ;;  %v1872_v0 = vsel %vm1870_vm8, %v5309_v51, %v1871_v14  ;;  %v2175_v34 = vsel %vm7416_vm10, 0, %v2173_v5  ;;  %v8375_v40 = vand.u32 2147483647, %v6513_v25  ;;  %v2970_v51 = vld [vmem:[%s7512_s25 + $0x20] sm:$0xff] }
 0x294   : > { %v1876_v10 = vsel %vm1869_vm6, %v1872_v0, %v1875_v59  ;;  %vm1974_vm13 = vcmp.eq.s32.totalorder %v1972_v32, 0  ;;  %v1975_v6 = vxor.u32 2147483648, %v5315_v23  ;;  %vm1977_vm11 = vcmp.eq.s32.totalorder %v1972_v32, 2 }
 0x295   : > { %vm7442_vm12 = vcmp.le.f32.partialorder %v8375_v40, 0.7853982  ;;  %v1877_v57 = vsel %vm1866_vm1, nan, %v1876_v10  ;;  %v2076_v55 = vand.u32 3, %v2075_v29  ;;  %v2179_v52 = vadd.s32 3, %v2175_v34 }
 0x296   : > { %v2278_v17 = vsel %vm7442_vm12, %v6513_v25, %v7129_v58  ;;  %v2506_v11 = vpack.c.bf16 %v1877_v57, %v1773_v22  ;;  %vm8378_vm3 = vcmp.lt.s32.totalorder %v6513_v25, 0  ;;  %v2483_v47 = vsel %vm2400_vm9, %v2482_v19, %v7138_v9 }
 0x297   : > { %5324 = vcosq.f32 %v2278_v17  ;;  %v2277_v27 = vsel %vm8378_vm3, %v2276_v1, %v8374_v20  ;;  %v1976_v58 = vsel %vm1974_vm13, %v5313_v56, %v1975_v6  ;;  %v1979_v18 = vsel %vm1977_vm11, %v1978_v3, %v5315_v23  ;;  %4869 = vmatmul.mubr.bf16.gmra.mxu1 %v2505_v21 }
 0x298   : > { %5326 = vsinq.f32 %v2278_v17  ;;  %v5317_v12 = vpop.eup %5316  ;;  %vm1970_vm4 = vweird.f32 %v8313_v39  ;;  %vm2074_vm2 = vweird.f32 %v8312_v31  ;;  %v8379_v49 = vand.u32 2147483647, %v6758_v13  ;;  %4872 = vmatprep.mubr.bf16.mxu1 %v2506_v11 }
 0x299   : > { %v2380_v50 = vsub.s32 4, %v6914_v16  ;;  %vm1973_vm0 = vcmp.lt.s32.totalorder %v1972_v32, 2  ;;  %v2082_v33 = vxor.u32 2147483648, %v5317_v12  ;;  %v2279_v9 = vsel %vm7442_vm12, 0, %v2277_v27 }
 0x29a   : > { %vm7465_vm5 = vcmp.le.f32.partialorder %v8379_v49, 0.7853982  ;;  %v5319_v62 = vpop.eup %5318  ;;  %v1980_v8 = vsel %vm1973_vm0, %v1976_v58, %v1979_v18  ;;  %vm2081_vm15 = vcmp.eq.s32.totalorder %v2076_v55, 2  ;;  %v2180_v63 = vand.u32 3, %v2179_v52 }
 0x29b   : > { %v2382_v19 = vsel %vm7465_vm5, %v6758_v13, %v7172_v37  ;;  %vm2078_vm1 = vcmp.eq.s32.totalorder %v2076_v55, 0  ;;  %v2079_v4 = vxor.u32 2147483648, %v5319_v62  ;;  %v2083_v60 = vsel %vm2081_vm15, %v2082_v33, %v5319_v62  ;;  %v8386_v37 = vld [vmem:[#allocation50_spill] sm:$0xff]  ;;  %v5127_v33 = vld [vmem:[#allocation8 + $0x38] sm:$0xff]  }
 0x29c   : > { %5328 = vcosq.f32 %v2382_v19  ;;  %v2283_v36 = vadd.s32 3, %v2279_v9  ;;  %vm8382_vm6 = vcmp.lt.s32.totalorder %v6758_v13, 0  ;;  %v8383_v43 = vand.u32 2147483647, %v8368_v42  ;;  %4880 = vmatprep.subr.bf16.mxu1 %v5127_v33  ;;  %v5128_v9 = vld [vmem:[#allocation8 + $0x30] sm:$0xff]   ;;  %v5131_v62 = vld [vmem:[#allocation8 + $0x18] sm:$0xff]  }
 0x29d   : > { %5330 = vsinq.f32 %v2382_v19  ;;  %v2381_v54 = vsel %vm8382_vm6, %v2380_v50, %v6914_v16  ;;  %v2484_v46 = vsub.s32 4, %v8386_v37  ;;  %v1981_v24 = vsel %vm1970_vm4, nan, %v1980_v8  ;;  %4881 = vmatpush3.bf16.msra.mxu1 %v5127_v33  ;;  %v5129_v19 = vld [vmem:[#allocation8 + $0x28] sm:$0xff]   ;;  %v5133_v8 = vld [vmem:[%s8135_s8] sm:$0xff]  }
 0x29e   : > { %vm7481_vm10 = vcmp.le.f32.partialorder %v8383_v43, 0.7853982  ;;  %vm2077_vm7 = vcmp.lt.s32.totalorder %v2076_v55, 2  ;;  %v2080_v53 = vsel %vm2078_vm1, %v5317_v12, %v2079_v4  ;;  %vm2182_vm14 = vcmp.eq.s32.totalorder %v2180_v63, 0  ;;  %4882 = vmatprep.subr.bf16.mxu1 %v5128_v9  ;;  %v2967_v4 = vld [vmem:[%s7512_s25 + $0x8] sm:$0xff]  ;;  %4912 = vmatprep.subr.bf16.mxu0 %v5133_v8  ;;  %v2969_v43 = vld [vmem:[%s7512_s25 + $0x18] sm:$0xff] }
 0x29f   : > { %v5321_v15 = vpop.eup %5320  ;;  %v2486_v35 = vsel %vm7481_vm10, %v8368_v42, %v2483_v47  ;;  %v2084_v16 = vsel %vm2077_vm7, %v2080_v53, %v2083_v60  ;;  %vm2185_vm8 = vcmp.eq.s32.totalorder %v2180_v63, 2  ;;  %v2383_v45 = vsel %vm7465_vm5, 0, %v2381_v54  ;;  %v2968_v60 = vld [vmem:[%s7512_s25 + $0x10] sm:$0xff]  ;;  %4913 = vmatpush3.bf16.msra.mxu0 %v5133_v8 }
 0x2a0   : > { %v5323_v30 = vpop.eup %5322  ;;  %v2186_v48 = vxor.u32 2147483648, %v5321_v15  ;;  %v2085_v61 = vsel %vm2074_vm2, nan, %v2084_v16  ;;  %5332 = vcosq.f32 %v2486_v35  ;;  %v2284_v41 = vand.u32 3, %v2283_v36  ;;  %v5134_v36 = vld [vmem:[#allocation8 + $0x8] sm:$0xff]  }
 0x2a1   : > { %v2183_v26 = vxor.u32 2147483648, %v5323_v30  ;;  %v2507_v39 = vpack.c.bf16 %v2085_v61, %v1981_v24  ;;  %v2485_v28 = vsel %vm2400_vm9, %v2484_v46, %v8386_v37  ;;  %5334 = vsinq.f32 %v2486_v35  ;;  %4883 = vmatpush3.bf16.msra.mxu1 %v5128_v9  ;;  %v2971_v46 = vld [vmem:[%s7512_s25 + $0x28] sm:$0xff]  ;;  %v2972_v53 = vld [vmem:[%s7512_s25 + $0x30] sm:$0xff]  ;;  %v2973_v35 = vld [vmem:[%s7512_s25 + $0x38] sm:$0xff] }
 0x2a2   : > { %v2187_v2 = vsel %vm2185_vm8, %v2186_v48, %v5323_v30  ;;  %vm2181_vm12 = vcmp.lt.s32.totalorder %v2180_v63, 2  ;;  %v2387_v14 = vadd.s32 3, %v2383_v45  ;;  %v2487_v56 = vsel %vm7481_vm10, 0, %v2485_v28  ;;  %4884 = vmatprep.subr.bf16.mxu1 %v5129_v19  ;;  %v2966_v63 = vld [vmem:[%s7512_s25] sm:$0xff]  ;;  %v2975_v16 = vld [vmem:[%s7512_s25 + $0x48] sm:$0xff]  ;;  %v2976_v45 = vld [vmem:[%s7512_s25 + $0x50] sm:$0xff] }
 0x2a3   : > { %v2184_v32 = vsel %vm2182_vm14, %v5321_v15, %v2183_v26  ;;  %4873 = vmatmul.mubr.bf16.gmra.mxu1 %v2507_v39  ;;  %vm2289_vm13 = vcmp.eq.s32.totalorder %v2284_v41, 2  ;;  %vm2178_vm11 = vweird.f32 %v6582_v44  ;;  %vm2285_vm3 = vcmp.lt.s32.totalorder %v2284_v41, 2  ;;  %v5135_v24 = vld [vmem:[#allocation8] sm:$0xff]   ;;  %v2977_v39 = vld [vmem:[%s7512_s25 + $0x58] sm:$0xff] }
 0x2a4   : > { %v5325_v29 = vpop.eup %5324  ;;  %v2188_v59 = vsel %vm2181_vm12, %v2184_v32, %v2187_v2  ;;  %vm2286_vm4 = vcmp.eq.s32.totalorder %v2284_v41, 0  ;;  %v2388_v23 = vand.u32 3, %v2387_v14  ;;  %v2491_v0 = vadd.s32 3, %v2487_v56  ;;  %v2974_v30 = vld [vmem:[%s7512_s25 + $0x40] sm:$0xff]  ;;  %v2979_v41 = vld [vmem:[%s7512_s25 + $0x68] sm:$0xff]  ;;  %v2981_v14 = vld [vmem:[%s7512_s25 + $0x78] sm:$0xff] }
 0x2a5   : > { %v5327_v31 = vpop.eup %5326  ;;  %v2290_v5 = vxor.u32 2147483648, %v5325_v29  ;;  %v2189_v20 = vsel %vm2178_vm11, nan, %v2188_v59  ;;  %vm2282_vm9 = vweird.f32 %v6513_v25  ;;  %vm2386_vm1 = vweird.f32 %v6758_v13  ;;  %4885 = vmatpush3.bf16.msra.mxu1 %v5129_v19  ;;  %v5130_v13 = vld [vmem:[#allocation8 + $0x20] sm:$0xff]   ;;  %v7538_v59 = vld [vmem:[#allocation7] ss:$0 sm:$0xff] }
 0x2a6   : > { %v2287_v21 = vxor.u32 2147483648, %v5327_v31  ;;  %vm2390_vm2 = vcmp.eq.s32.totalorder %v2388_v23, 0  ;;  %vm2393_vm5 = vcmp.eq.s32.totalorder %v2388_v23, 2  ;;  %v2492_v57 = vand.u32 3, %v2491_v0  ;;  %4886 = vmatprep.subr.bf16.mxu1 %v5130_v13  ;;  %v5138_v61 = vld [vmem:[#allocation11 + $0x74] ss:$8 sps:$4 sm:$0xff]  }
 0x2a7   : > { %v2291_v22 = vsel %vm2289_vm13, %v2290_v5, %v5327_v31  ;;  %vm2389_vm0 = vcmp.lt.s32.totalorder %v2388_v23, 2  ;;  %vm2490_vm7 = vweird.f32 %v8368_v42  ;;  %v5132_v42 = vld [vmem:[#allocation8 + $0x10] sm:$0xff]   ;;  %vm3005_vm14 = vcmask 130048   ;;  %v2978_v2 = vld [vmem:[%s7512_s25 + $0x60] sm:$0xff] }
 0x2a8   : > { %v2288_v1 = vsel %vm2286_vm4, %v5325_v29, %v2287_v21  ;;  %vm2497_vm15 = vcmp.eq.s32.totalorder %v2492_v57, 2  ;;  %vm2494_vm6 = vcmp.eq.s32.totalorder %v2492_v57, 0  ;;  %vm2493_vm10 = vcmp.lt.s32.totalorder %v2492_v57, 2  ;;  %v2980_v29 = vld [vmem:[%s7512_s25 + $0x70] sm:$0xff]  ;;  %s4364_s25 = sshll.u32 %s8043_s27, 4  ;;  %s8081_s25 = int_to_ptr.vmem [resolvable:$true] %s4364_s25 }
 0x2a9   : > { %v5329_v3 = vpop.eup %5328  ;;  %v2292_v34 = vsel %vm2285_vm3, %v2288_v1, %v2291_v22  ;;  %4887 = vmatpush3.bf16.msra.mxu1 %v5130_v13  ;;  %v2982_v54 = vpack.c.bf16 %v2967_v4, %v2966_v63  ;;  %v2983_v37 = vpack.c.bf16 %v2969_v43, %v2968_v60  ;;  %v2984_v15 = vpack.c.bf16 %v2971_v46, %v2970_v51  ;;  %s5584_s0 = scalar_lea.vmem %s8081_s25, 2048  ;;  %p5591_p0 = scmp.lt.s32.totalorder %s8081_s25, %s5589_s4 }
 0x2aa   : > { %v5331_v40 = vpop.eup %5330  ;;  %v2293_v7 = vsel %vm2282_vm9, nan, %v2292_v34  ;;  %v2394_v10 = vxor.u32 2147483648, %v5329_v3  ;;  %4888 = vmatprep.subr.bf16.mxu1 %v5131_v62  ;;  %v2985_v48 = vpack.c.bf16 %v2973_v35, %v2972_v53  ;;  %v2986_v26 = vpack.c.bf16 %v2975_v16, %v2974_v30  ;;  %p5585_p9 = scmp.ne.s32.totalorder %s8081_s25, %s5584_s0  ;;  %p5592_p13 = scmp.lt.s32.totalorder %s5590_s18, %s5584_s0 }
 0x2ab   : > { %v2508_v6 = vpack.c.bf16 %v2293_v7, %v2189_v20  ;;  %v2391_v17 = vxor.u32 2147483648, %v5331_v40  ;;  %4914 = vmatprep.mubr.msk.bf16.mxu0 %vm3005_vm14, %v2982_v54  ;;  %v2987_v28 = vpack.c.bf16 %v2977_v39, %v2976_v45  ;;  %v2988_v32 = vpack.c.bf16 %v2979_v41, %v2978_v2 }
 0x2ac   : > { %v2395_v55 = vsel %vm2393_vm5, %v2394_v10, %v5331_v40  ;;  %4915 = vmatmul.mubr.msk.bf16.vlgmr.msra.gmra.mxu0 %vm3005_vm14, %v2983_v37  ;;  %v2989_v31 = vpack.c.bf16 %v2981_v14, %v2980_v29  ;;  %p5586_p7 = pnand %p5585_p9, %p8389_p8  ;;  %p5593_p5 = por %p5592_p13, %p5591_p0 }
 0x2ad   : > { %4876 = vmatprep.mubr.bf16.mxu1 %v2508_v6  ;;  %v2392_v44 = vsel %vm2390_vm2, %v5329_v3, %v2391_v17  ;;  %v5333_v11 = vpop.eup %5332  ;;  %4889 = vmatpush3.bf16.msra.mxu1 %v5131_v62 }
 0x2ae   : > { %v2498_v52 = vxor.u32 2147483648, %v5333_v11  ;;  %v5335_v27 = vpop.eup %5334  ;;  %v2396_v47 = vsel %vm2389_vm0, %v2392_v44, %v2395_v55  ;;  %4890 = vmatprep.subr.bf16.mxu1 %v5132_v42  ;;  %4918 = vmatprep.mubr.msk.bf16.mxu0 %vm3005_vm14, %v2984_v15  ;;  %p5587_p11 = pneg %p5586_p7 }
 0x2af   : > { %v2495_v58 = vxor.u32 2147483648, %v5335_v27  ;;  %v2397_v18 = vsel %vm2386_vm1, nan, %v2396_v47 }
 0x2b0   : > { %v2499_v25 = vsel %vm2497_vm15, %v2498_v52, %v5335_v27  ;;  %p5594_p10 = pnand %p5593_p5, %p5587_p11 }
 0x2b1   : > { %v2496_v12 = vsel %vm2494_vm6, %v5333_v11, %v2495_v58  ;;  %4891 = vmatpush3.bf16.msra.mxu1 %v5132_v42 }
 0x2b2   : > { %v2500_v49 = vsel %vm2493_vm10, %v2496_v12, %v2499_v25  ;;  %4892 = vmatprep.subr.bf16.mxu1 %v5134_v36 }
 0x2b3   : > { %v2501_v38 = vsel %vm2490_vm7, nan, %v2500_v49 }
 0x2b4   : > { %v2509_v50 = vpack.c.bf16 %v2501_v38, %v2397_v18  ;;  %4919 = vmatmul.mubr.msk.bf16.gmra.mxu0 %vm3005_vm14, %v2985_v48 }
 0x2b5   : > { %4893 = vmatpush3.bf16.msra.mxu1 %v5134_v36  ;;  %4922 = vmatprep.mubr.msk.bf16.mxu0 %vm3005_vm14, %v2986_v26 }
 0x2b6   : > { %4877 = vmatmul.mubr.bf16.gmra.mxu1 %v2509_v50  ;;  %4894 = vmatprep.subr.bf16.mxu1 %v5135_v24 }
 0x2b9   : > { %4895 = vmatpush3.bf16.msra.mxu1 %v5135_v24 }
 0x2ba   : > { %3259 = vmatprep.subr.bf16.mxu1 %v5138_v61 }
 0x2bc   : > { %4923 = vmatmul.mubr.msk.bf16.gmra.mxu0 %vm3005_vm14, %v2987_v28 }
 0x2bd   : > { %4926 = vmatprep.mubr.msk.bf16.mxu0 %vm3005_vm14, %v2988_v32 }
 0x2c4   : > { %4927 = vmatmul.mubr.msk.bf16.gmra.mxu0 %vm3005_vm14, %v2989_v31 }
 0x34f   : > { %v4866_v5 = vpop.f32.mrf.mxu1 }
 0x350   : > { %v7541_v56 = vadd.f32 %v4866_v5, %v7538_v59 }
 0x351   : > { %v2615_v21 = vpop.f32.mrf.mxu1 }
 0x352   : > { %v4607_v22 = vmul.f32 -1.442695, %v7541_v56  ;;  %v7545_v20 = vadd.f32 %v7538_v59, %v2615_v21 }
 0x353   : > { %v4867_v1 = vpop.f32.mrf.mxu1 }
 0x354   : > { %5336 = vpow2.f32 %v4607_v22  ;;  %v4605_v23 = vmul.f32 -1.442695, %v7545_v20  ;;  %v7549_v0 = vadd.f32 %v4867_v1, %v7538_v59 }
 0x355   : > { %v2618_v3 = vpop.f32.mrf.mxu1 }
 0x356   : > { %5338 = vpow2.f32 %v4605_v23  ;;  %v4608_v34 = vmul.f32 -1.442695, %v7549_v0  ;;  %v7553_v40 = vadd.f32 %v7538_v59, %v2618_v3 }
 0x357   : > { %v4870_v7 = vpop.f32.mrf.mxu1 }
 0x358   : > { %5340 = vpow2.f32 %v4608_v34  ;;  %v4606_v10 = vmul.f32 -1.442695, %v7553_v40  ;;  %v7557_v6 = vadd.f32 %v4870_v7, %v7538_v59 }
 0x359   : > { %v2631_v17 = vpop.f32.mrf.mxu1 }
 0x35a   : > { %5342 = vpow2.f32 %v4606_v10  ;;  %v4611_v57 = vmul.f32 -1.442695, %v7557_v6  ;;  %v7561_v44 = vadd.f32 %v7538_v59, %v2631_v17 }
 0x35b   : > { %v4871_v55 = vpop.f32.mrf.mxu1 }
 0x35c   : > { %v4609_v11 = vmul.f32 -1.442695, %v7561_v44  ;;  %v7565_v52 = vadd.f32 %v4871_v55, %v7538_v59  ;;  %5344 = vpow2.f32 %v4611_v57 }
 0x35d   : > { %v2634_v27 = vpop.f32.mrf.mxu1 }
 0x35e   : > { %5346 = vpow2.f32 %v4609_v11  ;;  %v4612_v47 = vmul.f32 -1.442695, %v7565_v52  ;;  %v7569_v58 = vadd.f32 %v7538_v59, %v2634_v27  ;;  %v5136_v27 = vld [vmem:[#allocation11 + $0x70] ss:$8 sps:$4 sm:$0xff]  }
 0x360   : > { %5348 = vpow2.f32 %v4612_v47  ;;  %v4610_v25 = vmul.f32 -1.442695, %v7569_v58 }
 0x361   : > { %v5337_v18 = vpop.eup %5336 }
 0x362   : > { %v2728_v49 = vadd.f32 1.0, %v5337_v18  ;;  %5350 = vpow2.f32 %v4610_v25 }
 0x363   : > { %v4874_v12 = vpop.f32.mrf.mxu1  ;;  %v5339_v50 = vpop.eup %5338 }
 0x364   : > { %v7573_v38 = vadd.f32 %v4874_v12, %v7538_v59  ;;  %v2726_v9 = vadd.f32 1.0, %v5339_v50  ;;  %5352 = vrcp.f32 %v2728_v49 }
 0x365   : > { %v2647_v33 = vpop.f32.mrf.mxu1  ;;  %v5341_v62 = vpop.eup %5340 }
 0x366   : > { %v4615_v19 = vmul.f32 -1.442695, %v7573_v38  ;;  %v7577_v13 = vadd.f32 %v7538_v59, %v2647_v33  ;;  %5354 = vrcp.f32 %v2726_v9  ;;  %v2729_v8 = vadd.f32 1.0, %v5341_v62  ;;  %v5139_v9 = vld [vmem:[#allocation11 + $0x60] ss:$8 sps:$4 sm:$0xff]  }
 0x367   : > { %v4875_v42 = vpop.f32.mrf.mxu1  ;;  %v5343_v60 = vpop.eup %5342 }
 0x368   : > { %v4613_v63 = vmul.f32 -1.442695, %v7577_v13  ;;  %v7581_v4 = vadd.f32 %v4875_v42, %v7538_v59  ;;  %5356 = vpow2.f32 %v4615_v19  ;;  %v2727_v54 = vadd.f32 1.0, %v5343_v60  ;;  %v5142_v60 = vld [vmem:[#allocation11 + $0x50] ss:$8 sps:$4 sm:$0xff]  }
 0x369   : > { %v2650_v36 = vpop.f32.mrf.mxu1  ;;  %5358 = vrcp.f32 %v2729_v8  ;;  %v5345_v37 = vpop.eup %5344 }
 0x36a   : > { %v4616_v43 = vmul.f32 -1.442695, %v7581_v4  ;;  %v7585_v51 = vadd.f32 %v7538_v59, %v2650_v36  ;;  %5360 = vpow2.f32 %v4613_v63  ;;  %v2732_v35 = vadd.f32 1.0, %v5345_v37 }
 0x36b   : > { %5362 = vrcp.f32 %v2727_v54  ;;  %v5347_v15 = vpop.eup %5346  ;;  %v5147_v54 = vld [vmem:[#allocation11 + $0x44] ss:$8 sps:$4 sm:$0xff]  }
 0x36c   : > { %v4614_v46 = vmul.f32 -1.442695, %v7585_v51  ;;  %5364 = vpow2.f32 %v4616_v43  ;;  %v2730_v24 = vadd.f32 1.0, %v5347_v15 }
 0x36d   : > { %v5349_v53 = vpop.eup %5348 }
 0x36e   : > { %5366 = vpow2.f32 %v4614_v46  ;;  %v2733_v30 = vadd.f32 1.0, %v5349_v53 }
 0x36f   : > { %v5351_v16 = vpop.eup %5350  ;;  %5368 = vrcp.f32 %v2730_v24 }
 0x370   : > { %5370 = vrcp.f32 %v2733_v30  ;;  %v2731_v48 = vadd.f32 1.0, %v5351_v16 }
 0x371   : > { %5372 = vrcp.f32 %v2732_v35  ;;  %v5353_v61 = vpop.eup %5352 }
 0x372   : > { %5374 = vrcp.f32 %v2731_v48  ;;  %v2776_v17 = vmul.f32 %v5353_v61, %v7541_v56  ;;  %v5141_v56 = vld [vmem:[#allocation11 + $0x64] ss:$8 sps:$4 sm:$0xff]   ;;  %v5148_v61 = vld [vmem:[#allocation11 + $0x30] ss:$8 sps:$4 sm:$0xff]  }
 0x373   : > { %v5355_v26 = vpop.eup %5354 }
 0x374   : > { %v2774_v3 = vmul.f32 %v5355_v26, %v7545_v20 }
 0x375   : > { %v5357_v45 = vpop.eup %5356 }
 0x376   : > { %v5359_v39 = vpop.eup %5358  ;;  %v2736_v2 = vadd.f32 1.0, %v5357_v45  ;;  %v4878_v41 = vpop.f32.mrf.mxu1 }
 0x377   : > { %v5361_v28 = vpop.eup %5360  ;;  %v7589_v32 = vadd.f32 %v4878_v41, %v7538_v59  ;;  %v2777_v14 = vmul.f32 %v5359_v39, %v7549_v0 }
 0x378   : > { %v5363_v29 = vpop.eup %5362  ;;  %v2734_v31 = vadd.f32 1.0, %v5361_v28  ;;  %v2663_v5 = vpop.f32.mrf.mxu1  ;;  %5376 = vrcp.f32 %v2736_v2 }
 0x379   : > { %v5365_v21 = vpop.eup %5364  ;;  %v2775_v22 = vmul.f32 %v5363_v29, %v7553_v40  ;;  %v4619_v1 = vmul.f32 -1.442695, %v7589_v32  ;;  %v7595_v23 = vadd.f32 %v7538_v59, %v2663_v5  ;;  %v2791_v25 = vpack.c.bf16 %v2777_v14, %v2776_v17  ;;  %v5157_v17 = vld [vmem:[#allocation11] ss:$8 sps:$4 sm:$0xff]  }
 0x37a   : > { %5378 = vrcp.f32 %v2734_v31  ;;  %v2737_v34 = vadd.f32 1.0, %v5365_v21  ;;  %v4879_v7 = vpop.f32.mrf.mxu1 }
 0x37b   : > { %v5367_v10 = vpop.eup %5366  ;;  %5380 = vpow2.f32 %v4619_v1  ;;  %v4617_v0 = vmul.f32 -1.442695, %v7595_v23  ;;  %v7601_v57 = vadd.f32 %v4879_v7, %v7538_v59  ;;  %v2790_v11 = vpack.c.bf16 %v2775_v22, %v2774_v3  ;;  %v5151_v3 = vld [vmem:[#allocation11 + $0x20] ss:$8 sps:$4 sm:$0xff]   ;;  %v5154_v7 = vld [vmem:[#allocation11 + $0x10] ss:$8 sps:$4 sm:$0xff]  }
 0x37c   : > { %5382 = vrcp.f32 %v2737_v34  ;;  %v2735_v40 = vadd.f32 1.0, %v5367_v10  ;;  %v2666_v55 = vpop.f32.mrf.mxu1  ;;  %v5369_v47 = vpop.eup %5368  ;;  %v8387_v1 = vmov 0   ;;  %v5153_v34 = vld [vmem:[#allocation11 + $0x24] ss:$8 sps:$4 sm:$0xff]   ;;  %v5156_v10 = vld [vmem:[#allocation11 + $0x14] ss:$8 sps:$4 sm:$0xff]  }
 0x37d   : > { %5384 = vpow2.f32 %v4617_v0  ;;  %v4620_v20 = vmul.f32 -1.442695, %v7601_v57  ;;  %v7605_v18 = vadd.f32 %v7538_v59, %v2666_v55  ;;  %v5371_v12 = vpop.eup %5370  ;;  %4896 = vmatprep.mubr.bf16.mxu1 %v2790_v11  ;;  %v2778_v19 = vmul.f32 %v5369_v47, %v7561_v44  ;;  %v5144_v59 = vld [vmem:[#allocation11 + $0x54] ss:$8 sps:$4 sm:$0xff]  }
 0x37e   : > { %5386 = vrcp.f32 %v2735_v40  ;;  %v5373_v49 = vpop.eup %5372  ;;  %4897 = vmatmul.mubr.bf16.vlgmr.msra.gmra.mxu1 %v2791_v25  ;;  %v2781_v62 = vmul.f32 %v5371_v12, %v7565_v52  ;;  %v5145_v52 = vld [vmem:[#allocation11 + $0x40] ss:$8 sps:$4 sm:$0xff]   ;;  %v5162_v0 = vld [vmem:[%s8139_s12 + $0x74] ss:$8 sps:$4 sm:$0xff]  }
 0x37f   : > { %5388 = vpow2.f32 %v4620_v20  ;;  %v4618_v50 = vmul.f32 -1.442695, %v7605_v18  ;;  %v5375_v33 = vpop.eup %5374  ;;  %3260 = vmatpush1.bf16.msra.mxu1 %v5136_v27  ;;  %v2780_v8 = vmul.f32 %v5373_v49, %v7557_v6  ;;  %3608 = vmatprep.subr.bf16.mxu0 %v5162_v0  ;;  %v5163_v40 = vld [vmem:[%s8139_s12 + $0x60] ss:$8 sps:$4 sm:$0xff]   ;;  %v5168_v55 = vld [vmem:[%s8139_s12 + $0x54] ss:$8 sps:$4 sm:$0xff]  }
 0x380   : > { %v2779_v42 = vmul.f32 %v5375_v33, %v7569_v58  ;;  %3261 = vmatprep.subr.bf16.mxu1 %v5141_v56  ;;  %v5150_v58 = vld [vmem:[#allocation11 + $0x34] ss:$8 sps:$4 sm:$0xff]  }
 0x381   : > { %5390 = vpow2.f32 %v4618_v50  ;;  %v2793_v36 = vpack.c.bf16 %v2781_v62, %v2780_v8  ;;  %v5166_v11 = vld [vmem:[%s8139_s12 + $0x50] ss:$8 sps:$4 sm:$0xff]   ;;  %v5171_v27 = vld [vmem:[%s8139_s12 + $0x44] ss:$8 sps:$4 sm:$0xff]   ;;  %v5169_v47 = vld [vmem:[%s8139_s12 + $0x40] ss:$8 sps:$4 sm:$0xff]  }
 0x382   : > { %v2792_v63 = vpack.c.bf16 %v2779_v42, %v2778_v19  ;;  %v5174_v25 = vld [vmem:[%s8139_s12 + $0x34] ss:$8 sps:$4 sm:$0xff]   ;;  %v5172_v20 = vld [vmem:[%s8139_s12 + $0x30] ss:$8 sps:$4 sm:$0xff]   ;;  %v5175_v56 = vld [vmem:[%s8139_s12 + $0x20] ss:$8 sps:$4 sm:$0xff]  }
 0x383   : > { %3262 = vmatpush1.bf16.msra.mxu1 %v5139_v9  ;;  %v5180_v12 = vld [vmem:[%s8139_s12 + $0x14] ss:$8 sps:$4 sm:$0xff]   ;;  %v5178_v49 = vld [vmem:[%s8139_s12 + $0x10] ss:$8 sps:$4 sm:$0xff]   ;;  %v5183_v50 = vld [vmem:[%s8139_s12 + $0x4] ss:$8 sps:$4 sm:$0xff]  }
 0x384   : > { %4900 = vmatprep.mubr.bf16.mxu1 %v2792_v63  ;;  %3263 = vmatprep.subr.bf16.mxu1 %v5144_v59  ;;  %v5181_v33 = vld [vmem:[%s8139_s12] ss:$8 sps:$4 sm:$0xff]   ;;  %v5186_v9 = vld [vmem:[%s8139_s12 + $0xf4] ss:$8 sps:$4 sm:$0xff]   ;;  %v5184_v19 = vld [vmem:[%s8139_s12 + $0xf0] ss:$8 sps:$4 sm:$0xff]  }
 0x385   : > { %v5377_v43 = vpop.eup %5376  ;;  %v5189_v62 = vld [vmem:[%s8139_s12 + $0xe4] ss:$8 sps:$4 sm:$0xff]   ;;  %v5187_v42 = vld [vmem:[%s8139_s12 + $0xe0] ss:$8 sps:$4 sm:$0xff]   ;;  %v5192_v59 = vld [vmem:[%s8139_s12 + $0xd4] ss:$8 sps:$4 sm:$0xff]  }
 0x386   : > { %4901 = vmatmul.mubr.bf16.gmra.mxu1 %v2793_v36  ;;  %v2784_v26 = vmul.f32 %v5377_v43, %v7573_v38  ;;  %v5190_v8 = vld [vmem:[%s8139_s12 + $0xd0] ss:$8 sps:$4 sm:$0xff]   ;;  %v5195_v63 = vld [vmem:[%s8139_s12 + $0xc4] ss:$8 sps:$4 sm:$0xff]   ;;  %v5198_v36 = vld [vmem:[%s8139_s12 + $0xb4] ss:$8 sps:$4 sm:$0xff]   ;;  %v4916_v43 = vpop.f32.mrf.mxu0 }
 0x387   : > { %v5379_v37 = vpop.eup %5378  ;;  %3264 = vmatpush1.bf16.msra.mxu1 %v5142_v60  ;;  %v5193_v60 = vld [vmem:[%s8139_s12 + $0xc0] ss:$8 sps:$4 sm:$0xff]  }
 0x388   : > { %v5381_v44 = vpop.eup %5380  ;;  %3265 = vmatprep.subr.bf16.mxu1 %v5147_v54  ;;  %v2782_v30 = vmul.f32 %v5379_v37, %v7577_v13  ;;  %v5196_v54 = vld [vmem:[%s8139_s12 + $0xb0] ss:$8 sps:$4 sm:$0xff]   ;;  %v3064_v37 = vpop.f32.mrf.mxu0 }
 0x389   : > { %v5383_v46 = vpop.eup %5382  ;;  %v2740_v48 = vadd.f32 1.0, %v5381_v44 }
 0x38a   : > { %v5385_v15 = vpop.eup %5384  ;;  %v2785_v6 = vmul.f32 %v5383_v46, %v7581_v4  ;;  %v4917_v44 = vpop.f32.mrf.mxu0 }
 0x38b   : > { %v5387_v24 = vpop.eup %5386  ;;  %v2738_v53 = vadd.f32 1.0, %v5385_v15  ;;  %3266 = vmatpush1.bf16.msra.mxu1 %v5145_v52  ;;  %v7702_v15 = vld [vmem:[%s8136_s9] ss:$0 sm:$0xff] }
 0x38c   : > { %v5389_v35 = vpop.eup %5388  ;;  %v2783_v16 = vmul.f32 %v5387_v24, %v7585_v51  ;;  %3267 = vmatprep.subr.bf16.mxu1 %v5150_v58  ;;  %v2795_v28 = vpack.c.bf16 %v2785_v6, %v2784_v26  ;;  %v3067_v46 = vpop.f32.mrf.mxu0  ;;  %v7704_v24 = vld [vmem:[#allocation10] ss:$0 sm:$0xff] }
 0x38d   : > { %v2741_v45 = vadd.f32 1.0, %v5389_v35  ;;  %5392 = vrcp.f32 %v2738_v53 }
 0x38e   : > { %v5391_v39 = vpop.eup %5390  ;;  %v2794_v2 = vpack.c.bf16 %v2783_v16, %v2782_v30  ;;  %v4920_v53 = vpop.f32.mrf.mxu0  ;;  %v3065_v16 = vadd.f32 %v7702_v15, %v3064_v37 }
 0x38f   : > { %5394 = vrcp.f32 %v2741_v45  ;;  %v2739_v41 = vadd.f32 1.0, %v5391_v39  ;;  %3268 = vmatpush1.bf16.msra.mxu1 %v5148_v61 }
 0x390   : > { %5396 = vrcp.f32 %v2740_v48  ;;  %4904 = vmatprep.mubr.bf16.mxu1 %v2794_v2  ;;  %3269 = vmatprep.subr.bf16.mxu1 %v5153_v34  ;;  %v3068_v48 = vadd.f32 %v7702_v15, %v3067_v46  ;;  %v3080_v45 = vpop.f32.mrf.mxu0 }
 0x391   : > { %5398 = vrcp.f32 %v2739_v41  ;;  %4905 = vmatmul.mubr.bf16.gmra.mxu1 %v2795_v28 }
 0x393   : > { %3270 = vmatpush1.bf16.msra.mxu1 %v5151_v3 }
 0x394   : > { %3271 = vmatprep.subr.bf16.mxu1 %v5156_v10 }
 0x397   : > { %3272 = vmatpush1.bf16.msra.mxu1 %v5154_v7 }
 0x39a   : > { %v5393_v13 = vpop.eup %5392 }
 0x39b   : > { %v2786_v38 = vmul.f32 %v5393_v13, %v7595_v23  ;;  %v5159_v23 = vld [vmem:[#allocation11 + $0x4] ss:$8 sps:$4 sm:$0xff]  }
 0x39c   : > { %v5395_v4 = vpop.eup %5394  ;;  %3273 = vmatprep.subr.bf16.mxu1 %v5159_v23 }
 0x39d   : > { %v5397_v51 = vpop.eup %5396  ;;  %v2789_v14 = vmul.f32 %v5395_v4, %v7601_v57  ;;  %3274 = vmatpush1.bf16.msra.mxu1 %v5157_v17  ;;  %v5165_v57 = vld [vmem:[%s8139_s12 + $0x64] ss:$8 sps:$4 sm:$0xff]  }
 0x39e   : > { %v5399_v29 = vpop.eup %5398  ;;  %v2788_v5 = vmul.f32 %v5397_v51, %v7589_v32  ;;  %v5160_v32 = vld [vmem:[%s8139_s12 + $0x70] ss:$8 sps:$4 sm:$0xff]   ;;  %v4921_v51 = vpop.f32.mrf.mxu0 }
 0x39f   : > { %v2787_v31 = vmul.f32 %v5399_v29, %v7605_v18  ;;  %3609 = vmatpush1.bf16.msra.mxu0 %v5160_v32  ;;  %v5177_v18 = vld [vmem:[%s8139_s12 + $0x24] ss:$8 sps:$4 sm:$0xff]   ;;  %v3073_v29 = vadd.f32 %v4916_v43, %v7702_v15  ;;  %v3081_v32 = vadd.f32 %v7702_v15, %v3080_v45 }
 0x3a0   : > { %v2797_v22 = vpack.c.bf16 %v2789_v14, %v2788_v5  ;;  %3610 = vmatprep.subr.bf16.mxu0 %v5165_v57  ;;  %v3076_v14 = vadd.f32 %v4917_v44, %v7702_v15 }
 0x3a1   : > { %v2796_v21 = vpack.c.bf16 %v2787_v31, %v2786_v38 }
 0x3a3   : > { %4908 = vmatprep.mubr.bf16.mxu1 %v2796_v21  ;;  %3611 = vmatpush1.bf16.msra.mxu0 %v5163_v40  ;;  %v3083_v21 = vpop.f32.mrf.mxu0 }
 0x3a4   : > { %4909 = vmatmul.mubr.bf16.gmra.mxu1 %v2797_v22  ;;  %3612 = vmatprep.subr.bf16.mxu0 %v5168_v55  ;;  %v3084_v34 = vadd.f32 %v7702_v15, %v3083_v21  ;;  %v5199_v21 = vld [vmem:[%s8139_s12 + $0xa0] ss:$8 sps:$4 sm:$0xff]  }
 0x3a5   : > { %3291 = vmatprep.mubr.bf16.mxu1 %v8387_v1  ;;  %v4924_v17 = vpop.f32.mrf.mxu0 }
 0x3a7   : > { %3613 = vmatpush1.bf16.msra.mxu0 %v5166_v11  ;;  %v3096_v40 = vpop.f32.mrf.mxu0 }
 0x3a8   : > { %3614 = vmatprep.subr.bf16.mxu0 %v5171_v27  ;;  %v3092_v27 = vadd.f32 %v4921_v51, %v7702_v15 }
 0x3ab   : > { %3615 = vmatpush1.bf16.msra.mxu0 %v5169_v47 }
 0x3ac   : > { %3616 = vmatprep.subr.bf16.mxu0 %v5174_v25 }
 0x3af   : > { %3617 = vmatpush1.bf16.msra.mxu0 %v5172_v20  ;;  %v4925_v20 = vpop.f32.mrf.mxu0 }
 0x3b0   : > { %3618 = vmatprep.subr.bf16.mxu0 %v5177_v18  ;;  %v3108_v44 = vadd.f32 %v4925_v20, %v7702_v15  ;;  %v5226_v20 = vld [vmem:[%s8141_s14 + $0x10] ss:$8 sps:$4 sm:$0xff]  }
 0x3b3   : > { %3619 = vmatpush1.bf16.msra.mxu0 %v5175_v56  ;;  %v3089_v56 = vadd.f32 %v4920_v53, %v7702_v15  ;;  %v3105_v53 = vadd.f32 %v4924_v17, %v7702_v15  ;;  %v5213_v17 = vld [vmem:[%s8141_s14 + $0x64] ss:$8 sps:$4 sm:$0xff]  }
 0x3b4   : > { %3620 = vmatprep.subr.bf16.mxu0 %v5180_v12 }
 0x3b7   : > { %3621 = vmatpush1.bf16.msra.mxu0 %v5178_v49 }
 0x3b8   : > { %3622 = vmatprep.subr.bf16.mxu0 %v5183_v50  ;;  %v3099_v50 = vpop.f32.mrf.mxu0 }
 0x3bb   : > { %3623 = vmatpush1.bf16.msra.mxu0 %v5181_v33 }
 0x3bc   : > { %3624 = vmatprep.subr.bf16.mxu0 %v5186_v9 }
 0x3bf   : > { %3625 = vmatpush2.bf16.msra.mxu0 %v5184_v19  ;;  %v3100_v19 = vadd.f32 %v7702_v15, %v3099_v50  ;;  %v5237_v50 = vld [vmem:[%s8141_s14 + $0xe4] ss:$8 sps:$4 sm:$0xff]  }
 0x3c0   : > { %3626 = vmatprep.subr.bf16.mxu0 %v5189_v62 }
 0x3c3   : > { %3627 = vmatpush2.bf16.msra.mxu0 %v5187_v42  ;;  %v4928_v42 = vpop.f32.mrf.mxu0 }
 0x3c4   : > { %3628 = vmatprep.subr.bf16.mxu0 %v5192_v59 }
 0x3c7   : > { %3629 = vmatpush2.bf16.msra.mxu0 %v5190_v8  ;;  %v3097_v8 = vadd.f32 %v7702_v15, %v3096_v40  ;;  %v5217_v40 = vld [vmem:[%s8141_s14 + $0x40] ss:$8 sps:$4 sm:$0xff]  }
 0x3c8   : > { %3630 = vmatprep.subr.bf16.mxu0 %v5195_v63 }
 0x3cb   : > { %3631 = vmatpush2.bf16.msra.mxu0 %v5193_v60 }
 0x3cc   : > { %3632 = vmatprep.subr.bf16.mxu0 %v5198_v36 }
 0x3cf   : > { %3633 = vmatpush2.bf16.msra.mxu0 %v5196_v54  ;;  %v3112_v54 = vpop.f32.mrf.mxu0 }
 0x43e   : > { %v4898_v52 = vpop.f32.mrf.mxu1 }
 0x43f   : > { %v2912_v38 = vadd.f32 %v4898_v52, %v7704_v24 }
 0x440   : > { %v2903_v58 = vpop.f32.mrf.mxu1 }
 0x441   : > { %v2904_v35 = vadd.f32 %v7704_v24, %v2903_v58  ;;  %v3129_v22 = vadd.f32 %v3073_v29, %v2912_v38  ;;  %v4929_v58 = vpop.f32.mrf.mxu0 }
 0x442   : > { %v4899_v6 = vpop.f32.mrf.mxu1 }
 0x443   : > { %v3127_v39 = vadd.f32 %v3065_v16, %v2904_v35  ;;  %v2915_v28 = vadd.f32 %v4899_v6, %v7704_v24  ;;  %v3115_v16 = vpop.f32.mrf.mxu0 }
 0x444   : > { %v2906_v30 = vpop.f32.mrf.mxu1 }
 0x445   : > { %v2907_v61 = vadd.f32 %v7704_v24, %v2906_v30  ;;  %v3130_v31 = vadd.f32 %v3076_v14, %v2915_v28  ;;  %v3121_v14 = vadd.f32 %v4928_v42, %v7702_v15  ;;  %v5241_v42 = vld [vmem:[%s8141_s14 + $0xc0] ss:$8 sps:$4 sm:$0xff]  }
 0x446   : > { %v4902_v26 = vpop.f32.mrf.mxu1 }
 0x447   : > { %v3128_v2 = vadd.f32 %v3068_v48, %v2907_v61  ;;  %v3144_v7 = vpack.c.bf16 %v3130_v31, %v3129_v22  ;;  %v2928_v18 = vadd.f32 %v4902_v26, %v7704_v24  ;;  %v3116_v26 = vadd.f32 %v7702_v15, %v3115_v16  ;;  %v5201_v22 = vld [vmem:[%s8139_s12 + $0xa4] ss:$8 sps:$4 sm:$0xff]  }
 0x448   : > { %v2919_v41 = vpop.f32.mrf.mxu1  ;;  %3634 = vmatprep.subr.bf16.mxu0 %v5201_v22 }
 0x449   : > { %v3143_v13 = vpack.c.bf16 %v3128_v2, %v3127_v39  ;;  %v2920_v23 = vadd.f32 %v7704_v24, %v2919_v41  ;;  %v3133_v33 = vadd.f32 %v3089_v56, %v2928_v18  ;;  %v3113_v2 = vadd.f32 %v7702_v15, %v3112_v54  ;;  %3635 = vmatpush2.bf16.msra.mxu0 %v5199_v21  ;;  %v5231_v18 = vld [vmem:[%s8141_s14 + $0x4] ss:$8 sps:$4 sm:$0xff]   ;;  %v5229_v56 = vld [vmem:[%s8141_s14] ss:$8 sps:$4 sm:$0xff]  }
 0x44a   : > { %v4903_v4 = vpop.f32.mrf.mxu1  ;;  %v3167_v54 = vld [vmem:[%s8138_s11] sm:$0x3] }
 0x44b   : > { %3292 = vmatmul.mubr.bf16.vlgmr.msra.gmra.mxu1 %v3143_v13  ;;  %v3131_v55 = vadd.f32 %v3081_v32, %v2920_v23  ;;  %v2931_v11 = vadd.f32 %v4903_v4, %v7704_v24  ;;  %v3124_v4 = vadd.f32 %v4929_v58, %v7702_v15  ;;  %v5202_v15 = vld [vmem:[%s8139_s12 + $0x90] ss:$8 sps:$4 sm:$0xff]   ;;  %v5211_v23 = vld [vmem:[%s8141_s14 + $0x60] ss:$8 sps:$4 sm:$0xff]   ;;  %v5216_v32 = vld [vmem:[%s8141_s14 + $0x54] ss:$8 sps:$4 sm:$0xff]  }
 0x44c   : > { %3301 = vmatprep.mubr.bf16.mxu1 %v8387_v1  ;;  %v2922_v5 = vpop.f32.mrf.mxu1 }
 0x44d   : > { %v2923_v3 = vadd.f32 %v7704_v24, %v2922_v5  ;;  %v3134_v12 = vadd.f32 %v3092_v27, %v2931_v11  ;;  %v5220_v11 = vld [vmem:[%s8141_s14 + $0x30] ss:$8 sps:$4 sm:$0xff]   ;;  %v5225_v27 = vld [vmem:[%s8141_s14 + $0x24] ss:$8 sps:$4 sm:$0xff]  }
 0x44f   : > { %v3132_v0 = vadd.f32 %v3084_v34, %v2923_v3  ;;  %v3146_v62 = vpack.c.bf16 %v3134_v12, %v3133_v33  ;;  %v5207_v3 = vld [vmem:[%s8139_s12 + $0x84] ss:$8 sps:$4 sm:$0xff]   ;;  %v5205_v34 = vld [vmem:[%s8139_s12 + $0x80] ss:$8 sps:$4 sm:$0xff]   ;;  %v5234_v12 = vld [vmem:[%s8141_s14 + $0xf4] ss:$8 sps:$4 sm:$0xff]  }
 0x450   : > { %v5235_v33 = vld [vmem:[%s8141_s14 + $0xe0] ss:$8 sps:$4 sm:$0xff]  }
 0x451   : > { %v4906_v10 = vpop.f32.mrf.mxu1  ;;  %v3145_v47 = vpack.c.bf16 %v3132_v0, %v3131_v55  ;;  %v5214_v0 = vld [vmem:[%s8141_s14 + $0x50] ss:$8 sps:$4 sm:$0xff]   ;;  %v5222_v55 = vld [vmem:[%s8141_s14 + $0x34] ss:$8 sps:$4 sm:$0xff]  }
 0x452   : > { %v2944_v6 = vadd.f32 %v4906_v10, %v7704_v24  ;;  %v5210_v10 = vld [vmem:[%s8141_s14 + $0x74] ss:$8 sps:$4 sm:$0xff]  }
 0x453   : > { %3302 = vmatmul.mubr.bf16.gmra.mxu1 %v3144_v7  ;;  %v2935_v57 = vpop.f32.mrf.mxu1  ;;  %v5208_v7 = vld [vmem:[%s8141_s14 + $0x70] ss:$8 sps:$4 sm:$0xff]   ;;  %3957 = vmatprep.subr.bf16.mxu1 %v5210_v10 }
 0x454   : > { %3311 = vmatprep.mubr.bf16.mxu1 %v8387_v1  ;;  %v2936_v59 = vadd.f32 %v7704_v24, %v2935_v57  ;;  %v3137_v48 = vadd.f32 %v3105_v53, %v2944_v6  ;;  %3958 = vmatpush1.bf16.msra.mxu1 %v5208_v7  ;;  %v5219_v57 = vld [vmem:[%s8141_s14 + $0x44] ss:$8 sps:$4 sm:$0xff]  }
 0x455   : > { %v4907_v25 = vpop.f32.mrf.mxu1  ;;  %3959 = vmatprep.subr.bf16.mxu1 %v5213_v17 }
 0x456   : > { %v3135_v43 = vadd.f32 %v3097_v8, %v2936_v59  ;;  %v2947_v37 = vadd.f32 %v4907_v25, %v7704_v24  ;;  %v5228_v25 = vld [vmem:[%s8141_s14 + $0x14] ss:$8 sps:$4 sm:$0xff]   ;;  %v5244_v8 = vld [vmem:[%s8141_s14 + $0xb0] ss:$8 sps:$4 sm:$0xff]  }
 0x457   : > { %v2938_v49 = vpop.f32.mrf.mxu1  ;;  %v5246_v59 = vld [vmem:[%s8141_s14 + $0xb4] ss:$8 sps:$4 sm:$0xff]  }
 0x458   : > { %v2939_v9 = vadd.f32 %v7704_v24, %v2938_v49  ;;  %v3138_v35 = vadd.f32 %v3108_v44, %v2947_v37  ;;  %3960 = vmatpush1.bf16.msra.mxu1 %v5211_v23  ;;  %v5232_v49 = vld [vmem:[%s8141_s14 + $0xf0] ss:$8 sps:$4 sm:$0xff]  }
 0x459   : > { %3961 = vmatprep.subr.bf16.mxu1 %v5216_v32 }
 0x45a   : > { %v3136_v60 = vadd.f32 %v3100_v19, %v2939_v9  ;;  %v3148_v45 = vpack.c.bf16 %v3138_v35, %v3137_v48  ;;  %v5240_v9 = vld [vmem:[%s8141_s14 + $0xd4] ss:$8 sps:$4 sm:$0xff]   ;;  %v5238_v19 = vld [vmem:[%s8141_s14 + $0xd0] ss:$8 sps:$4 sm:$0xff]  }
 0x45b   : > { %3312 = vmatmul.mubr.bf16.gmra.mxu1 %v3145_v47  ;;  %v5223_v47 = vld [vmem:[%s8141_s14 + $0x20] ss:$8 sps:$4 sm:$0xff]  }
 0x45c   : > { %3321 = vmatprep.mubr.bf16.mxu1 %v8387_v1  ;;  %v3147_v52 = vpack.c.bf16 %v3136_v60, %v3135_v43  ;;  %3962 = vmatpush1.bf16.msra.mxu1 %v5214_v0 }
 0x45d   : > { %3963 = vmatprep.subr.bf16.mxu1 %v5219_v57 }
 0x460   : > { %3964 = vmatpush1.bf16.msra.mxu1 %v5217_v40 }
 0x461   : > { %3965 = vmatprep.subr.bf16.mxu1 %v5222_v55 }
 0x463   : > { %3322 = vmatmul.mubr.bf16.gmra.mxu1 %v3146_v62  ;;  %v5243_v62 = vld [vmem:[%s8141_s14 + $0xc4] ss:$8 sps:$4 sm:$0xff]  }
 0x464   : > { %v4910_v63 = vpop.f32.mrf.mxu1  ;;  %3331 = vmatprep.mubr.bf16.mxu1 %v8387_v1  ;;  %3966 = vmatpush1.bf16.msra.mxu1 %v5220_v11 }
 0x465   : > { %v2960_v29 = vadd.f32 %v4910_v63, %v7704_v24  ;;  %3967 = vmatprep.subr.bf16.mxu1 %v5225_v27  ;;  %v3169_v63 = vlaneseq }
 0x466   : > { %v2951_v36 = vpop.f32.mrf.mxu1 }
 0x467   : > { %v2952_v39 = vadd.f32 %v7704_v24, %v2951_v36  ;;  %v3141_v31 = vadd.f32 %v3121_v14, %v2960_v29  ;;  %v3170_v60 = vshrl.u32 %v3169_v63, 7 }
 0x468   : > { %v4911_v46 = vpop.f32.mrf.mxu1  ;;  %3968 = vmatpush1.bf16.msra.mxu1 %v5223_v47 }
 0x469   : > { %v3139_v28 = vadd.f32 %v3113_v2, %v2952_v39  ;;  %v2963_v13 = vadd.f32 %v4911_v46, %v7704_v24  ;;  %3969 = vmatprep.subr.bf16.mxu1 %v5228_v25  ;;  %v7841_v36 = vsub.s32 0, %v3170_v60  ;;  %v7846_v43 = vsub.s32 1, %v3170_v60 }
 0x46a   : > { %v2954_v30 = vpop.f32.mrf.mxu1 }
 0x46b   : > { %3332 = vmatmul.mubr.bf16.gmra.mxu1 %v3147_v52  ;;  %v2955_v61 = vadd.f32 %v7704_v24, %v2954_v30  ;;  %v3142_v38 = vadd.f32 %v3124_v4, %v2963_v13  ;;  %v5204_v24 = vld [vmem:[%s8139_s12 + $0x94] ss:$8 sps:$4 sm:$0xff]   ;;  %v7849_v44 = vrot.slane %v3167_v54, %v7841_v36  ;;  %v7852_v46 = vrot.slane %v3167_v54, %v7846_v43 }
 0x46c   : > { %3341 = vmatprep.mubr.bf16.mxu1 %v8387_v1  ;;  %3636 = vmatprep.subr.bf16.mxu0 %v5204_v24 }
 0x46d   : > { %v3140_v41 = vadd.f32 %v3116_v26, %v2955_v61  ;;  %v3150_v5 = vpack.c.bf16 %v3142_v38, %v3141_v31  ;;  %3637 = vmatpush2.bf16.msra.mxu0 %v5202_v15  ;;  %3970 = vmatpush1.bf16.msra.mxu1 %v5226_v20 }
 0x46e   : > { %3638 = vmatprep.subr.bf16.mxu0 %v5207_v3  ;;  %3971 = vmatprep.subr.bf16.mxu1 %v5231_v18 }
 0x46f   : > { %v3149_v51 = vpack.c.bf16 %v3140_v41, %v3139_v28 }
 0x471   : > { %3639 = vmatpush2.bf16.msra.mxu0 %v5205_v34  ;;  %3972 = vmatpush1.bf16.msra.mxu1 %v5229_v56 }
 0x472   : > { %3973 = vmatprep.subr.bf16.mxu1 %v5234_v12 }
 0x473   : > { %3342 = vmatmul.mubr.bf16.gmra.mxu1 %v3148_v45 }
 0x474   : > { %3351 = vmatprep.mubr.bf16.mxu1 %v8387_v1 }
 0x475   : > { %3974 = vmatpush2.bf16.msra.mxu1 %v5232_v49 }
 0x476   : > { %3975 = vmatprep.subr.bf16.mxu1 %v5237_v50 }
 0x479   : > { %3976 = vmatpush2.bf16.msra.mxu1 %v5235_v33 }
 0x47a   : > { %3977 = vmatprep.subr.bf16.mxu1 %v5240_v9 }
 0x47b   : > { %3352 = vmatmul.mubr.bf16.gmra.mxu1 %v3149_v51 }
 0x47c   : > { %3361 = vmatprep.mubr.bf16.mxu1 %v8387_v1 }
 0x47d   : > { %3978 = vmatpush2.bf16.msra.mxu1 %v5238_v19 }
 0x47e   : > { %3979 = vmatprep.subr.bf16.mxu1 %v5243_v62 }
 0x481   : > { %3980 = vmatpush2.bf16.msra.mxu1 %v5241_v42 }
 0x482   : > { %3981 = vmatprep.subr.bf16.mxu1 %v5246_v59 }
 0x483   : > { %3362 = vmatmul.mubr.bf16.gmra.mxu1 %v3150_v5 }
 0x485   : > { %3982 = vmatpush2.bf16.msra.mxu1 %v5244_v8 }
 0x50b   : > { %v3293_v37 = vpop.f32.mrf.mxu1 }
 0x50c   : > { %v3294_v53 = vadd.f32 %v3293_v37, %v7849_v44 }
 0x50d   : > { %v3295_v52 = vpop.f32.mrf.mxu1 }
 0x50e   : > { %v3296_v30 = vadd.f32 %v3295_v52, %v7852_v46 }
 0x50f   : > { %v3297_v58 = vpop.f32.mrf.mxu1 }
 0x510   : > { %v3298_v6 = vadd.f32 %v3297_v58, %v7849_v44 }
 0x511   : > { %v3299_v35 = vpop.f32.mrf.mxu1 }
 0x512   : > { %v3300_v16 = vadd.f32 %v3299_v35, %v7852_v46  ;;  %v3372_v48 = vpack.c.bf16 %v3298_v6, %v3294_v53 }
 0x513   : > { %v3303_v61 = vpop.f32.mrf.mxu1 }
 0x514   : > { %v3373_v26 = vpack.c.bf16 %v3300_v16, %v3296_v30  ;;  %v3388_v2 = vmax.bf16 %v8387_v1, %v3372_v48  ;;  %v3304_v13 = vadd.f32 %v3303_v61, %v7849_v44 }
 0x515   : > { %v3305_v45 = vpop.f32.mrf.mxu1 }
 0x516   : > { %v3389_v39 = vmax.bf16 %v8387_v1, %v3373_v26  ;;  %v3306_v51 = vadd.f32 %v3305_v45, %v7852_v46 }
 0x517   : > { %v3307_v41 = vpop.f32.mrf.mxu1 }
 0x518   : > { %v3308_v28 = vadd.f32 %v3307_v41, %v7849_v44  ;;  %3640 = vmatprep.mubr.bf16.mxu0 %v3389_v39 }
 0x519   : > { %v3309_v4 = vpop.f32.mrf.mxu1  ;;  %3641 = vmatmul.mubr.bf16.vlgmr.msra.gmra.mxu0 %v3388_v2 }
 0x51a   : > { %v3310_v29 = vadd.f32 %v3309_v4, %v7852_v46  ;;  %v3374_v14 = vpack.c.bf16 %v3308_v28, %v3304_v13 }
 0x51b   : > { %v3313_v38 = vpop.f32.mrf.mxu1 }
 0x51c   : > { %v3375_v31 = vpack.c.bf16 %v3310_v29, %v3306_v51  ;;  %v3390_v15 = vmax.bf16 %v8387_v1, %v3374_v14  ;;  %v3314_v3 = vadd.f32 %v3313_v38, %v7849_v44 }
 0x51d   : > { %v3315_v5 = vpop.f32.mrf.mxu1 }
 0x51e   : > { %v3391_v21 = vmax.bf16 %v8387_v1, %v3375_v31  ;;  %v3316_v7 = vadd.f32 %v3315_v5, %v7852_v46 }
 0x51f   : > { %v3317_v22 = vpop.f32.mrf.mxu1 }
 0x520   : > { %v3318_v24 = vadd.f32 %v3317_v22, %v7849_v44  ;;  %3650 = vmatprep.mubr.bf16.mxu0 %v3391_v21 }
 0x521   : > { %v3319_v34 = vpop.f32.mrf.mxu1  ;;  %3651 = vmatmul.mubr.bf16.gmra.mxu0 %v3390_v15 }
 0x522   : > { %v3320_v10 = vadd.f32 %v3319_v34, %v7852_v46  ;;  %v3376_v17 = vpack.c.bf16 %v3318_v24, %v3314_v3 }
 0x523   : > { %v3323_v23 = vpop.f32.mrf.mxu1 }
 0x524   : > { %v3377_v32 = vpack.c.bf16 %v3320_v10, %v3316_v7  ;;  %v3392_v55 = vmax.bf16 %v8387_v1, %v3376_v17  ;;  %v3324_v27 = vadd.f32 %v3323_v23, %v7849_v44 }
 0x525   : > { %v3325_v0 = vpop.f32.mrf.mxu1 }
 0x526   : > { %v3393_v57 = vmax.bf16 %v8387_v1, %v3377_v32  ;;  %v3326_v25 = vadd.f32 %v3325_v0, %v7852_v46 }
 0x527   : > { %v3327_v40 = vpop.f32.mrf.mxu1 }
 0x528   : > { %v3328_v11 = vadd.f32 %v3327_v40, %v7849_v44  ;;  %3660 = vmatprep.mubr.bf16.mxu0 %v3393_v57  ;;  %v5247_v40 = vld [vmem:[%s8141_s14 + $0xa0] ss:$8 sps:$4 sm:$0xff]  }
 0x529   : > { %v3329_v47 = vpop.f32.mrf.mxu1  ;;  %3661 = vmatmul.mubr.bf16.gmra.mxu0 %v3392_v55  ;;  %v5252_v55 = vld [vmem:[%s8141_s14 + $0x94] ss:$8 sps:$4 sm:$0xff]  }
 0x52a   : > { %v3330_v20 = vadd.f32 %v3329_v47, %v7852_v46  ;;  %v3378_v18 = vpack.c.bf16 %v3328_v11, %v3324_v27  ;;  %v5255_v11 = vld [vmem:[%s8141_s14 + $0x84] ss:$8 sps:$4 sm:$0xff]   ;;  %v5253_v27 = vld [vmem:[%s8141_s14 + $0x80] ss:$8 sps:$4 sm:$0xff]  }
 0x52b   : > { %v3333_v56 = vpop.f32.mrf.mxu1  ;;  %v5256_v47 = vld [vmem:[#allocation13 + $0x78] sm:$0xff]  }
 0x52c   : > { %v3379_v12 = vpack.c.bf16 %v3330_v20, %v3326_v25  ;;  %v3394_v9 = vmax.bf16 %v8387_v1, %v3378_v18  ;;  %v3334_v62 = vadd.f32 %v3333_v56, %v7849_v44  ;;  %v5257_v25 = vld [vmem:[#allocation13 + $0x38] sm:$0xff]   ;;  %v5258_v20 = vld [vmem:[#allocation13 + $0x70] sm:$0xff]   ;;  %4784 = vmatprep.subr.bf16.mxu0 %v5256_v47  ;;  %v5260_v56 = vld [vmem:[#allocation13 + $0x68] sm:$0xff]  }
 0x52d   : > { %v3335_v49 = vpop.f32.mrf.mxu1  ;;  %4785 = vmatpush3.bf16.msra.mxu0 %v5257_v25  ;;  %v5259_v18 = vld [vmem:[#allocation13 + $0x30] sm:$0xff]  }
 0x52e   : > { %v3395_v50 = vmax.bf16 %v8387_v1, %v3379_v12  ;;  %v3336_v59 = vadd.f32 %v3335_v49, %v7852_v46  ;;  %4786 = vmatprep.subr.bf16.mxu0 %v5258_v20  ;;  %v5261_v12 = vld [vmem:[#allocation13 + $0x28] sm:$0xff]   ;;  %v5262_v49 = vld [vmem:[#allocation13 + $0x60] sm:$0xff]  }
 0x52f   : > { %v3337_v33 = vpop.f32.mrf.mxu1 }
 0x530   : > { %v3338_v19 = vadd.f32 %v3337_v33, %v7849_v44  ;;  %3670 = vmatprep.mubr.bf16.mxu0 %v3395_v50  ;;  %v5263_v50 = vld [vmem:[#allocation13 + $0x20] sm:$0xff]   ;;  %v5264_v33 = vld [vmem:[#allocation13 + $0x58] sm:$0xff]  }
 0x531   : > { %v3339_v42 = vpop.f32.mrf.mxu1  ;;  %3671 = vmatmul.mubr.bf16.gmra.mxu0 %v3394_v9  ;;  %v5265_v9 = vld [vmem:[#allocation13 + $0x18] sm:$0xff]  }
 0x532   : > { %v3340_v8 = vadd.f32 %v3339_v42, %v7852_v46  ;;  %v3380_v63 = vpack.c.bf16 %v3338_v19, %v3334_v62  ;;  %4787 = vmatpush3.bf16.msra.mxu0 %v5259_v18  ;;  %v5266_v19 = vld [vmem:[#allocation13 + $0x50] sm:$0xff]   ;;  %v5268_v42 = vld [vmem:[#allocation13 + $0x48] sm:$0xff]  }
 0x533   : > { %v3343_v60 = vpop.f32.mrf.mxu1  ;;  %4788 = vmatprep.subr.bf16.mxu0 %v5260_v56  ;;  %v5267_v62 = vld [vmem:[#allocation13 + $0x10] sm:$0xff]  }
 0x534   : > { %v3381_v54 = vpack.c.bf16 %v3340_v8, %v3336_v59  ;;  %v3396_v6 = vmax.bf16 %v8387_v1, %v3380_v63  ;;  %v3344_v35 = vadd.f32 %v3343_v60, %v7849_v44  ;;  %v5269_v59 = vld [vmem:[#allocation13 + $0x8] sm:$0xff]   ;;  %v3436_v8 = vld [vmem:[%s8140_s13] sm:$0x3] }
 0x535   : > { %v3345_v37 = vpop.f32.mrf.mxu1  ;;  %v7924_v60 = vrot.slane %v3436_v8, %v7841_v36 }
 0x536   : > { %v3397_v52 = vmax.bf16 %v8387_v1, %v3381_v54  ;;  %v3346_v16 = vadd.f32 %v3345_v37, %v7852_v46  ;;  %4789 = vmatpush3.bf16.msra.mxu0 %v5261_v12  ;;  %v7927_v37 = vrot.slane %v3436_v8, %v7846_v43 }
 0x537   : > { %v3347_v58 = vpop.f32.mrf.mxu1  ;;  %4790 = vmatprep.subr.bf16.mxu0 %v5262_v49 }
 0x538   : > { %v3348_v53 = vadd.f32 %v3347_v58, %v7849_v44  ;;  %3680 = vmatprep.mubr.bf16.mxu0 %v3397_v52 }
 0x539   : > { %v3349_v30 = vpop.f32.mrf.mxu1  ;;  %3681 = vmatmul.mubr.bf16.gmra.mxu0 %v3396_v6 }
 0x53a   : > { %v3350_v48 = vadd.f32 %v3349_v30, %v7852_v46  ;;  %v3382_v61 = vpack.c.bf16 %v3348_v53, %v3344_v35  ;;  %4791 = vmatpush3.bf16.msra.mxu0 %v5263_v50 }
 0x53b   : > { %v3353_v26 = vpop.f32.mrf.mxu1  ;;  %4792 = vmatprep.subr.bf16.mxu0 %v5264_v33 }
 0x53c   : > { %v3383_v45 = vpack.c.bf16 %v3350_v48, %v3346_v16  ;;  %v3398_v28 = vmax.bf16 %v8387_v1, %v3382_v61  ;;  %v3354_v4 = vadd.f32 %v3353_v26, %v7849_v44 }
 0x53d   : > { %v3355_v39 = vpop.f32.mrf.mxu1 }
 0x53e   : > { %v3399_v2 = vmax.bf16 %v8387_v1, %v3383_v45  ;;  %v3356_v29 = vadd.f32 %v3355_v39, %v7852_v46  ;;  %4793 = vmatpush3.bf16.msra.mxu0 %v5265_v9 }
 0x53f   : > { %v3357_v41 = vpop.f32.mrf.mxu1  ;;  %4794 = vmatprep.subr.bf16.mxu0 %v5266_v19 }
 0x540   : > { %v3358_v13 = vadd.f32 %v3357_v41, %v7849_v44  ;;  %3690 = vmatprep.mubr.bf16.mxu0 %v3399_v2 }
 0x541   : > { %v3359_v51 = vpop.f32.mrf.mxu1  ;;  %3691 = vmatmul.mubr.bf16.gmra.mxu0 %v3398_v28 }
 0x542   : > { %v3360_v14 = vadd.f32 %v3359_v51, %v7852_v46  ;;  %v3384_v38 = vpack.c.bf16 %v3358_v13, %v3354_v4  ;;  %4795 = vmatpush3.bf16.msra.mxu0 %v5267_v62 }
 0x543   : > { %v3363_v31 = vpop.f32.mrf.mxu1  ;;  %4796 = vmatprep.subr.bf16.mxu0 %v5268_v42 }
 0x544   : > { %v3385_v5 = vpack.c.bf16 %v3360_v14, %v3356_v29  ;;  %v3400_v24 = vmax.bf16 %v8387_v1, %v3384_v38  ;;  %v3364_v34 = vadd.f32 %v3363_v31, %v7849_v44 }
 0x545   : > { %v3365_v21 = vpop.f32.mrf.mxu1 }
 0x546   : > { %v3401_v22 = vmax.bf16 %v8387_v1, %v3385_v5  ;;  %v3366_v10 = vadd.f32 %v3365_v21, %v7852_v46  ;;  %4797 = vmatpush3.bf16.msra.mxu0 %v5269_v59 }
 0x547   : > { %v3367_v15 = vpop.f32.mrf.mxu1 }
 0x548   : > { %v3368_v3 = vadd.f32 %v3367_v15, %v7849_v44  ;;  %3700 = vmatprep.mubr.bf16.mxu0 %v3401_v22  ;;  %v5249_v44 = vld [vmem:[%s8141_s14 + $0xa4] ss:$8 sps:$4 sm:$0xff]  }
 0x549   : > { %v3369_v7 = vpop.f32.mrf.mxu1  ;;  %3701 = vmatmul.mubr.bf16.gmra.mxu0 %v3400_v24  ;;  %3983 = vmatprep.subr.bf16.mxu1 %v5249_v44 }
 0x54a   : > { %v3370_v17 = vadd.f32 %v3369_v7, %v7852_v46  ;;  %v3386_v23 = vpack.c.bf16 %v3368_v3, %v3364_v34  ;;  %3984 = vmatpush2.bf16.msra.mxu1 %v5247_v40  ;;  %v5250_v46 = vld [vmem:[%s8141_s14 + $0x90] ss:$8 sps:$4 sm:$0xff]  }
 0x54b   : > { %3985 = vmatprep.subr.bf16.mxu1 %v5252_v55 }
 0x54c   : > { %v3387_v32 = vpack.c.bf16 %v3370_v17, %v3366_v10  ;;  %v3402_v57 = vmax.bf16 %v8387_v1, %v3386_v23 }
 0x54e   : > { %v3403_v0 = vmax.bf16 %v8387_v1, %v3387_v32  ;;  %3986 = vmatpush2.bf16.msra.mxu1 %v5250_v46 }
 0x54f   : > { %3987 = vmatprep.subr.bf16.mxu1 %v5255_v11 }
 0x550   : > { %3710 = vmatprep.mubr.bf16.mxu0 %v3403_v0 }
 0x551   : > { %3711 = vmatmul.mubr.bf16.gmra.mxu0 %v3402_v57 }
 0x552   : > { %3988 = vmatpush2.bf16.msra.mxu1 %v5253_v27 }
 0x5d9   : > { %v3642_v63 = vpop.f32.mrf.mxu0 }
 0x5da   : > { %v3643_v6 = vadd.f32 %v3642_v63, %v7924_v60 }
 0x5db   : > { %v3644_v54 = vpop.f32.mrf.mxu0 }
 0x5dc   : > { %v3645_v35 = vadd.f32 %v3644_v54, %v7927_v37 }
 0x5dd   : > { %v3646_v52 = vpop.f32.mrf.mxu0 }
 0x5de   : > { %v3647_v58 = vadd.f32 %v3646_v52, %v7924_v60 }
 0x5df   : > { %v3648_v53 = vpop.f32.mrf.mxu0 }
 0x5e0   : > { %v3649_v30 = vadd.f32 %v3648_v53, %v7927_v37  ;;  %v3721_v16 = vpack.c.bf16 %v3647_v58, %v3643_v6 }
 0x5e1   : > { %v3652_v48 = vpop.f32.mrf.mxu0 }
 0x5e2   : > { %v3722_v61 = vpack.c.bf16 %v3649_v30, %v3645_v35  ;;  %v3737_v39 = vmax.bf16 %v8387_v1, %v3721_v16  ;;  %v3653_v28 = vadd.f32 %v3652_v48, %v7924_v60 }
 0x5e3   : > { %v3654_v26 = vpop.f32.mrf.mxu0 }
 0x5e4   : > { %v3738_v45 = vmax.bf16 %v8387_v1, %v3722_v61  ;;  %v3655_v4 = vadd.f32 %v3654_v26, %v7927_v37 }
 0x5e5   : > { %v3656_v2 = vpop.f32.mrf.mxu0 }
 0x5e6   : > { %v3657_v41 = vadd.f32 %v3656_v2, %v7924_v60  ;;  %3989 = vmatprep.mubr.bf16.mxu1 %v3738_v45 }
 0x5e7   : > { %v3658_v13 = vpop.f32.mrf.mxu0  ;;  %3990 = vmatmul.mubr.bf16.vlgmr.msra.gmra.mxu1 %v3737_v39 }
 0x5e8   : > { %v3659_v51 = vadd.f32 %v3658_v13, %v7927_v37  ;;  %v3723_v29 = vpack.c.bf16 %v3657_v41, %v3653_v28 }
 0x5e9   : > { %v3662_v14 = vpop.f32.mrf.mxu0 }
 0x5ea   : > { %v3724_v38 = vpack.c.bf16 %v3659_v51, %v3655_v4  ;;  %v3739_v22 = vmax.bf16 %v8387_v1, %v3723_v29  ;;  %v3663_v24 = vadd.f32 %v3662_v14, %v7924_v60 }
 0x5eb   : > { %v3664_v31 = vpop.f32.mrf.mxu0 }
 0x5ec   : > { %v3740_v5 = vmax.bf16 %v8387_v1, %v3724_v38  ;;  %v3665_v34 = vadd.f32 %v3664_v31, %v7927_v37 }
 0x5ed   : > { %v3666_v21 = vpop.f32.mrf.mxu0 }
 0x5ee   : > { %v3667_v15 = vadd.f32 %v3666_v21, %v7924_v60  ;;  %3999 = vmatprep.mubr.bf16.mxu1 %v3740_v5 }
 0x5ef   : > { %v3668_v3 = vpop.f32.mrf.mxu0  ;;  %4000 = vmatmul.mubr.bf16.gmra.mxu1 %v3739_v22 }
 0x5f0   : > { %v3669_v7 = vadd.f32 %v3668_v3, %v7927_v37  ;;  %v3725_v10 = vpack.c.bf16 %v3667_v15, %v3663_v24 }
 0x5f1   : > { %v3672_v17 = vpop.f32.mrf.mxu0 }
 0x5f2   : > { %v3726_v23 = vpack.c.bf16 %v3669_v7, %v3665_v34  ;;  %v3741_v40 = vmax.bf16 %v8387_v1, %v3725_v10  ;;  %v3673_v46 = vadd.f32 %v3672_v17, %v7924_v60 }
 0x5f3   : > { %v3674_v32 = vpop.f32.mrf.mxu0 }
 0x5f4   : > { %v3742_v0 = vmax.bf16 %v8387_v1, %v3726_v23  ;;  %v3675_v11 = vadd.f32 %v3674_v32, %v7927_v37 }
 0x5f5   : > { %v3676_v57 = vpop.f32.mrf.mxu0 }
 0x5f6   : > { %v3677_v44 = vadd.f32 %v3676_v57, %v7924_v60  ;;  %4009 = vmatprep.mubr.bf16.mxu1 %v3742_v0  ;;  %v5270_v57 = vld [vmem:[#allocation13 + $0x40] sm:$0xff]  }
 0x5f7   : > { %v3678_v55 = vpop.f32.mrf.mxu0  ;;  %4010 = vmatmul.mubr.bf16.gmra.mxu1 %v3741_v40  ;;  %v5271_v40 = vld [vmem:[#allocation13] sm:$0xff]   ;;  %4798 = vmatprep.subr.bf16.mxu0 %v5270_v57 }
 0x5f8   : > { %v3679_v27 = vadd.f32 %v3678_v55, %v7927_v37  ;;  %v3727_v47 = vpack.c.bf16 %v3677_v44, %v3673_v46  ;;  %4799 = vmatpush3.bf16.msra.mxu0 %v5271_v40 }
 0x5f9   : > { %v3682_v25 = vpop.f32.mrf.mxu0 }
 0x5fa   : > { %v3728_v20 = vpack.c.bf16 %v3679_v27, %v3675_v11  ;;  %v3743_v49 = vmax.bf16 %v8387_v1, %v3727_v47  ;;  %v3683_v33 = vadd.f32 %v3682_v25, %v7924_v60 }
 0x5fb   : > { %v3684_v18 = vpop.f32.mrf.mxu0 }
 0x5fc   : > { %v3744_v56 = vmax.bf16 %v8387_v1, %v3728_v20  ;;  %v3685_v19 = vadd.f32 %v3684_v18, %v7927_v37 }
 0x5fd   : > { %v3686_v12 = vpop.f32.mrf.mxu0 }
 0x5fe   : > { %v3687_v50 = vadd.f32 %v3686_v12, %v7924_v60  ;;  %4019 = vmatprep.mubr.bf16.mxu1 %v3744_v56 }
 0x5ff   : > { %v3688_v9 = vpop.f32.mrf.mxu0  ;;  %4020 = vmatmul.mubr.bf16.gmra.mxu1 %v3743_v49 }
 0x600   : > { %v3689_v62 = vadd.f32 %v3688_v9, %v7927_v37  ;;  %v3729_v42 = vpack.c.bf16 %v3687_v50, %v3683_v33 }
 0x601   : > { %v3692_v59 = vpop.f32.mrf.mxu0 }
 0x602   : > { %v3730_v8 = vpack.c.bf16 %v3689_v62, %v3685_v19  ;;  %v3745_v58 = vmax.bf16 %v8387_v1, %v3729_v42  ;;  %v3693_v53 = vadd.f32 %v3692_v59, %v7924_v60 }
 0x603   : > { %v3694_v63 = vpop.f32.mrf.mxu0 }
 0x604   : > { %v3746_v54 = vmax.bf16 %v8387_v1, %v3730_v8  ;;  %v3695_v30 = vadd.f32 %v3694_v63, %v7927_v37 }
 0x605   : > { %v3696_v52 = vpop.f32.mrf.mxu0 }
 0x606   : > { %v3697_v6 = vadd.f32 %v3696_v52, %v7924_v60  ;;  %4029 = vmatprep.mubr.bf16.mxu1 %v3746_v54 }
 0x607   : > { %v3698_v35 = vpop.f32.mrf.mxu0  ;;  %4030 = vmatmul.mubr.bf16.gmra.mxu1 %v3745_v58 }
 0x608   : > { %v3699_v16 = vadd.f32 %v3698_v35, %v7927_v37  ;;  %v3731_v48 = vpack.c.bf16 %v3697_v6, %v3693_v53 }
 0x609   : > { %v3702_v61 = vpop.f32.mrf.mxu0 }
 0x60a   : > { %v3732_v26 = vpack.c.bf16 %v3699_v16, %v3695_v30  ;;  %v3747_v41 = vmax.bf16 %v8387_v1, %v3731_v48  ;;  %v3703_v13 = vadd.f32 %v3702_v61, %v7924_v60 }
 0x60b   : > { %v3704_v45 = vpop.f32.mrf.mxu0 }
 0x60c   : > { %v3748_v39 = vmax.bf16 %v8387_v1, %v3732_v26  ;;  %v3705_v51 = vadd.f32 %v3704_v45, %v7927_v37 }
 0x60d   : > { %v3706_v2 = vpop.f32.mrf.mxu0 }
 0x60e   : > { %v3707_v28 = vadd.f32 %v3706_v2, %v7924_v60  ;;  %4039 = vmatprep.mubr.bf16.mxu1 %v3748_v39 }
 0x60f   : > { %v3708_v4 = vpop.f32.mrf.mxu0  ;;  %4040 = vmatmul.mubr.bf16.gmra.mxu1 %v3747_v41 }
 0x610   : > { %v3709_v29 = vadd.f32 %v3708_v4, %v7927_v37  ;;  %v3733_v14 = vpack.c.bf16 %v3707_v28, %v3703_v13 }
 0x611   : > { %v3712_v38 = vpop.f32.mrf.mxu0 }
 0x612   : > { %v3734_v31 = vpack.c.bf16 %v3709_v29, %v3705_v51  ;;  %v3749_v15 = vmax.bf16 %v8387_v1, %v3733_v14  ;;  %v3713_v3 = vadd.f32 %v3712_v38, %v7924_v60 }
 0x613   : > { %v3714_v5 = vpop.f32.mrf.mxu0 }
 0x614   : > { %v3750_v21 = vmax.bf16 %v8387_v1, %v3734_v31  ;;  %v3715_v7 = vadd.f32 %v3714_v5, %v7927_v37 }
 0x615   : > { %v3716_v22 = vpop.f32.mrf.mxu0 }
 0x616   : > { %v3717_v24 = vadd.f32 %v3716_v22, %v7924_v60  ;;  %4049 = vmatprep.mubr.bf16.mxu1 %v3750_v21  ;;  %v3785_v60 = vld [vmem:[%s8142_s15] sm:$0x3] }
 0x617   : > { %v3718_v34 = vpop.f32.mrf.mxu0  ;;  %4050 = vmatmul.mubr.bf16.gmra.mxu1 %v3749_v15  ;;  %v7981_v46 = vrot.slane %v3785_v60, %v7841_v36  ;;  %v7984_v55 = vrot.slane %v3785_v60, %v7846_v43 }
 0x618   : > { %v3719_v10 = vadd.f32 %v3718_v34, %v7927_v37  ;;  %v3735_v17 = vpack.c.bf16 %v3717_v24, %v3713_v3 }
 0x61a   : > { %v3736_v23 = vpack.c.bf16 %v3719_v10, %v3715_v7  ;;  %v3751_v0 = vmax.bf16 %v8387_v1, %v3735_v17 }
 0x61c   : > { %v3752_v32 = vmax.bf16 %v8387_v1, %v3736_v23 }
 0x61e   : > { %4059 = vmatprep.mubr.bf16.mxu1 %v3752_v32 }
 0x61f   : > { %4060 = vmatmul.mubr.bf16.gmra.mxu1 %v3751_v0 }
 0x6a7   : > { %v3991_v44 = vpop.f32.mrf.mxu1 }
 0x6a8   : > { %v3992_v47 = vadd.f32 %v3991_v44, %v7981_v46 }
 0x6a9   : > { %v3993_v37 = vpop.f32.mrf.mxu1 }
 0x6aa   : > { %v3994_v20 = vadd.f32 %v3993_v37, %v7984_v55 }
 0x6ab   : > { %v3995_v11 = vpop.f32.mrf.mxu1 }
 0x6ac   : > { %v3996_v27 = vadd.f32 %v3995_v11, %v7981_v46 }
 0x6ad   : > { %v3997_v25 = vpop.f32.mrf.mxu1 }
 0x6ae   : > { %v3998_v18 = vadd.f32 %v3997_v25, %v7984_v55  ;;  %v4070_v56 = vpack.c.bf16 %v3996_v27, %v3992_v47 }
 0x6af   : > { %v4001_v12 = vpop.f32.mrf.mxu1 }
 0x6b0   : > { %v4071_v49 = vpack.c.bf16 %v3998_v18, %v3994_v20  ;;  %v4086_v33 = vmax.bf16 %v8387_v1, %v4070_v56  ;;  %v4002_v19 = vadd.f32 %v4001_v12, %v7981_v46 }
 0x6b1   : > { %v4003_v50 = vpop.f32.mrf.mxu1 }
 0x6b2   : > { %v4087_v36 = vmax.bf16 %v8387_v1, %v4071_v49  ;;  %v4004_v42 = vadd.f32 %v4003_v50, %v7984_v55 }
 0x6b3   : > { %v4005_v43 = vpop.f32.mrf.mxu1 }
 0x6b4   : > { %v4006_v9 = vadd.f32 %v4005_v43, %v7981_v46  ;;  %4269 = vmatprep.mubr.bf16.mxu0 %v4087_v36 }
 0x6b5   : > { %v4007_v62 = vpop.f32.mrf.mxu1  ;;  %4270 = vmatmul.mubr.bf16.vlgmr.msra.gmra.mxu0 %v4086_v33 }
 0x6b6   : > { %v4008_v59 = vadd.f32 %v4007_v62, %v7984_v55  ;;  %v4072_v8 = vpack.c.bf16 %v4006_v9, %v4002_v19 }
 0x6b7   : > { %v4011_v63 = vpop.f32.mrf.mxu1 }
 0x6b8   : > { %v4073_v54 = vpack.c.bf16 %v4008_v59, %v4004_v42  ;;  %v4088_v53 = vmax.bf16 %v8387_v1, %v4072_v8  ;;  %v4012_v30 = vadd.f32 %v4011_v63, %v7981_v46 }
 0x6b9   : > { %v4013_v52 = vpop.f32.mrf.mxu1 }
 0x6ba   : > { %v4089_v58 = vmax.bf16 %v8387_v1, %v4073_v54  ;;  %v4014_v48 = vadd.f32 %v4013_v52, %v7984_v55 }
 0x6bb   : > { %v4015_v6 = vpop.f32.mrf.mxu1 }
 0x6bc   : > { %v4016_v35 = vadd.f32 %v4015_v6, %v7981_v46  ;;  %4277 = vmatprep.mubr.bf16.mxu0 %v4089_v58 }
 0x6bd   : > { %v4017_v16 = vpop.f32.mrf.mxu1  ;;  %4278 = vmatmul.mubr.bf16.gmra.mxu0 %v4088_v53 }
 0x6be   : > { %v4018_v61 = vadd.f32 %v4017_v16, %v7984_v55  ;;  %v4074_v26 = vpack.c.bf16 %v4016_v35, %v4012_v30 }
 0x6bf   : > { %v4021_v45 = vpop.f32.mrf.mxu1 }
 0x6c0   : > { %v4075_v39 = vpack.c.bf16 %v4018_v61, %v4014_v48  ;;  %v4090_v13 = vmax.bf16 %v8387_v1, %v4074_v26  ;;  %v4022_v51 = vadd.f32 %v4021_v45, %v7981_v46 }
 0x6c1   : > { %v4023_v2 = vpop.f32.mrf.mxu1 }
 0x6c2   : > { %v4091_v41 = vmax.bf16 %v8387_v1, %v4075_v39  ;;  %v4024_v14 = vadd.f32 %v4023_v2, %v7984_v55 }
 0x6c3   : > { %v4025_v28 = vpop.f32.mrf.mxu1 }
 0x6c4   : > { %v4026_v4 = vadd.f32 %v4025_v28, %v7981_v46  ;;  %4285 = vmatprep.mubr.bf16.mxu0 %v4091_v41 }
 0x6c5   : > { %v4027_v29 = vpop.f32.mrf.mxu1  ;;  %4286 = vmatmul.mubr.bf16.gmra.mxu0 %v4090_v13 }
 0x6c6   : > { %v4028_v38 = vadd.f32 %v4027_v29, %v7984_v55  ;;  %v4076_v31 = vpack.c.bf16 %v4026_v4, %v4022_v51 }
 0x6c7   : > { %v4031_v5 = vpop.f32.mrf.mxu1 }
 0x6c8   : > { %v4077_v21 = vpack.c.bf16 %v4028_v38, %v4024_v14  ;;  %v4092_v3 = vmax.bf16 %v8387_v1, %v4076_v31  ;;  %v4032_v7 = vadd.f32 %v4031_v5, %v7981_v46 }
 0x6c9   : > { %v4033_v22 = vpop.f32.mrf.mxu1 }
 0x6ca   : > { %v4093_v15 = vmax.bf16 %v8387_v1, %v4077_v21  ;;  %v4034_v17 = vadd.f32 %v4033_v22, %v7984_v55 }
 0x6cb   : > { %v4035_v24 = vpop.f32.mrf.mxu1 }
 0x6cc   : > { %v4036_v34 = vadd.f32 %v4035_v24, %v7981_v46  ;;  %4293 = vmatprep.mubr.bf16.mxu0 %v4093_v15 }
 0x6cd   : > { %v4037_v10 = vpop.f32.mrf.mxu1  ;;  %4294 = vmatmul.mubr.bf16.gmra.mxu0 %v4092_v3 }
 0x6ce   : > { %v4038_v23 = vadd.f32 %v4037_v10, %v7984_v55  ;;  %v4078_v32 = vpack.c.bf16 %v4036_v34, %v4032_v7 }
 0x6cf   : > { %v4041_v0 = vpop.f32.mrf.mxu1 }
 0x6d0   : > { %v4079_v57 = vpack.c.bf16 %v4038_v23, %v4034_v17  ;;  %v4094_v37 = vmax.bf16 %v8387_v1, %v4078_v32  ;;  %v4042_v27 = vadd.f32 %v4041_v0, %v7981_v46 }
 0x6d1   : > { %v4043_v40 = vpop.f32.mrf.mxu1 }
 0x6d2   : > { %v4095_v60 = vmax.bf16 %v8387_v1, %v4079_v57  ;;  %v4044_v25 = vadd.f32 %v4043_v40, %v7984_v55 }
 0x6d3   : > { %v4045_v44 = vpop.f32.mrf.mxu1 }
 0x6d4   : > { %v4046_v11 = vadd.f32 %v4045_v44, %v7981_v46  ;;  %4301 = vmatprep.mubr.bf16.mxu0 %v4095_v60 }
 0x6d5   : > { %v4047_v47 = vpop.f32.mrf.mxu1  ;;  %4302 = vmatmul.mubr.bf16.gmra.mxu0 %v4094_v37 }
 0x6d6   : > { %v4048_v20 = vadd.f32 %v4047_v47, %v7984_v55  ;;  %v4080_v18 = vpack.c.bf16 %v4046_v11, %v4042_v27 }
 0x6d7   : > { %v4051_v56 = vpop.f32.mrf.mxu1 }
 0x6d8   : > { %v4081_v12 = vpack.c.bf16 %v4048_v20, %v4044_v25  ;;  %v4096_v33 = vmax.bf16 %v8387_v1, %v4080_v18  ;;  %v4052_v9 = vadd.f32 %v4051_v56, %v7981_v46 }
 0x6d9   : > { %v4053_v49 = vpop.f32.mrf.mxu1 }
 0x6da   : > { %v4097_v50 = vmax.bf16 %v8387_v1, %v4081_v12  ;;  %v4054_v62 = vadd.f32 %v4053_v49, %v7984_v55 }
 0x6db   : > { %v4055_v36 = vpop.f32.mrf.mxu1 }
 0x6dc   : > { %v4056_v43 = vadd.f32 %v4055_v36, %v7981_v46  ;;  %4309 = vmatprep.mubr.bf16.mxu0 %v4097_v50 }
 0x6dd   : > { %v4057_v19 = vpop.f32.mrf.mxu1  ;;  %4310 = vmatmul.mubr.bf16.gmra.mxu0 %v4096_v33 }
 0x6de   : > { %v4058_v42 = vadd.f32 %v4057_v19, %v7984_v55  ;;  %v4082_v59 = vpack.c.bf16 %v4056_v43, %v4052_v9 }
 0x6df   : > { %v4061_v8 = vpop.f32.mrf.mxu1 }
 0x6e0   : > { %v4083_v63 = vpack.c.bf16 %v4058_v42, %v4054_v62  ;;  %v4098_v6 = vmax.bf16 %v8387_v1, %v4082_v59  ;;  %v4062_v35 = vadd.f32 %v4061_v8, %v7981_v46 }
 0x6e1   : > { %v4063_v54 = vpop.f32.mrf.mxu1 }
 0x6e2   : > { %v4099_v52 = vmax.bf16 %v8387_v1, %v4083_v63  ;;  %v4064_v16 = vadd.f32 %v4063_v54, %v7984_v55 }
 0x6e3   : > { %v4065_v58 = vpop.f32.mrf.mxu1 }
 0x6e4   : > { %v4066_v53 = vadd.f32 %v4065_v58, %v7981_v46  ;;  %4317 = vmatprep.mubr.bf16.mxu0 %v4099_v52  ;;  %v8040_v46 = vld [vmem:[%s8144_s17] ss:$0 sm:$0xff] }
 0x6e5   : > { %v4067_v30 = vpop.f32.mrf.mxu1  ;;  %4318 = vmatmul.mubr.bf16.gmra.mxu0 %v4098_v6 }
 0x6e6   : > { %v4068_v48 = vadd.f32 %v4067_v30, %v7984_v55  ;;  %v4084_v61 = vpack.c.bf16 %v4066_v53, %v4062_v35 }
 0x6e8   : > { %v4085_v26 = vpack.c.bf16 %v4068_v48, %v4064_v16  ;;  %v4100_v39 = vmax.bf16 %v8387_v1, %v4084_v61 }
 0x6ea   : > { %v4101_v45 = vmax.bf16 %v8387_v1, %v4085_v26 }
 0x6ec   : > { %4325 = vmatprep.mubr.bf16.mxu0 %v4101_v45 }
 0x6ed   : > { %4326 = vmatmul.mubr.bf16.gmra.mxu0 %v4100_v39 }
 0x775   : > { %v4800_v2 = vpop.f32.mrf.mxu0 }
 0x777   : > { %v4801_v41 = vpop.f32.mrf.mxu0 }
 0x778   : > { %v4802_v28 = vadd.f32 %v4801_v41, %v4800_v2 }
 0x779   : > { %v4803_v55 = vpop.f32.mrf.mxu0 }
 0x77a   : > { %v4272_v13 = vadd.f32 %v4802_v28, %v8040_v46 }
 0x77b   : > { %v4804_v4 = vpop.f32.mrf.mxu0 }
 0x77c   : > { %4334 = vst [vmem:[%s8043_s27] sm:$0xff] %v4272_v13  ;;  %v4805_v1 = vadd.f32 %v4804_v4, %v4803_v55 }
 0x77d   : > { %v4806_v51 = vpop.f32.mrf.mxu0 }
 0x77e   : > { %v4275_v29 = vadd.f32 %v4805_v1, %v8040_v46 }
 0x77f   : > { %v4807_v14 = vpop.f32.mrf.mxu0 }
 0x780   : > { %4335 = vst [vmem:[%s8043_s27 + $0x8] sm:$0xff] %v4275_v29  ;;  %v4808_v38 = vadd.f32 %v4807_v14, %v4806_v51 }
 0x781   : > { %v4809_v31 = vpop.f32.mrf.mxu0 }
 0x782   : > { %v4280_v5 = vadd.f32 %v4808_v38, %v8040_v46 }
 0x783   : > { %v4810_v21 = vpop.f32.mrf.mxu0 }
 0x784   : > { %4336 = vst [vmem:[%s8043_s27 + $0x10] sm:$0xff] %v4280_v5  ;;  %v4811_v22 = vadd.f32 %v4810_v21, %v4809_v31 }
 0x785   : > { %v4812_v15 = vpop.f32.mrf.mxu0 }
 0x786   : > { %v4283_v24 = vadd.f32 %v4811_v22, %v8040_v46 }
 0x787   : > { %v4813_v3 = vpop.f32.mrf.mxu0 }
 0x788   : > { %4337 = vst [vmem:[%s8043_s27 + $0x18] sm:$0xff] %v4283_v24  ;;  %v4814_v34 = vadd.f32 %v4813_v3, %v4812_v15 }
 0x789   : > { %v4815_v7 = vpop.f32.mrf.mxu0 }
 0x78a   : > { %v4288_v10 = vadd.f32 %v4814_v34, %v8040_v46 }
 0x78b   : > { %v4816_v17 = vpop.f32.mrf.mxu0 }
 0x78c   : > { %4338 = vst [vmem:[%s8043_s27 + $0x20] sm:$0xff] %v4288_v10  ;;  %v4817_v23 = vadd.f32 %v4816_v17, %v4815_v7 }
 0x78d   : > { %v4818_v32 = vpop.f32.mrf.mxu0 }
 0x78e   : > { %v4291_v0 = vadd.f32 %v4817_v23, %v8040_v46 }
 0x78f   : > { %v4819_v57 = vpop.f32.mrf.mxu0 }
 0x790   : > { %4339 = vst [vmem:[%s8043_s27 + $0x28] sm:$0xff] %v4291_v0  ;;  %v4820_v40 = vadd.f32 %v4819_v57, %v4818_v32 }
 0x791   : > { %v4821_v60 = vpop.f32.mrf.mxu0 }
 0x792   : > { %v4296_v44 = vadd.f32 %v4820_v40, %v8040_v46 }
 0x793   : > { %v4822_v37 = vpop.f32.mrf.mxu0 }
 0x794   : > { %4340 = vst [vmem:[%s8043_s27 + $0x30] sm:$0xff] %v4296_v44  ;;  %v4823_v11 = vadd.f32 %v4822_v37, %v4821_v60 }
 0x795   : > { %v4824_v27 = vpop.f32.mrf.mxu0 }
 0x796   : > { %v4299_v47 = vadd.f32 %v4823_v11, %v8040_v46 }
 0x797   : > { %v4825_v25 = vpop.f32.mrf.mxu0 }
 0x798   : > { %4341 = vst [vmem:[%s8043_s27 + $0x38] sm:$0xff] %v4299_v47  ;;  %v4826_v20 = vadd.f32 %v4825_v25, %v4824_v27 }
 0x799   : > { %v4827_v18 = vpop.f32.mrf.mxu0 }
 0x79a   : > { %v4304_v56 = vadd.f32 %v4826_v20, %v8040_v46 }
 0x79b   : > { %v4828_v12 = vpop.f32.mrf.mxu0 }
 0x79c   : > { %4342 = vst [vmem:[%s8043_s27 + $0x40] sm:$0xff] %v4304_v56  ;;  %v4829_v49 = vadd.f32 %v4828_v12, %v4827_v18 }
 0x79d   : > { %v4830_v50 = vpop.f32.mrf.mxu0 }
 0x79e   : > { %v4307_v36 = vadd.f32 %v4829_v49, %v8040_v46 }
 0x79f   : > { %v4831_v33 = vpop.f32.mrf.mxu0 }
 0x7a0   : > { %4343 = vst [vmem:[%s8043_s27 + $0x48] sm:$0xff] %v4307_v36  ;;  %v4832_v43 = vadd.f32 %v4831_v33, %v4830_v50 }
 0x7a1   : > { %v4833_v9 = vpop.f32.mrf.mxu0 }
 0x7a2   : > { %v4312_v19 = vadd.f32 %v4832_v43, %v8040_v46 }
 0x7a3   : > { %v4834_v62 = vpop.f32.mrf.mxu0 }
 0x7a4   : > { %4344 = vst [vmem:[%s8043_s27 + $0x50] sm:$0xff] %v4312_v19  ;;  %v4835_v42 = vadd.f32 %v4834_v62, %v4833_v9 }
 0x7a5   : > { %v4836_v59 = vpop.f32.mrf.mxu0 }
 0x7a6   : > { %v4315_v8 = vadd.f32 %v4835_v42, %v8040_v46 }
 0x7a7   : > { %v4837_v63 = vpop.f32.mrf.mxu0 }
 0x7a8   : > { %4345 = vst [vmem:[%s8043_s27 + $0x58] sm:$0xff] %v4315_v8  ;;  %v4838_v54 = vadd.f32 %v4837_v63, %v4836_v59 }
 0x7a9   : > { %v4839_v52 = vpop.f32.mrf.mxu0 }
 0x7aa   : > { %v4320_v58 = vadd.f32 %v4838_v54, %v8040_v46 }
 0x7ab   : > { %v4840_v6 = vpop.f32.mrf.mxu0 }
 0x7ac   : > { %4346 = vst [vmem:[%s8043_s27 + $0x60] sm:$0xff] %v4320_v58  ;;  %v4841_v53 = vadd.f32 %v4840_v6, %v4839_v52 }
 0x7ad   : > { %v4842_v35 = vpop.f32.mrf.mxu0 }
 0x7ae   : > { %v4323_v30 = vadd.f32 %v4841_v53, %v8040_v46 }
 0x7af   : > { %v4843_v16 = vpop.f32.mrf.mxu0 }
 0x7b0   : > { %4347 = vst [vmem:[%s8043_s27 + $0x68] sm:$0xff] %v4323_v30  ;;  %v4844_v48 = vadd.f32 %v4843_v16, %v4842_v35 }
 0x7b1   : > { %v4845_v61 = vpop.f32.mrf.mxu0 }
 0x7b2   : > { %v4328_v26 = vadd.f32 %v4844_v48, %v8040_v46 }
 0x7b3   : > { %v4846_v45 = vpop.f32.mrf.mxu0 }
 0x7b4   : > { %4348 = vst [vmem:[%s8043_s27 + $0x70] sm:$0xff] %v4328_v26  ;;  %v4847_v39 = vadd.f32 %v4846_v45, %v4845_v61 }
 0x7b6   : > { %v4331_v2 = vadd.f32 %v4847_v39, %v8040_v46 }
 0x7b8   : > { %4349 = vst [vmem:[%s8043_s27 + $0x78] sm:$0xff] %v4331_v2 }
 0x7b9   : > { %5597 = shalt.err (!%p5594_p10)
}
 0x7ba   : > { %s5598_s23 = scalar_lea.hbm %s8079_s29, 2048  ;;  %s5602_s19 = scalar_lea.hbm %s8388_s26, 4096 }
 0x7bb   : > { %p5599_p6 = scmp.ne.s32.totalorder %s8079_s29, %s5598_s23  ;;  %p5603_p1 = scmp.lt.s32.totalorder %s8079_s29, %s8388_s26 }
 0x7bc   : > { %p5604_p2 = scmp.lt.s32.totalorder %s5602_s19, %s5598_s23 }
 0x7bd   : > { %p5600_p3 = pnand %p5599_p6, %p8389_p8 }
 0x7be   : > { %p5605_p4 = por %p5604_p2, %p5603_p1 }
 0x7bf   : > { %p5601_p12 = pneg %p5600_p3 }
 0x7c1   : > { %p5606_p9 = pnand %p5605_p4, %p5601_p12 }
 0x7c3   : > { %5609 = shalt.err (!%p5606_p9)
}
 0x7c4   : > { %s5681_s0 = smov 128   ;;  %s5682_s20 = smov 8  }
 0x7c5   : > { %5022 = dma.vmem_to_hbm [thread:$0]  (%p8389_p8), %s8081_s25, 2048, %s8079_s29, %s8087_s30, %s5681_s0, %s5681_s0, %s5682_s20  }
 0x7c6 PF: > { %s8390_s4 = sld [smem:[#allocation22_spill]] }
 0x7c7   : > { %s8391_s18 = sld [smem:[#allocation20_spill]] }
 0x7c8   : > { %s8392_s21 = sld [smem:[#allocation25_spill]] }
 0x7cc   : > { %p5064_p7 = scmp.ge.s32.totalorder %s8390_s4, 2 }
 0x7cd   : > { %s4379_s27 = sand.u32 1, %s8391_s18  }
 0x7ce   : > { %p8393_p11 = scmp.ne.s32.totalorder %s8392_s21, 0  ;;  %s4380_s23 = scalar_lea.sflag [#allocation4], %s4379_s27 }
 0x7d0   : > { %p5047_p0 = pnand %p5064_p7, %p8393_p11 }
 0x7d2   : > { %p5048_p13 = pneg %p5047_p0 }
 0x7d4   : > { %5643 = dma.done.wait (%p5048_p13), %s4380_s23, 2048  }
 0x7d5   : > { %5645 = vsyncadd (%p5048_p13), %s4380_s23, 4294965248  ;;  %s8394_s30 = sld [smem:[#allocation23_spill]]  ;;  %s8397_s27 = smov %s5652_s28 }
 0x7d6   : > { %s8395_s19 = sld [smem:[#allocation21_spill]] }
 0x7d7   : > { %s8396_s29 = sld [smem:[#allocation24_spill]] }
 0x7db   : > { %p32_p5 = scmp.ge.s32.totalorder %s8394_s30, 4  }
 0x7dc   : > { %s8398_s28 = smov %s8395_s19 }
 0x7dd   :  { %34 = sbr.rel (!%p32_p5) target bundleno = 13 (0xd), region = 159 }
 0x7e2   :  { %4385 = vsyncpa [#allocation3], 1 }
 0x7e3   :  { %4387 = vsyncpa [#allocation3 + $0x1], 1 }
 0x7e4   :  { %4388 = vsyncpa [#allocation6], 1 }
 0x7e5   :  { %4389 = vsyncpa [#allocation9], 1 }
 0x7e6   :  { %4390 = vsyncpa [#allocation12], 1 }
 0x7e7   :  { %4391 = vsyncpa [#allocation4], 1 }
 0x7e8   :  { %4393 = vsyncpa [#allocation4 + $0x1], 1 }

</bundles_post_ra>
